<compile_context>
chip_gen: v7x
topology: tpu7x:2x2x1
jax: 0.10.0
libtpu: 0.0.40
codegen_flags: <defaults>
</compile_context>

<pallas_src>
import functools

import jax
import jax.numpy as jnp
from jax.experimental import pallas as pl
from jax.experimental.pallas import tpu as pltpu


# ----------------------------------------------------------------------------
# helpers
# ----------------------------------------------------------------------------
def _round_up(x, m):
    return (x + m - 1) // m * m


def _row_tile(M, target=256):
    """Pick a large row tile (multiple of 8) and the padded row count."""
    m8 = _round_up(M, 8)
    tm = min(target, m8)
    return tm, _round_up(m8, tm)


# ----------------------------------------------------------------------------
# Pallas kernels
# ----------------------------------------------------------------------------
def _cam_kernel(x_ref, w_ref, o_ref):
    # x: (1, C, HW) f32, w: (num_class, C) bf16 -> cam[b] = W @ x[b]  (lane dim = HW)
    x = x_ref[0].astype(jnp.bfloat16)
    o_ref[0] = jnp.dot(w_ref[...], x, preferred_element_type=jnp.float32)


def _mha_ln_kernel(*refs, nhead, eps, shared_kv, has_bias):
    """Fused MHA block for one batch element:
       out = LayerNorm(q_src + OutProj(MHA(q_src+q_pos, kv_src+k_pos, kv_src) [+ bias])).
       (1/sqrt(Dh) scale is pre-folded into Wq / bq.)"""
    i = 0
    q_src_ref = refs[i]; i += 1
    q_pos_ref = refs[i]; i += 1
    if shared_kv:
        kv_src_ref, k_pos_ref = q_src_ref, q_pos_ref
    else:
        kv_src_ref = refs[i]; i += 1
        k_pos_ref = refs[i]; i += 1
    bias_ref = None
    if has_bias:
        bias_ref = refs[i]; i += 1
    (wq_ref, wk_ref, wv_ref, wo_ref,
     bq_ref, bk_ref, bv_ref, bo_ref, g_ref, bl_ref, o_ref) = refs[i:]

    f32, bf16 = jnp.float32, jnp.bfloat16

    x_res = q_src_ref[0]                                   # (Lq, C) residual
    xq = (x_res + q_pos_ref[0]).astype(bf16)
    if shared_kv:
        xk = xq
        xv = x_res.astype(bf16)
    else:
        xk = (kv_src_ref[0] + k_pos_ref[0]).astype(bf16)
        xv = kv_src_ref[0].astype(bf16)

    # fused full-width input projections (bf16 on the MXU, f32 accumulate)
    q = jnp.dot(xq, wq_ref[...], preferred_element_type=f32) + bq_ref[...]
    k = jnp.dot(xk, wk_ref[...], preferred_element_type=f32) + bk_ref[...]
    v = jnp.dot(xv, wv_ref[...], preferred_element_type=f32) + bv_ref[...]

    Lq, C = q.shape
    Dh = C // nhead
    bias = bias_ref[0] if has_bias else None               # (Lq, Lk), shared by all heads

    # per-head attention; the out-projection is folded into the head loop
    # (sum_h o_h @ Wo[h*Dh:(h+1)*Dh, :] == concat(o_h) @ Wo), so no lane concat is needed.
    proj = jnp.zeros((Lq, C), f32)
    for h in range(nhead):
        sl = slice(h * Dh, (h + 1) * Dh)
        qh = q[:, sl].astype(bf16)                          # (Lq, Dh)  (already scaled)
        kh = k[:, sl].astype(bf16)                          # (Lk, Dh)
        vh = v[:, sl].astype(bf16)
        s = jax.lax.dot_general(qh, kh, (((1,), (1,)), ((), ())),
                                preferred_element_type=f32)  # (Lq, Lk)
        if bias is not None:
            s = s + bias
        m = jnp.max(s, axis=-1, keepdims=True)
        p = jnp.exp(s - m)
        inv = pl.reciprocal(jnp.sum(p, axis=-1, keepdims=True), approx=True)
        oh = jnp.dot(p.astype(bf16), vh, preferred_element_type=f32) * inv  # (Lq, Dh)
        proj = proj + jnp.dot(oh.astype(bf16), wo_ref[h], preferred_element_type=f32)
    proj = proj + bo_ref[...]

    # residual + LayerNorm epilogue (fused, no HBM round trip)
    z = x_res + proj
    mu = jnp.mean(z, axis=-1, keepdims=True)
    var = jnp.mean(jnp.square(z - mu), axis=-1, keepdims=True)
    y = (z - mu) * jax.lax.rsqrt(var + eps)
    o_ref[0] = (y * g_ref[...] + bl_ref[...]).astype(o_ref.dtype)


def _ffn_ln_kernel(*refs, eps, double_norm):
    """out = LN(x + linear2(relu(linear1(x)))) over a (tm, C) row tile.
       double_norm=True additionally applies the final decoder LayerNorm (fused)."""
    if double_norm:
        (x_ref, w1_ref, b1_ref, w2_ref, b2_ref,
         g_ref, bl_ref, g2_ref, bl2_ref, o_ref) = refs
    else:
        (x_ref, w1_ref, b1_ref, w2_ref, b2_ref, g_ref, bl_ref, o_ref) = refs
    f32, bf16 = jnp.float32, jnp.bfloat16
    x = x_ref[...]
    h = jnp.dot(x.astype(bf16), w1_ref[...], preferred_element_type=f32) + b1_ref[...]
    h = jnp.maximum(h, 0.0)
    y = jnp.dot(h.astype(bf16), w2_ref[...], preferred_element_type=f32) + b2_ref[...]
    z = x + y
    mu = jnp.mean(z, axis=-1, keepdims=True)
    var = jnp.mean(jnp.square(z - mu), axis=-1, keepdims=True)
    z = (z - mu) * jax.lax.rsqrt(var + eps) * g_ref[...] + bl_ref[...]
    if double_norm:
        mu2 = jnp.mean(z, axis=-1, keepdims=True)
        var2 = jnp.mean(jnp.square(z - mu2), axis=-1, keepdims=True)
        z = (z - mu2) * jax.lax.rsqrt(var2 + eps) * g2_ref[...] + bl2_ref[...]
    o_ref[...] = z.astype(o_ref.dtype)


def _ln_kernel(x_ref, g_ref, b_ref, o_ref, *, eps):
    x = x_ref[...]
    mu = jnp.mean(x, axis=-1, keepdims=True)
    var = jnp.mean(jnp.square(x - mu), axis=-1, keepdims=True)
    o_ref[...] = ((x - mu) * jax.lax.rsqrt(var + eps) * g_ref[...] + b_ref[...]).astype(o_ref.dtype)


# ----------------------------------------------------------------------------
# Kernel wrappers
# ----------------------------------------------------------------------------
def cam_bias(src_flat, cam_w):
    """cam_mask: (B, num_class, HW) = cam_w @ src[b]  (== CAMMask without the unused sigmoid path)."""
    B, C, HW = src_flat.shape
    NC = cam_w.shape[0]
    return pl.pallas_call(
        _cam_kernel,
        out_shape=jax.ShapeDtypeStruct((B, NC, HW), jnp.float32),
        grid=(B,),
        in_specs=[
            pl.BlockSpec((1, C, HW), lambda b: (b, 0, 0)),
            pl.BlockSpec((NC, C), lambda b: (0, 0)),
        ],
        out_specs=pl.BlockSpec((1, NC, HW), lambda b: (b, 0, 0)),
        compiler_params=pltpu.CompilerParams(dimension_semantics=("parallel",)),
    )(src_flat, cam_w)


def mha_ln(q_src, q_pos, mp, ln, nhead, kv_src=None, k_pos=None, bias=None, eps=1e-5):
    """Fused attention block. shared_kv (kv_src is None): key = q_src+q_pos, value = q_src."""
    B, Lq, C = q_src.shape
    Dh = C // nhead
    gamma, beta = ln
    shared_kv = kv_src is None
    Lk = Lq if shared_kv else kv_src.shape[1]

    seq_q = pl.BlockSpec((1, Lq, C), lambda b: (b, 0, 0))
    seq_k = pl.BlockSpec((1, Lk, C), lambda b: (b, 0, 0))
    w_spec = pl.BlockSpec((C, C), lambda b: (0, 0))
    wo_spec = pl.BlockSpec((nhead, Dh, C), lambda b: (0, 0, 0))
    vec = pl.BlockSpec((1, C), lambda b: (0, 0))

    operands = [q_src, q_pos]
    specs = [seq_q, seq_q]
    if not shared_kv:
        operands += [kv_src, k_pos]
        specs += [seq_k, seq_k]
    if bias is not None:                                    # (B, Lq, Lk): one block per batch,
        operands.append(bias)                               # broadcast over heads in-kernel
        specs.append(pl.BlockSpec((1, Lq, Lk), lambda b: (b, 0, 0)))
    operands += [mp["wq"], mp["wk"], mp["wv"], mp["wo"],
                 mp["bq"], mp["bk"], mp["bv"], mp["bo"], gamma, beta]
    specs += [w_spec, w_spec, w_spec, wo_spec] + [vec] * 6

    kern = functools.partial(_mha_ln_kernel, nhead=nhead, eps=eps,
                             shared_kv=shared_kv, has_bias=bias is not None)
    return pl.pallas_call(
        kern,
        out_shape=jax.ShapeDtypeStruct((B, Lq, C), jnp.float32),
        grid=(B,),
        in_specs=specs,
        out_specs=pl.BlockSpec((1, Lq, C), lambda b: (b, 0, 0)),
        compiler_params=pltpu.CompilerParams(dimension_semantics=("parallel",)),
    )(*operands)


def ffn_ln(x, fp, ln, ln2=None, eps=1e-5):
    """Fused FFN + residual + LayerNorm (optionally followed by a second fused LayerNorm)."""
    B, L, C = x.shape
    gamma, beta = ln
    M = B * L
    Fh = fp["w1"].shape[1]
    x2 = x.reshape(M, C)
    tm, Mp = _row_tile(M)
    if Mp != M:
        x2 = jnp.pad(x2, ((0, Mp - M), (0, 0)))

    vec_c = pl.BlockSpec((1, C), lambda i: (0, 0))
    operands = [x2, fp["w1"], fp["b1"], fp["w2"], fp["b2"], gamma, beta]
    specs = [
        pl.BlockSpec((tm, C), lambda i: (i, 0)),
        pl.BlockSpec((C, Fh), lambda i: (0, 0)),
        pl.BlockSpec((1, Fh), lambda i: (0, 0)),
        pl.BlockSpec((Fh, C), lambda i: (0, 0)),
        vec_c, vec_c, vec_c,
    ]
    if ln2 is not None:
        operands += [ln2[0], ln2[1]]
        specs += [vec_c, vec_c]

    out = pl.pallas_call(
        functools.partial(_ffn_ln_kernel, eps=eps, double_norm=ln2 is not None),
        out_shape=jax.ShapeDtypeStruct((Mp, C), jnp.float32),
        grid=(Mp // tm,),
        in_specs=specs,
        out_specs=pl.BlockSpec((tm, C), lambda i: (i, 0)),
        compiler_params=pltpu.CompilerParams(dimension_semantics=("parallel",)),
    )(*operands)
    return out[:M].reshape(B, L, C)


def layernorm(x, ln, eps=1e-5):
    B, L, C = x.shape
    gamma, beta = ln
    M = B * L
    x2 = x.reshape(M, C)
    tm, Mp = _row_tile(M)
    if Mp != M:
        x2 = jnp.pad(x2, ((0, Mp - M), (0, 0)))
    out = pl.pallas_call(
        functools.partial(_ln_kernel, eps=eps),
        out_shape=jax.ShapeDtypeStruct((Mp, C), jnp.float32),
        grid=(Mp // tm,),
        in_specs=[
            pl.BlockSpec((tm, C), lambda i: (i, 0)),
            pl.BlockSpec((1, C), lambda i: (0, 0)),
            pl.BlockSpec((1, C), lambda i: (0, 0)),
        ],
        out_specs=pl.BlockSpec((tm, C), lambda i: (i, 0)),
        compiler_params=pltpu.CompilerParams(dimension_semantics=("parallel",)),
    )(x2, gamma, beta)
    return out[:M].reshape(B, L, C)


# ----------------------------------------------------------------------------
# Forward pass
# ----------------------------------------------------------------------------
def transformer_forward(params, src, query_embed, pos_embed, *, nhead):
    B, C, H, W = src.shape
    HW = H * W
    src_flat = src.reshape(B, C, HW)

    # CAMMask: cam = (src.view(B,C,HW).permute(0,2,1) @ fc_w.T).permute(0,2,1)
    cam_mask = cam_bias(src_flat, params["cam_weight"])           # (B, num_class, HW)

    memory = src_flat.transpose(0, 2, 1)                          # (B, HW, C)
    pos = pos_embed.reshape(B, C, HW).transpose(0, 2, 1)          # (B, HW, C)
    Nq = query_embed.shape[0]
    q_embed = jnp.broadcast_to(query_embed[None], (B, Nq, C)).astype(jnp.float32)

    # ---- encoder
    for lp in params["enc_layers"]:
        memory = mha_ln(memory, pos, lp["self_attn"], lp["norm1"], nhead)
        memory = ffn_ln(memory, lp["ffn"], lp["norm2"])

    # ---- decoder (self_attn/norm1/dropout1 were deleted by rm_self_attn_dec_func)
    tgt = jnp.zeros((B, Nq, C), jnp.float32)
    n_dec = len(params["dec_layers"])
    for li, lp in enumerate(params["dec_layers"]):
        # TODO(synk): MA.multi_head_attention_forward is undefined in the reference source;
        # cam_mask is applied as an additive per-head bias on the cross-attention logits.
        tgt = mha_ln(tgt, q_embed, lp["cross_attn_sy"], lp["norm2"], nhead,
                     kv_src=memory, k_pos=pos, bias=cam_mask)
        tgt = mha_ln(tgt, q_embed, lp["self_attn2"], lp["norm3"], nhead)
        # final decoder LayerNorm is fused into the last layer's FFN kernel
        last = li == n_dec - 1
        tgt = ffn_ln(tgt, lp["ffn"], lp["norm4"],
                     ln2=params["decoder_norm"] if last else None)
    if n_dec == 0:
        tgt = layernorm(tgt, params["decoder_norm"])

    hs = tgt[None]                                                # (1, B, Nq, C)  == hs.transpose(1,2)
    mem_out = memory.transpose(0, 2, 1).reshape(B, C, H, W)
    return hs, mem_out


# ----------------------------------------------------------------------------
# Parameters: PyTorch-layout init + one-time preparation (transpose/split/bf16-cast)
# ----------------------------------------------------------------------------
def init_params(key, d_model, nhead, dff, num_enc, num_dec, num_class):
    keys = iter(jax.random.split(key, 256))

    def dense(shape, scale=0.05):
        return jax.random.normal(next(keys), shape, jnp.float32) * scale

    def mha_p():
        return dict(
            in_proj_weight=dense((3 * d_model, d_model)),
            in_proj_bias=jnp.zeros((3 * d_model,), jnp.float32),
            out_proj_weight=dense((d_model, d_model)),
            out_proj_bias=jnp.zeros((d_model,), jnp.float32),
        )

    def ln_p():
        return (jnp.ones((d_model,), jnp.float32), jnp.zeros((d_model,), jnp.float32))

    enc_layers = [
        dict(self_attn=mha_p(),
             linear1_w=dense((dff, d_model)), linear1_b=jnp.zeros((dff,), jnp.float32),
             linear2_w=dense((d_model, dff)), linear2_b=jnp.zeros((d_model,), jnp.float32),
             norm1=ln_p(), norm2=ln_p())
        for _ in range(num_enc)
    ]
    dec_layers = [
        dict(cross_attn_sy=mha_p(), self_attn2=mha_p(),
             linear1_w=dense((dff, d_model)), linear1_b=jnp.zeros((dff,), jnp.float32),
             linear2_w=dense((d_model, dff)), linear2_b=jnp.zeros((d_model,), jnp.float32),
             norm2=ln_p(), norm3=ln_p(), norm4=ln_p())
        for _ in range(num_dec)
    ]
    return dict(enc_layers=enc_layers, dec_layers=dec_layers, decoder_norm=ln_p(),
                cam_weight=dense((num_class, d_model)))   # nn.Linear(d_model, num_class, bias=False)


def prepare_params(raw, d_model, nhead):
    """One-time weight prep: transpose to (in, out), split out-proj per head, fold the
       1/sqrt(Dh) attention scale into Wq/bq, cast matmul operands to bf16."""
    C = d_model
    Dh = C // nhead
    scale = 1.0 / (Dh ** 0.5)
    bf = jnp.bfloat16

    def prep_mha(p):
        w_in, b_in = p["in_proj_weight"], p["in_proj_bias"]
        wo_t = p["out_proj_weight"].T                      # (C_in, C_out): attn @ wo_t
        return dict(
            wq=(w_in[:C].T * scale).astype(bf),            # scale folded into Wq / bq
            wk=w_in[C:2 * C].T.astype(bf),
            wv=w_in[2 * C:].T.astype(bf),
            bq=(b_in[:C] * scale).reshape(1, C),
            bk=b_in[C:2 * C].reshape(1, C),
            bv=b_in[2 * C:].reshape(1, C),
            wo=wo_t.reshape(nhead, Dh, C).astype(bf),
            bo=p["out_proj_bias"].reshape(1, C),
        )

    def prep_ln(ln):
        g, b = ln
        return (g.reshape(1, -1).astype(jnp.float32), b.reshape(1, -1).astype(jnp.float32))

    def prep_ffn(lp):
        return dict(w1=lp["linear1_w"].T.astype(bf), b1=lp["linear1_b"].reshape(1, -1),
                    w2=lp["linear2_w"].T.astype(bf), b2=lp["linear2_b"].reshape(1, -1))

    enc = [dict(self_attn=prep_mha(lp["self_attn"]), ffn=prep_ffn(lp),
                norm1=prep_ln(lp["norm1"]), norm2=prep_ln(lp["norm2"]))
           for lp in raw["enc_layers"]]
    dec = [dict(cross_attn_sy=prep_mha(lp["cross_attn_sy"]), self_attn2=prep_mha(lp["self_attn2"]),
                ffn=prep_ffn(lp), norm2=prep_ln(lp["norm2"]),
                norm3=prep_ln(lp["norm3"]), norm4=prep_ln(lp["norm4"]))
           for lp in raw["dec_layers"]]
    return dict(enc_layers=enc, dec_layers=dec, decoder_norm=prep_ln(raw["decoder_norm"]),
                cam_weight=raw["cam_weight"].astype(bf))


# ----------------------------------------------------------------------------
if __name__ == "__main__":
    d_model, nhead, dff = 32, 4, 64
    num_enc, num_dec = 2, 2
    num_class = 8          # also the number of decoder queries (cam_mask lines up)
    B, H, W = 2, 4, 4

    key = jax.random.PRNGKey(0)
    k1, k2, k3, kp = jax.random.split(key, 4)
    src = jax.random.normal(k1, (B, d_model, H, W), jnp.float32)
    pos_embed = jax.random.normal(k2, (B, d_model, H, W), jnp.float32)
    query_embed = jax.random.normal(k3, (num_class, d_model), jnp.float32)

    raw_params = init_params(kp, d_model, nhead, dff, num_enc, num_dec, num_class)
    params = prepare_params(raw_params, d_model, nhead)   # one-time transpose/split/bf16 cast

    fwd = jax.jit(functools.partial(transformer_forward, nhead=nhead))
    hs, mem = fwd(params, src, query_embed, pos_embed)
    jax.block_until_ready((hs, mem))

    assert hs.shape == (1, B, num_class, d_model), hs.shape
    assert mem.shape == (B, d_model, H, W), mem.shape
    print("KERNEL_OK")
</pallas_src>

<mosaic_0001>
module attributes {stable_mosaic.version = 11 : i64} {
  func.func @_mha_ln_kernel(%arg0: i32, %arg1: memref<1x16x32xf32, #tpu.memory_space<vmem>>, %arg2: memref<1x16x32xf32, #tpu.memory_space<vmem>>, %arg3: memref<32x32xbf16, #tpu.memory_space<vmem>>, %arg4: memref<32x32xbf16, #tpu.memory_space<vmem>>, %arg5: memref<32x32xbf16, #tpu.memory_space<vmem>>, %arg6: memref<4x8x32xbf16, #tpu.memory_space<vmem>>, %arg7: memref<1x32xf32, #tpu.memory_space<vmem>>, %arg8: memref<1x32xf32, #tpu.memory_space<vmem>>, %arg9: memref<1x32xf32, #tpu.memory_space<vmem>>, %arg10: memref<1x32xf32, #tpu.memory_space<vmem>>, %arg11: memref<1x32xf32, #tpu.memory_space<vmem>>, %arg12: memref<1x32xf32, #tpu.memory_space<vmem>>, %arg13: memref<1x16x32xf32, #tpu.memory_space<vmem>>) attributes {dimension_semantics = [#tpu.dimension_semantics<parallel>], iteration_bounds = array<i64: 2>, scalar_prefetch = 0 : i64, scratch_operands = 0 : i64, tpu.core_type = #tpu.core_type<tc>, window_params = [{transform_indices = @transform_0, window_bounds = array<i64: 1, 16, 32>}, {transform_indices = @transform_1, window_bounds = array<i64: 1, 16, 32>}, {pipeline_mode = #tpu.pipeline_mode<synchronous>, transform_indices = @transform_2, window_bounds = array<i64: 32, 32>}, {pipeline_mode = #tpu.pipeline_mode<synchronous>, transform_indices = @transform_3, window_bounds = array<i64: 32, 32>}, {pipeline_mode = #tpu.pipeline_mode<synchronous>, transform_indices = @transform_4, window_bounds = array<i64: 32, 32>}, {pipeline_mode = #tpu.pipeline_mode<synchronous>, transform_indices = @transform_5, window_bounds = array<i64: 4, 8, 32>}, {pipeline_mode = #tpu.pipeline_mode<synchronous>, transform_indices = @transform_6, window_bounds = array<i64: 1, 32>}, {pipeline_mode = #tpu.pipeline_mode<synchronous>, transform_indices = @transform_7, window_bounds = array<i64: 1, 32>}, {pipeline_mode = #tpu.pipeline_mode<synchronous>, transform_indices = @transform_8, window_bounds = array<i64: 1, 32>}, {pipeline_mode = #tpu.pipeline_mode<synchronous>, transform_indices = @transform_9, window_bounds = array<i64: 1, 32>}, {pipeline_mode = #tpu.pipeline_mode<synchronous>, transform_indices = @transform_10, window_bounds = array<i64: 1, 32>}, {pipeline_mode = #tpu.pipeline_mode<synchronous>, transform_indices = @transform_11, window_bounds = array<i64: 1, 32>}, {transform_indices = @transform_12, window_bounds = array<i64: 1, 16, 32>}]} {
    %c0 = arith.constant 0 : index
    %c0_0 = arith.constant 0 : index
    %c0_1 = arith.constant 0 : index
    %0 = vector.load %arg1[%c0, %c0_0, %c0_1] : memref<1x16x32xf32, #tpu.memory_space<vmem>>, vector<1x16x32xf32>
    %1 = vector.shape_cast %0 : vector<1x16x32xf32> to vector<16x32xf32>
    %c0_2 = arith.constant 0 : index
    %c0_3 = arith.constant 0 : index
    %c0_4 = arith.constant 0 : index
    %2 = vector.load %arg2[%c0_2, %c0_3, %c0_4] : memref<1x16x32xf32, #tpu.memory_space<vmem>>, vector<1x16x32xf32>
    %3 = vector.shape_cast %2 : vector<1x16x32xf32> to vector<16x32xf32>
    %4 = arith.addf %1, %3 : vector<16x32xf32>
    %5 = arith.truncf %4 : vector<16x32xf32> to vector<16x32xbf16>
    %6 = arith.truncf %1 : vector<16x32xf32> to vector<16x32xbf16>
    %c0_5 = arith.constant 0 : index
    %c0_6 = arith.constant 0 : index
    %7 = vector.load %arg3[%c0_5, %c0_6] : memref<32x32xbf16, #tpu.memory_space<vmem>>, vector<32x32xbf16>
    %cst = arith.constant dense<0.000000e+00> : vector<16x32xf32>
    %8 = tpu.matmul %5, %7, %cst {dimension_numbers = #tpu.dot_dimension_numbers<[1], [0], [0], [1], [0, 0, 1, 1], [], []>} : vector<16x32xbf16>, vector<32x32xbf16>, vector<16x32xf32> -> vector<16x32xf32>
    %c0_7 = arith.constant 0 : index
    %c0_8 = arith.constant 0 : index
    %9 = vector.load %arg7[%c0_7, %c0_8] : memref<1x32xf32, #tpu.memory_space<vmem>>, vector<1x32xf32>
    %10 = vector.broadcast %9 : vector<1x32xf32> to vector<16x32xf32>
    %11 = arith.addf %8, %10 : vector<16x32xf32>
    %c0_9 = arith.constant 0 : index
    %c0_10 = arith.constant 0 : index
    %12 = vector.load %arg4[%c0_9, %c0_10] : memref<32x32xbf16, #tpu.memory_space<vmem>>, vector<32x32xbf16>
    %cst_11 = arith.constant dense<0.000000e+00> : vector<16x32xf32>
    %13 = tpu.matmul %5, %12, %cst_11 {dimension_numbers = #tpu.dot_dimension_numbers<[1], [0], [0], [1], [0, 0, 1, 1], [], []>} : vector<16x32xbf16>, vector<32x32xbf16>, vector<16x32xf32> -> vector<16x32xf32>
    %c0_12 = arith.constant 0 : index
    %c0_13 = arith.constant 0 : index
    %14 = vector.load %arg8[%c0_12, %c0_13] : memref<1x32xf32, #tpu.memory_space<vmem>>, vector<1x32xf32>
    %15 = vector.broadcast %14 : vector<1x32xf32> to vector<16x32xf32>
    %16 = arith.addf %13, %15 : vector<16x32xf32>
    %c0_14 = arith.constant 0 : index
    %c0_15 = arith.constant 0 : index
    %17 = vector.load %arg5[%c0_14, %c0_15] : memref<32x32xbf16, #tpu.memory_space<vmem>>, vector<32x32xbf16>
    %cst_16 = arith.constant dense<0.000000e+00> : vector<16x32xf32>
    %18 = tpu.matmul %6, %17, %cst_16 {dimension_numbers = #tpu.dot_dimension_numbers<[1], [0], [0], [1], [0, 0, 1, 1], [], []>} : vector<16x32xbf16>, vector<32x32xbf16>, vector<16x32xf32> -> vector<16x32xf32>
    %c0_17 = arith.constant 0 : index
    %c0_18 = arith.constant 0 : index
    %19 = vector.load %arg9[%c0_17, %c0_18] : memref<1x32xf32, #tpu.memory_space<vmem>>, vector<1x32xf32>
    %20 = vector.broadcast %19 : vector<1x32xf32> to vector<16x32xf32>
    %21 = arith.addf %18, %20 : vector<16x32xf32>
    %cst_19 = arith.constant 0.000000e+00 : f32
    %22 = vector.broadcast %cst_19 : f32 to vector<16x32xf32>
    %23 = vector.extract_strided_slice %11 {offsets = [0, 0], sizes = [16, 8], strides = [1, 1]} : vector<16x32xf32> to vector<16x8xf32>
    %24 = arith.truncf %23 : vector<16x8xf32> to vector<16x8xbf16>
    %25 = vector.extract_strided_slice %16 {offsets = [0, 0], sizes = [16, 8], strides = [1, 1]} : vector<16x32xf32> to vector<16x8xf32>
    %26 = arith.truncf %25 : vector<16x8xf32> to vector<16x8xbf16>
    %27 = vector.extract_strided_slice %21 {offsets = [0, 0], sizes = [16, 8], strides = [1, 1]} : vector<16x32xf32> to vector<16x8xf32>
    %28 = arith.truncf %27 : vector<16x8xf32> to vector<16x8xbf16>
    %cst_20 = arith.constant dense<0.000000e+00> : vector<16x16xf32>
    %29 = tpu.matmul %24, %26, %cst_20 {dimension_numbers = #tpu.dot_dimension_numbers<[1], [1], [0], [0], [0, 0, 1, 0], [], []>} : vector<16x8xbf16>, vector<16x8xbf16>, vector<16x16xf32> -> vector<16x16xf32>
    %cst_21 = arith.constant dense<0xFF800000> : vector<16xf32>
    %30 = vector.multi_reduction <maximumf>, %29, %cst_21 [1] : vector<16x16xf32> to vector<16xf32>
    %31 = vector.shape_cast %30 : vector<16xf32> to vector<16x1xf32>
    %32 = vector.broadcast %31 : vector<16x1xf32> to vector<16x16xf32>
    %33 = arith.subf %29, %32 : vector<16x16xf32>
    %34 = math.exp %33 : vector<16x16xf32>
    %cst_22 = arith.constant dense<0.000000e+00> : vector<16xf32>
    %35 = vector.multi_reduction <add>, %34, %cst_22 [1] : vector<16x16xf32> to vector<16xf32>
    %36 = vector.shape_cast %35 : vector<16xf32> to vector<16x1xf32>
    %37 = tpu.reciprocal %36 {approx = true} : vector<16x1xf32> -> vector<16x1xf32>
    %38 = arith.truncf %34 : vector<16x16xf32> to vector<16x16xbf16>
    %cst_23 = arith.constant dense<0.000000e+00> : vector<16x8xf32>
    %39 = tpu.matmul %38, %28, %cst_23 {dimension_numbers = #tpu.dot_dimension_numbers<[1], [0], [0], [1], [0, 0, 1, 1], [], []>} : vector<16x16xbf16>, vector<16x8xbf16>, vector<16x8xf32> -> vector<16x8xf32>
    %40 = vector.broadcast %37 : vector<16x1xf32> to vector<16x8xf32>
    %41 = arith.mulf %39, %40 : vector<16x8xf32>
    %42 = arith.truncf %41 : vector<16x8xf32> to vector<16x8xbf16>
    %c0_24 = arith.constant 0 : index
    %c0_25 = arith.constant 0 : index
    %c0_26 = arith.constant 0 : index
    %43 = vector.load %arg6[%c0_24, %c0_25, %c0_26] : memref<4x8x32xbf16, #tpu.memory_space<vmem>>, vector<1x8x32xbf16>
    %44 = vector.shape_cast %43 : vector<1x8x32xbf16> to vector<8x32xbf16>
    %cst_27 = arith.constant dense<0.000000e+00> : vector<16x32xf32>
    %45 = tpu.matmul %42, %44, %cst_27 {dimension_numbers = #tpu.dot_dimension_numbers<[1], [0], [0], [1], [0, 0, 1, 1], [], []>} : vector<16x8xbf16>, vector<8x32xbf16>, vector<16x32xf32> -> vector<16x32xf32>
    %46 = arith.addf %22, %45 : vector<16x32xf32>
    %47 = vector.extract_strided_slice %11 {offsets = [0, 8], sizes = [16, 8], strides = [1, 1]} : vector<16x32xf32> to vector<16x8xf32>
    %48 = arith.truncf %47 : vector<16x8xf32> to vector<16x8xbf16>
    %49 = vector.extract_strided_slice %16 {offsets = [0, 8], sizes = [16, 8], strides = [1, 1]} : vector<16x32xf32> to vector<16x8xf32>
    %50 = arith.truncf %49 : vector<16x8xf32> to vector<16x8xbf16>
    %51 = vector.extract_strided_slice %21 {offsets = [0, 8], sizes = [16, 8], strides = [1, 1]} : vector<16x32xf32> to vector<16x8xf32>
    %52 = arith.truncf %51 : vector<16x8xf32> to vector<16x8xbf16>
    %cst_28 = arith.constant dense<0.000000e+00> : vector<16x16xf32>
    %53 = tpu.matmul %48, %50, %cst_28 {dimension_numbers = #tpu.dot_dimension_numbers<[1], [1], [0], [0], [0, 0, 1, 0], [], []>} : vector<16x8xbf16>, vector<16x8xbf16>, vector<16x16xf32> -> vector<16x16xf32>
    %cst_29 = arith.constant dense<0xFF800000> : vector<16xf32>
    %54 = vector.multi_reduction <maximumf>, %53, %cst_29 [1] : vector<16x16xf32> to vector<16xf32>
    %55 = vector.shape_cast %54 : vector<16xf32> to vector<16x1xf32>
    %56 = vector.broadcast %55 : vector<16x1xf32> to vector<16x16xf32>
    %57 = arith.subf %53, %56 : vector<16x16xf32>
    %58 = math.exp %57 : vector<16x16xf32>
    %cst_30 = arith.constant dense<0.000000e+00> : vector<16xf32>
    %59 = vector.multi_reduction <add>, %58, %cst_30 [1] : vector<16x16xf32> to vector<16xf32>
    %60 = vector.shape_cast %59 : vector<16xf32> to vector<16x1xf32>
    %61 = tpu.reciprocal %60 {approx = true} : vector<16x1xf32> -> vector<16x1xf32>
    %62 = arith.truncf %58 : vector<16x16xf32> to vector<16x16xbf16>
    %cst_31 = arith.constant dense<0.000000e+00> : vector<16x8xf32>
    %63 = tpu.matmul %62, %52, %cst_31 {dimension_numbers = #tpu.dot_dimension_numbers<[1], [0], [0], [1], [0, 0, 1, 1], [], []>} : vector<16x16xbf16>, vector<16x8xbf16>, vector<16x8xf32> -> vector<16x8xf32>
    %64 = vector.broadcast %61 : vector<16x1xf32> to vector<16x8xf32>
    %65 = arith.mulf %63, %64 : vector<16x8xf32>
    %66 = arith.truncf %65 : vector<16x8xf32> to vector<16x8xbf16>
    %c1 = arith.constant 1 : index
    %c0_32 = arith.constant 0 : index
    %c0_33 = arith.constant 0 : index
    %67 = vector.load %arg6[%c1, %c0_32, %c0_33] : memref<4x8x32xbf16, #tpu.memory_space<vmem>>, vector<1x8x32xbf16>
    %68 = vector.shape_cast %67 : vector<1x8x32xbf16> to vector<8x32xbf16>
    %cst_34 = arith.constant dense<0.000000e+00> : vector<16x32xf32>
    %69 = tpu.matmul %66, %68, %cst_34 {dimension_numbers = #tpu.dot_dimension_numbers<[1], [0], [0], [1], [0, 0, 1, 1], [], []>} : vector<16x8xbf16>, vector<8x32xbf16>, vector<16x32xf32> -> vector<16x32xf32>
    %70 = arith.addf %46, %69 : vector<16x32xf32>
    %71 = vector.extract_strided_slice %11 {offsets = [0, 16], sizes = [16, 8], strides = [1, 1]} : vector<16x32xf32> to vector<16x8xf32>
    %72 = arith.truncf %71 : vector<16x8xf32> to vector<16x8xbf16>
    %73 = vector.extract_strided_slice %16 {offsets = [0, 16], sizes = [16, 8], strides = [1, 1]} : vector<16x32xf32> to vector<16x8xf32>
    %74 = arith.truncf %73 : vector<16x8xf32> to vector<16x8xbf16>
    %75 = vector.extract_strided_slice %21 {offsets = [0, 16], sizes = [16, 8], strides = [1, 1]} : vector<16x32xf32> to vector<16x8xf32>
    %76 = arith.truncf %75 : vector<16x8xf32> to vector<16x8xbf16>
    %cst_35 = arith.constant dense<0.000000e+00> : vector<16x16xf32>
    %77 = tpu.matmul %72, %74, %cst_35 {dimension_numbers = #tpu.dot_dimension_numbers<[1], [1], [0], [0], [0, 0, 1, 0], [], []>} : vector<16x8xbf16>, vector<16x8xbf16>, vector<16x16xf32> -> vector<16x16xf32>
    %cst_36 = arith.constant dense<0xFF800000> : vector<16xf32>
    %78 = vector.multi_reduction <maximumf>, %77, %cst_36 [1] : vector<16x16xf32> to vector<16xf32>
    %79 = vector.shape_cast %78 : vector<16xf32> to vector<16x1xf32>
    %80 = vector.broadcast %79 : vector<16x1xf32> to vector<16x16xf32>
    %81 = arith.subf %77, %80 : vector<16x16xf32>
    %82 = math.exp %81 : vector<16x16xf32>
    %cst_37 = arith.constant dense<0.000000e+00> : vector<16xf32>
    %83 = vector.multi_reduction <add>, %82, %cst_37 [1] : vector<16x16xf32> to vector<16xf32>
    %84 = vector.shape_cast %83 : vector<16xf32> to vector<16x1xf32>
    %85 = tpu.reciprocal %84 {approx = true} : vector<16x1xf32> -> vector<16x1xf32>
    %86 = arith.truncf %82 : vector<16x16xf32> to vector<16x16xbf16>
    %cst_38 = arith.constant dense<0.000000e+00> : vector<16x8xf32>
    %87 = tpu.matmul %86, %76, %cst_38 {dimension_numbers = #tpu.dot_dimension_numbers<[1], [0], [0], [1], [0, 0, 1, 1], [], []>} : vector<16x16xbf16>, vector<16x8xbf16>, vector<16x8xf32> -> vector<16x8xf32>
    %88 = vector.broadcast %85 : vector<16x1xf32> to vector<16x8xf32>
    %89 = arith.mulf %87, %88 : vector<16x8xf32>
    %90 = arith.truncf %89 : vector<16x8xf32> to vector<16x8xbf16>
    %c2 = arith.constant 2 : index
    %c0_39 = arith.constant 0 : index
    %c0_40 = arith.constant 0 : index
    %91 = vector.load %arg6[%c2, %c0_39, %c0_40] : memref<4x8x32xbf16, #tpu.memory_space<vmem>>, vector<1x8x32xbf16>
    %92 = vector.shape_cast %91 : vector<1x8x32xbf16> to vector<8x32xbf16>
    %cst_41 = arith.constant dense<0.000000e+00> : vector<16x32xf32>
    %93 = tpu.matmul %90, %92, %cst_41 {dimension_numbers = #tpu.dot_dimension_numbers<[1], [0], [0], [1], [0, 0, 1, 1], [], []>} : vector<16x8xbf16>, vector<8x32xbf16>, vector<16x32xf32> -> vector<16x32xf32>
    %94 = arith.addf %70, %93 : vector<16x32xf32>
    %95 = vector.extract_strided_slice %11 {offsets = [0, 24], sizes = [16, 8], strides = [1, 1]} : vector<16x32xf32> to vector<16x8xf32>
    %96 = arith.truncf %95 : vector<16x8xf32> to vector<16x8xbf16>
    %97 = vector.extract_strided_slice %16 {offsets = [0, 24], sizes = [16, 8], strides = [1, 1]} : vector<16x32xf32> to vector<16x8xf32>
    %98 = arith.truncf %97 : vector<16x8xf32> to vector<16x8xbf16>
    %99 = vector.extract_strided_slice %21 {offsets = [0, 24], sizes = [16, 8], strides = [1, 1]} : vector<16x32xf32> to vector<16x8xf32>
    %100 = arith.truncf %99 : vector<16x8xf32> to vector<16x8xbf16>
    %cst_42 = arith.constant dense<0.000000e+00> : vector<16x16xf32>
    %101 = tpu.matmul %96, %98, %cst_42 {dimension_numbers = #tpu.dot_dimension_numbers<[1], [1], [0], [0], [0, 0, 1, 0], [], []>} : vector<16x8xbf16>, vector<16x8xbf16>, vector<16x16xf32> -> vector<16x16xf32>
    %cst_43 = arith.constant dense<0xFF800000> : vector<16xf32>
    %102 = vector.multi_reduction <maximumf>, %101, %cst_43 [1] : vector<16x16xf32> to vector<16xf32>
    %103 = vector.shape_cast %102 : vector<16xf32> to vector<16x1xf32>
    %104 = vector.broadcast %103 : vector<16x1xf32> to vector<16x16xf32>
    %105 = arith.subf %101, %104 : vector<16x16xf32>
    %106 = math.exp %105 : vector<16x16xf32>
    %cst_44 = arith.constant dense<0.000000e+00> : vector<16xf32>
    %107 = vector.multi_reduction <add>, %106, %cst_44 [1] : vector<16x16xf32> to vector<16xf32>
    %108 = vector.shape_cast %107 : vector<16xf32> to vector<16x1xf32>
    %109 = tpu.reciprocal %108 {approx = true} : vector<16x1xf32> -> vector<16x1xf32>
    %110 = arith.truncf %106 : vector<16x16xf32> to vector<16x16xbf16>
    %cst_45 = arith.constant dense<0.000000e+00> : vector<16x8xf32>
    %111 = tpu.matmul %110, %100, %cst_45 {dimension_numbers = #tpu.dot_dimension_numbers<[1], [0], [0], [1], [0, 0, 1, 1], [], []>} : vector<16x16xbf16>, vector<16x8xbf16>, vector<16x8xf32> -> vector<16x8xf32>
    %112 = vector.broadcast %109 : vector<16x1xf32> to vector<16x8xf32>
    %113 = arith.mulf %111, %112 : vector<16x8xf32>
    %114 = arith.truncf %113 : vector<16x8xf32> to vector<16x8xbf16>
    %c3 = arith.constant 3 : index
    %c0_46 = arith.constant 0 : index
    %c0_47 = arith.constant 0 : index
    %115 = vector.load %arg6[%c3, %c0_46, %c0_47] : memref<4x8x32xbf16, #tpu.memory_space<vmem>>, vector<1x8x32xbf16>
    %116 = vector.shape_cast %115 : vector<1x8x32xbf16> to vector<8x32xbf16>
    %cst_48 = arith.constant dense<0.000000e+00> : vector<16x32xf32>
    %117 = tpu.matmul %114, %116, %cst_48 {dimension_numbers = #tpu.dot_dimension_numbers<[1], [0], [0], [1], [0, 0, 1, 1], [], []>} : vector<16x8xbf16>, vector<8x32xbf16>, vector<16x32xf32> -> vector<16x32xf32>
    %118 = arith.addf %94, %117 : vector<16x32xf32>
    %c0_49 = arith.constant 0 : index
    %c0_50 = arith.constant 0 : index
    %119 = vector.load %arg10[%c0_49, %c0_50] : memref<1x32xf32, #tpu.memory_space<vmem>>, vector<1x32xf32>
    %120 = vector.broadcast %119 : vector<1x32xf32> to vector<16x32xf32>
    %121 = arith.addf %118, %120 : vector<16x32xf32>
    %122 = arith.addf %1, %121 : vector<16x32xf32>
    %cst_51 = arith.constant dense<0.000000e+00> : vector<16xf32>
    %123 = vector.multi_reduction <add>, %122, %cst_51 [1] : vector<16x32xf32> to vector<16xf32>
    %124 = vector.shape_cast %123 : vector<16xf32> to vector<16x1xf32>
    %cst_52 = arith.constant 3.200000e+01 : f32
    %125 = vector.broadcast %cst_52 : f32 to vector<16x1xf32>
    %126 = arith.divf %124, %125 : vector<16x1xf32>
    %127 = vector.broadcast %126 : vector<16x1xf32> to vector<16x32xf32>
    %128 = arith.subf %122, %127 : vector<16x32xf32>
    %129 = arith.mulf %128, %128 : vector<16x32xf32>
    %cst_53 = arith.constant dense<0.000000e+00> : vector<16xf32>
    %130 = vector.multi_reduction <add>, %129, %cst_53 [1] : vector<16x32xf32> to vector<16xf32>
    %131 = vector.shape_cast %130 : vector<16xf32> to vector<16x1xf32>
    %cst_54 = arith.constant 3.200000e+01 : f32
    %132 = vector.broadcast %cst_54 : f32 to vector<16x1xf32>
    %133 = arith.divf %131, %132 : vector<16x1xf32>
    %134 = vector.broadcast %126 : vector<16x1xf32> to vector<16x32xf32>
    %135 = arith.subf %122, %134 : vector<16x32xf32>
    %cst_55 = arith.constant 9.99999974E-6 : f32
    %136 = vector.broadcast %cst_55 : f32 to vector<16x1xf32>
    %137 = arith.addf %133, %136 : vector<16x1xf32>
    %138 = math.rsqrt %137 : vector<16x1xf32>
    %139 = vector.broadcast %138 : vector<16x1xf32> to vector<16x32xf32>
    %140 = arith.mulf %135, %139 : vector<16x32xf32>
    %c0_56 = arith.constant 0 : index
    %c0_57 = arith.constant 0 : index
    %141 = vector.load %arg11[%c0_56, %c0_57] : memref<1x32xf32, #tpu.memory_space<vmem>>, vector<1x32xf32>
    %142 = vector.broadcast %141 : vector<1x32xf32> to vector<16x32xf32>
    %143 = arith.mulf %140, %142 : vector<16x32xf32>
    %c0_58 = arith.constant 0 : index
    %c0_59 = arith.constant 0 : index
    %144 = vector.load %arg12[%c0_58, %c0_59] : memref<1x32xf32, #tpu.memory_space<vmem>>, vector<1x32xf32>
    %145 = vector.broadcast %144 : vector<1x32xf32> to vector<16x32xf32>
    %146 = arith.addf %143, %145 : vector<16x32xf32>
    %c0_60 = arith.constant 0 : index
    %c0_61 = arith.constant 0 : index
    %c0_62 = arith.constant 0 : index
    %147 = vector.load %arg13[%c0_60, %c0_61, %c0_62] : memref<1x16x32xf32, #tpu.memory_space<vmem>>, vector<1x16x32xf32>
    %148 = vector.shape_cast %147 : vector<1x16x32xf32> to vector<16x32xf32>
    %149 = vector.shape_cast %146 : vector<16x32xf32> to vector<1x16x32xf32>
    tpu.vector_store %arg13[%c0_60, %c0_61, %c0_62], %149 {strides = array<i32>} : memref<1x16x32xf32, #tpu.memory_space<vmem>>, vector<1x16x32xf32>,
    return
  }
  func.func @transform_0(%arg0: i32) -> (i32, i32, i32) {
    %c0_i32 = arith.constant 0 : i32
    %c0_i32_0 = arith.constant 0 : i32
    %c0_i32_1 = arith.constant 0 : i32
    return %arg0, %c0_i32, %c0_i32_0 : i32, i32, i32
  }
  func.func @transform_1(%arg0: i32) -> (i32, i32, i32) {
    %c0_i32 = arith.constant 0 : i32
    %c0_i32_0 = arith.constant 0 : i32
    %c0_i32_1 = arith.constant 0 : i32
    return %arg0, %c0_i32, %c0_i32_0 : i32, i32, i32
  }
  func.func @transform_2(%arg0: i32) -> (i32, i32) {
    %c0_i32 = arith.constant 0 : i32
    %c0_i32_0 = arith.constant 0 : i32
    %c0_i32_1 = arith.constant 0 : i32
    return %c0_i32, %c0_i32_0 : i32, i32
  }
  func.func @transform_3(%arg0: i32) -> (i32, i32) {
    %c0_i32 = arith.constant 0 : i32
    %c0_i32_0 = arith.constant 0 : i32
    %c0_i32_1 = arith.constant 0 : i32
    return %c0_i32, %c0_i32_0 : i32, i32
  }
  func.func @transform_4(%arg0: i32) -> (i32, i32) {
    %c0_i32 = arith.constant 0 : i32
    %c0_i32_0 = arith.constant 0 : i32
    %c0_i32_1 = arith.constant 0 : i32
    return %c0_i32, %c0_i32_0 : i32, i32
  }
  func.func @transform_5(%arg0: i32) -> (i32, i32, i32) {
    %c0_i32 = arith.constant 0 : i32
    %c0_i32_0 = arith.constant 0 : i32
    %c0_i32_1 = arith.constant 0 : i32
    %c0_i32_2 = arith.constant 0 : i32
    return %c0_i32, %c0_i32_0, %c0_i32_1 : i32, i32, i32
  }
  func.func @transform_6(%arg0: i32) -> (i32, i32) {
    %c0_i32 = arith.constant 0 : i32
    %c0_i32_0 = arith.constant 0 : i32
    %c0_i32_1 = arith.constant 0 : i32
    return %c0_i32, %c0_i32_0 : i32, i32
  }
  func.func @transform_7(%arg0: i32) -> (i32, i32) {
    %c0_i32 = arith.constant 0 : i32
    %c0_i32_0 = arith.constant 0 : i32
    %c0_i32_1 = arith.constant 0 : i32
    return %c0_i32, %c0_i32_0 : i32, i32
  }
  func.func @transform_8(%arg0: i32) -> (i32, i32) {
    %c0_i32 = arith.constant 0 : i32
    %c0_i32_0 = arith.constant 0 : i32
    %c0_i32_1 = arith.constant 0 : i32
    return %c0_i32, %c0_i32_0 : i32, i32
  }
  func.func @transform_9(%arg0: i32) -> (i32, i32) {
    %c0_i32 = arith.constant 0 : i32
    %c0_i32_0 = arith.constant 0 : i32
    %c0_i32_1 = arith.constant 0 : i32
    return %c0_i32, %c0_i32_0 : i32, i32
  }
  func.func @transform_10(%arg0: i32) -> (i32, i32) {
    %c0_i32 = arith.constant 0 : i32
    %c0_i32_0 = arith.constant 0 : i32
    %c0_i32_1 = arith.constant 0 : i32
    return %c0_i32, %c0_i32_0 : i32, i32
  }
  func.func @transform_11(%arg0: i32) -> (i32, i32) {
    %c0_i32 = arith.constant 0 : i32
    %c0_i32_0 = arith.constant 0 : i32
    %c0_i32_1 = arith.constant 0 : i32
    return %c0_i32, %c0_i32_0 : i32, i32
  }
  func.func @transform_12(%arg0: i32) -> (i32, i32, i32) {
    %c0_i32 = arith.constant 0 : i32
    %c0_i32_0 = arith.constant 0 : i32
    %c0_i32_1 = arith.constant 0 : i32
    return %arg0, %c0_i32, %c0_i32_0 : i32, i32, i32
  }
}

module attributes {stable_mosaic.version = 11 : i64} {
  func.func @_ffn_ln_kernel(%arg0: i32, %arg1: memref<32x32xf32, #tpu.memory_space<vmem>>, %arg2: memref<32x64xbf16, #tpu.memory_space<vmem>>, %arg3: memref<1x64xf32, #tpu.memory_space<vmem>>, %arg4: memref<64x32xbf16, #tpu.memory_space<vmem>>, %arg5: memref<1x32xf32, #tpu.memory_space<vmem>>, %arg6: memref<1x32xf32, #tpu.memory_space<vmem>>, %arg7: memref<1x32xf32, #tpu.memory_space<vmem>>, %arg8: memref<32x32xf32, #tpu.memory_space<vmem>>) attributes {dimension_semantics = [#tpu.dimension_semantics<parallel>], iteration_bounds = array<i64: 1>, scalar_prefetch = 0 : i64, scratch_operands = 0 : i64, tpu.core_type = #tpu.core_type<tc>, window_params = [{transform_indices = @transform_0, window_bounds = array<i64: 32, 32>}, {pipeline_mode = #tpu.pipeline_mode<synchronous>, transform_indices = @transform_1, window_bounds = array<i64: 32, 64>}, {pipeline_mode = #tpu.pipeline_mode<synchronous>, transform_indices = @transform_2, window_bounds = array<i64: 1, 64>}, {pipeline_mode = #tpu.pipeline_mode<synchronous>, transform_indices = @transform_3, window_bounds = array<i64: 64, 32>}, {pipeline_mode = #tpu.pipeline_mode<synchronous>, transform_indices = @transform_4, window_bounds = array<i64: 1, 32>}, {pipeline_mode = #tpu.pipeline_mode<synchronous>, transform_indices = @transform_5, window_bounds = array<i64: 1, 32>}, {pipeline_mode = #tpu.pipeline_mode<synchronous>, transform_indices = @transform_6, window_bounds = array<i64: 1, 32>}, {transform_indices = @transform_7, window_bounds = array<i64: 32, 32>}]} {
    %c0 = arith.constant 0 : index
    %c0_0 = arith.constant 0 : index
    %0 = vector.load %arg1[%c0, %c0_0] : memref<32x32xf32, #tpu.memory_space<vmem>>, vector<32x32xf32>
    %1 = arith.truncf %0 : vector<32x32xf32> to vector<32x32xbf16>
    %c0_1 = arith.constant 0 : index
    %c0_2 = arith.constant 0 : index
    %2 = vector.load %arg2[%c0_1, %c0_2] : memref<32x64xbf16, #tpu.memory_space<vmem>>, vector<32x64xbf16>
    %cst = arith.constant dense<0.000000e+00> : vector<32x64xf32>
    %3 = tpu.matmul %1, %2, %cst {dimension_numbers = #tpu.dot_dimension_numbers<[1], [0], [0], [1], [0, 0, 1, 1], [], []>} : vector<32x32xbf16>, vector<32x64xbf16>, vector<32x64xf32> -> vector<32x64xf32>
    %c0_3 = arith.constant 0 : index
    %c0_4 = arith.constant 0 : index
    %4 = vector.load %arg3[%c0_3, %c0_4] : memref<1x64xf32, #tpu.memory_space<vmem>>, vector<1x64xf32>
    %5 = vector.broadcast %4 : vector<1x64xf32> to vector<32x64xf32>
    %6 = arith.addf %3, %5 : vector<32x64xf32>
    %cst_5 = arith.constant 0.000000e+00 : f32
    %7 = vector.broadcast %cst_5 : f32 to vector<32x64xf32>
    %8 = arith.maximumf %6, %7 : vector<32x64xf32>
    %9 = arith.truncf %8 : vector<32x64xf32> to vector<32x64xbf16>
    %c0_6 = arith.constant 0 : index
    %c0_7 = arith.constant 0 : index
    %10 = vector.load %arg4[%c0_6, %c0_7] : memref<64x32xbf16, #tpu.memory_space<vmem>>, vector<64x32xbf16>
    %cst_8 = arith.constant dense<0.000000e+00> : vector<32x32xf32>
    %11 = tpu.matmul %9, %10, %cst_8 {dimension_numbers = #tpu.dot_dimension_numbers<[1], [0], [0], [1], [0, 0, 1, 1], [], []>} : vector<32x64xbf16>, vector<64x32xbf16>, vector<32x32xf32> -> vector<32x32xf32>
    %c0_9 = arith.constant 0 : index
    %c0_10 = arith.constant 0 : index
    %12 = vector.load %arg5[%c0_9, %c0_10] : memref<1x32xf32, #tpu.memory_space<vmem>>, vector<1x32xf32>
    %13 = vector.broadcast %12 : vector<1x32xf32> to vector<32x32xf32>
    %14 = arith.addf %11, %13 : vector<32x32xf32>
    %15 = arith.addf %0, %14 : vector<32x32xf32>
    %cst_11 = arith.constant dense<0.000000e+00> : vector<32xf32>
    %16 = vector.multi_reduction <add>, %15, %cst_11 [1] : vector<32x32xf32> to vector<32xf32>
    %17 = vector.shape_cast %16 : vector<32xf32> to vector<32x1xf32>
    %cst_12 = arith.constant 3.200000e+01 : f32
    %18 = vector.broadcast %cst_12 : f32 to vector<32x1xf32>
    %19 = arith.divf %17, %18 : vector<32x1xf32>
    %20 = vector.broadcast %19 : vector<32x1xf32> to vector<32x32xf32>
    %21 = arith.subf %15, %20 : vector<32x32xf32>
    %22 = arith.mulf %21, %21 : vector<32x32xf32>
    %cst_13 = arith.constant dense<0.000000e+00> : vector<32xf32>
    %23 = vector.multi_reduction <add>, %22, %cst_13 [1] : vector<32x32xf32> to vector<32xf32>
    %24 = vector.shape_cast %23 : vector<32xf32> to vector<32x1xf32>
    %cst_14 = arith.constant 3.200000e+01 : f32
    %25 = vector.broadcast %cst_14 : f32 to vector<32x1xf32>
    %26 = arith.divf %24, %25 : vector<32x1xf32>
    %27 = vector.broadcast %19 : vector<32x1xf32> to vector<32x32xf32>
    %28 = arith.subf %15, %27 : vector<32x32xf32>
    %cst_15 = arith.constant 9.99999974E-6 : f32
    %29 = vector.broadcast %cst_15 : f32 to vector<32x1xf32>
    %30 = arith.addf %26, %29 : vector<32x1xf32>
    %31 = math.rsqrt %30 : vector<32x1xf32>
    %32 = vector.broadcast %31 : vector<32x1xf32> to vector<32x32xf32>
    %33 = arith.mulf %28, %32 : vector<32x32xf32>
    %c0_16 = arith.constant 0 : index
    %c0_17 = arith.constant 0 : index
    %34 = vector.load %arg6[%c0_16, %c0_17] : memref<1x32xf32, #tpu.memory_space<vmem>>, vector<1x32xf32>
    %35 = vector.broadcast %34 : vector<1x32xf32> to vector<32x32xf32>
    %36 = arith.mulf %33, %35 : vector<32x32xf32>
    %c0_18 = arith.constant 0 : index
    %c0_19 = arith.constant 0 : index
    %37 = vector.load %arg7[%c0_18, %c0_19] : memref<1x32xf32, #tpu.memory_space<vmem>>, vector<1x32xf32>
    %38 = vector.broadcast %37 : vector<1x32xf32> to vector<32x32xf32>
    %39 = arith.addf %36, %38 : vector<32x32xf32>
    %c0_20 = arith.constant 0 : index
    %c0_21 = arith.constant 0 : index
    %40 = vector.load %arg8[%c0_20, %c0_21] : memref<32x32xf32, #tpu.memory_space<vmem>>, vector<32x32xf32>
    tpu.vector_store %arg8[%c0_20, %c0_21], %39 {strides = array<i32>} : memref<32x32xf32, #tpu.memory_space<vmem>>, vector<32x32xf32>,
    return
  }
  func.func @transform_0(%arg0: i32) -> (i32, i32) {
    %c0_i32 = arith.constant 0 : i32
    %c0_i32_0 = arith.constant 0 : i32
    return %arg0, %c0_i32 : i32, i32
  }
  func.func @transform_1(%arg0: i32) -> (i32, i32) {
    %c0_i32 = arith.constant 0 : i32
    %c0_i32_0 = arith.constant 0 : i32
    %c0_i32_1 = arith.constant 0 : i32
    return %c0_i32, %c0_i32_0 : i32, i32
  }
  func.func @transform_2(%arg0: i32) -> (i32, i32) {
    %c0_i32 = arith.constant 0 : i32
    %c0_i32_0 = arith.constant 0 : i32
    %c0_i32_1 = arith.constant 0 : i32
    return %c0_i32, %c0_i32_0 : i32, i32
  }
  func.func @transform_3(%arg0: i32) -> (i32, i32) {
    %c0_i32 = arith.constant 0 : i32
    %c0_i32_0 = arith.constant 0 : i32
    %c0_i32_1 = arith.constant 0 : i32
    return %c0_i32, %c0_i32_0 : i32, i32
  }
  func.func @transform_4(%arg0: i32) -> (i32, i32) {
    %c0_i32 = arith.constant 0 : i32
    %c0_i32_0 = arith.constant 0 : i32
    %c0_i32_1 = arith.constant 0 : i32
    return %c0_i32, %c0_i32_0 : i32, i32
  }
  func.func @transform_5(%arg0: i32) -> (i32, i32) {
    %c0_i32 = arith.constant 0 : i32
    %c0_i32_0 = arith.constant 0 : i32
    %c0_i32_1 = arith.constant 0 : i32
    return %c0_i32, %c0_i32_0 : i32, i32
  }
  func.func @transform_6(%arg0: i32) -> (i32, i32) {
    %c0_i32 = arith.constant 0 : i32
    %c0_i32_0 = arith.constant 0 : i32
    %c0_i32_1 = arith.constant 0 : i32
    return %c0_i32, %c0_i32_0 : i32, i32
  }
  func.func @transform_7(%arg0: i32) -> (i32, i32) {
    %c0_i32 = arith.constant 0 : i32
    %c0_i32_0 = arith.constant 0 : i32
    return %arg0, %c0_i32 : i32, i32
  }
}

module attributes {stable_mosaic.version = 11 : i64} {
  func.func @_cam_kernel(%arg0: i32, %arg1: memref<1x32x16xf32, #tpu.memory_space<vmem>>, %arg2: memref<8x32xbf16, #tpu.memory_space<vmem>>, %arg3: memref<1x8x16xf32, #tpu.memory_space<vmem>>) attributes {dimension_semantics = [#tpu.dimension_semantics<parallel>], iteration_bounds = array<i64: 2>, scalar_prefetch = 0 : i64, scratch_operands = 0 : i64, tpu.core_type = #tpu.core_type<tc>, window_params = [{transform_indices = @transform_0, window_bounds = array<i64: 1, 32, 16>}, {pipeline_mode = #tpu.pipeline_mode<synchronous>, transform_indices = @transform_1, window_bounds = array<i64: 8, 32>}, {transform_indices = @transform_2, window_bounds = array<i64: 1, 8, 16>}]} {
    %c0 = arith.constant 0 : index
    %c0_0 = arith.constant 0 : index
    %c0_1 = arith.constant 0 : index
    %0 = vector.load %arg1[%c0, %c0_0, %c0_1] : memref<1x32x16xf32, #tpu.memory_space<vmem>>, vector<1x32x16xf32>
    %1 = vector.shape_cast %0 : vector<1x32x16xf32> to vector<32x16xf32>
    %2 = arith.truncf %1 : vector<32x16xf32> to vector<32x16xbf16>
    %c0_2 = arith.constant 0 : index
    %c0_3 = arith.constant 0 : index
    %3 = vector.load %arg2[%c0_2, %c0_3] : memref<8x32xbf16, #tpu.memory_space<vmem>>, vector<8x32xbf16>
    %cst = arith.constant dense<0.000000e+00> : vector<8x16xf32>
    %4 = tpu.matmul %3, %2, %cst {dimension_numbers = #tpu.dot_dimension_numbers<[1], [0], [0], [1], [0, 0, 1, 1], [], []>} : vector<8x32xbf16>, vector<32x16xbf16>, vector<8x16xf32> -> vector<8x16xf32>
    %c0_4 = arith.constant 0 : index
    %c0_5 = arith.constant 0 : index
    %c0_6 = arith.constant 0 : index
    %5 = vector.load %arg3[%c0_4, %c0_5, %c0_6] : memref<1x8x16xf32, #tpu.memory_space<vmem>>, vector<1x8x16xf32>
    %6 = vector.shape_cast %5 : vector<1x8x16xf32> to vector<8x16xf32>
    %7 = vector.shape_cast %4 : vector<8x16xf32> to vector<1x8x16xf32>
    tpu.vector_store %arg3[%c0_4, %c0_5, %c0_6], %7 {strides = array<i32>} : memref<1x8x16xf32, #tpu.memory_space<vmem>>, vector<1x8x16xf32>,
    return
  }
  func.func @transform_0(%arg0: i32) -> (i32, i32, i32) {
    %c0_i32 = arith.constant 0 : i32
    %c0_i32_0 = arith.constant 0 : i32
    %c0_i32_1 = arith.constant 0 : i32
    return %arg0, %c0_i32, %c0_i32_0 : i32, i32, i32
  }
  func.func @transform_1(%arg0: i32) -> (i32, i32) {
    %c0_i32 = arith.constant 0 : i32
    %c0_i32_0 = arith.constant 0 : i32
    %c0_i32_1 = arith.constant 0 : i32
    return %c0_i32, %c0_i32_0 : i32, i32
  }
  func.func @transform_2(%arg0: i32) -> (i32, i32, i32) {
    %c0_i32 = arith.constant 0 : i32
    %c0_i32_0 = arith.constant 0 : i32
    %c0_i32_1 = arith.constant 0 : i32
    return %arg0, %c0_i32, %c0_i32_0 : i32, i32, i32
  }
}

module attributes {stable_mosaic.version = 11 : i64} {
  func.func @_mha_ln_kernel(%arg0: i32, %arg1: memref<1x8x32xf32, #tpu.memory_space<vmem>>, %arg2: memref<1x8x32xf32, #tpu.memory_space<vmem>>, %arg3: memref<1x16x32xf32, #tpu.memory_space<vmem>>, %arg4: memref<1x16x32xf32, #tpu.memory_space<vmem>>, %arg5: memref<1x8x16xf32, #tpu.memory_space<vmem>>, %arg6: memref<32x32xbf16, #tpu.memory_space<vmem>>, %arg7: memref<32x32xbf16, #tpu.memory_space<vmem>>, %arg8: memref<32x32xbf16, #tpu.memory_space<vmem>>, %arg9: memref<4x8x32xbf16, #tpu.memory_space<vmem>>, %arg10: memref<1x32xf32, #tpu.memory_space<vmem>>, %arg11: memref<1x32xf32, #tpu.memory_space<vmem>>, %arg12: memref<1x32xf32, #tpu.memory_space<vmem>>, %arg13: memref<1x32xf32, #tpu.memory_space<vmem>>, %arg14: memref<1x32xf32, #tpu.memory_space<vmem>>, %arg15: memref<1x32xf32, #tpu.memory_space<vmem>>, %arg16: memref<1x8x32xf32, #tpu.memory_space<vmem>>) attributes {dimension_semantics = [#tpu.dimension_semantics<parallel>], iteration_bounds = array<i64: 2>, scalar_prefetch = 0 : i64, scratch_operands = 0 : i64, tpu.core_type = #tpu.core_type<tc>, window_params = [{transform_indices = @transform_0, window_bounds = array<i64: 1, 8, 32>}, {transform_indices = @transform_1, window_bounds = array<i64: 1, 8, 32>}, {transform_indices = @transform_2, window_bounds = array<i64: 1, 16, 32>}, {transform_indices = @transform_3, window_bounds = array<i64: 1, 16, 32>}, {transform_indices = @transform_4, window_bounds = array<i64: 1, 8, 16>}, {pipeline_mode = #tpu.pipeline_mode<synchronous>, transform_indices = @transform_5, window_bounds = array<i64: 32, 32>}, {pipeline_mode = #tpu.pipeline_mode<synchronous>, transform_indices = @transform_6, window_bounds = array<i64: 32, 32>}, {pipeline_mode = #tpu.pipeline_mode<synchronous>, transform_indices = @transform_7, window_bounds = array<i64: 32, 32>}, {pipeline_mode = #tpu.pipeline_mode<synchronous>, transform_indices = @transform_8, window_bounds = array<i64: 4, 8, 32>}, {pipeline_mode = #tpu.pipeline_mode<synchronous>, transform_indices = @transform_9, window_bounds = array<i64: 1, 32>}, {pipeline_mode = #tpu.pipeline_mode<synchronous>, transform_indices = @transform_10, window_bounds = array<i64: 1, 32>}, {pipeline_mode = #tpu.pipeline_mode<synchronous>, transform_indices = @transform_11, window_bounds = array<i64: 1, 32>}, {pipeline_mode = #tpu.pipeline_mode<synchronous>, transform_indices = @transform_12, window_bounds = array<i64: 1, 32>}, {pipeline_mode = #tpu.pipeline_mode<synchronous>, transform_indices = @transform_13, window_bounds = array<i64: 1, 32>}, {pipeline_mode = #tpu.pipeline_mode<synchronous>, transform_indices = @transform_14, window_bounds = array<i64: 1, 32>}, {transform_indices = @transform_15, window_bounds = array<i64: 1, 8, 32>}]} {
    %c0 = arith.constant 0 : index
    %c0_0 = arith.constant 0 : index
    %c0_1 = arith.constant 0 : index
    %0 = vector.load %arg1[%c0, %c0_0, %c0_1] : memref<1x8x32xf32, #tpu.memory_space<vmem>>, vector<1x8x32xf32>
    %1 = vector.shape_cast %0 : vector<1x8x32xf32> to vector<8x32xf32>
    %c0_2 = arith.constant 0 : index
    %c0_3 = arith.constant 0 : index
    %c0_4 = arith.constant 0 : index
    %2 = vector.load %arg2[%c0_2, %c0_3, %c0_4] : memref<1x8x32xf32, #tpu.memory_space<vmem>>, vector<1x8x32xf32>
    %3 = vector.shape_cast %2 : vector<1x8x32xf32> to vector<8x32xf32>
    %4 = arith.addf %1, %3 : vector<8x32xf32>
    %5 = arith.truncf %4 : vector<8x32xf32> to vector<8x32xbf16>
    %c0_5 = arith.constant 0 : index
    %c0_6 = arith.constant 0 : index
    %c0_7 = arith.constant 0 : index
    %6 = vector.load %arg3[%c0_5, %c0_6, %c0_7] : memref<1x16x32xf32, #tpu.memory_space<vmem>>, vector<1x16x32xf32>
    %7 = vector.shape_cast %6 : vector<1x16x32xf32> to vector<16x32xf32>
    %c0_8 = arith.constant 0 : index
    %c0_9 = arith.constant 0 : index
    %c0_10 = arith.constant 0 : index
    %8 = vector.load %arg4[%c0_8, %c0_9, %c0_10] : memref<1x16x32xf32, #tpu.memory_space<vmem>>, vector<1x16x32xf32>
    %9 = vector.shape_cast %8 : vector<1x16x32xf32> to vector<16x32xf32>
    %10 = arith.addf %7, %9 : vector<16x32xf32>
    %11 = arith.truncf %10 : vector<16x32xf32> to vector<16x32xbf16>
    %c0_11 = arith.constant 0 : index
    %c0_12 = arith.constant 0 : index
    %c0_13 = arith.constant 0 : index
    %12 = vector.load %arg3[%c0_11, %c0_12, %c0_13] : memref<1x16x32xf32, #tpu.memory_space<vmem>>, vector<1x16x32xf32>
    %13 = vector.shape_cast %12 : vector<1x16x32xf32> to vector<16x32xf32>
    %14 = arith.truncf %13 : vector<16x32xf32> to vector<16x32xbf16>
    %c0_14 = arith.constant 0 : index
    %c0_15 = arith.constant 0 : index
    %15 = vector.load %arg6[%c0_14, %c0_15] : memref<32x32xbf16, #tpu.memory_space<vmem>>, vector<32x32xbf16>
    %cst = arith.constant dense<0.000000e+00> : vector<8x32xf32>
    %16 = tpu.matmul %5, %15, %cst {dimension_numbers = #tpu.dot_dimension_numbers<[1], [0], [0], [1], [0, 0, 1, 1], [], []>} : vector<8x32xbf16>, vector<32x32xbf16>, vector<8x32xf32> -> vector<8x32xf32>
    %c0_16 = arith.constant 0 : index
    %c0_17 = arith.constant 0 : index
    %17 = vector.load %arg10[%c0_16, %c0_17] : memref<1x32xf32, #tpu.memory_space<vmem>>, vector<1x32xf32>
    %18 = vector.broadcast %17 : vector<1x32xf32> to vector<8x32xf32>
    %19 = arith.addf %16, %18 : vector<8x32xf32>
    %c0_18 = arith.constant 0 : index
    %c0_19 = arith.constant 0 : index
    %20 = vector.load %arg7[%c0_18, %c0_19] : memref<32x32xbf16, #tpu.memory_space<vmem>>, vector<32x32xbf16>
    %cst_20 = arith.constant dense<0.000000e+00> : vector<16x32xf32>
    %21 = tpu.matmul %11, %20, %cst_20 {dimension_numbers = #tpu.dot_dimension_numbers<[1], [0], [0], [1], [0, 0, 1, 1], [], []>} : vector<16x32xbf16>, vector<32x32xbf16>, vector<16x32xf32> -> vector<16x32xf32>
    %c0_21 = arith.constant 0 : index
    %c0_22 = arith.constant 0 : index
    %22 = vector.load %arg11[%c0_21, %c0_22] : memref<1x32xf32, #tpu.memory_space<vmem>>, vector<1x32xf32>
    %23 = vector.broadcast %22 : vector<1x32xf32> to vector<16x32xf32>
    %24 = arith.addf %21, %23 : vector<16x32xf32>
    %c0_23 = arith.constant 0 : index
    %c0_24 = arith.constant 0 : index
    %25 = vector.load %arg8[%c0_23, %c0_24] : memref<32x32xbf16, #tpu.memory_space<vmem>>, vector<32x32xbf16>
    %cst_25 = arith.constant dense<0.000000e+00> : vector<16x32xf32>
    %26 = tpu.matmul %14, %25, %cst_25 {dimension_numbers = #tpu.dot_dimension_numbers<[1], [0], [0], [1], [0, 0, 1, 1], [], []>} : vector<16x32xbf16>, vector<32x32xbf16>, vector<16x32xf32> -> vector<16x32xf32>
    %c0_26 = arith.constant 0 : index
    %c0_27 = arith.constant 0 : index
    %27 = vector.load %arg12[%c0_26, %c0_27] : memref<1x32xf32, #tpu.memory_space<vmem>>, vector<1x32xf32>
    %28 = vector.broadcast %27 : vector<1x32xf32> to vector<16x32xf32>
    %29 = arith.addf %26, %28 : vector<16x32xf32>
    %c0_28 = arith.constant 0 : index
    %c0_29 = arith.constant 0 : index
    %c0_30 = arith.constant 0 : index
    %30 = vector.load %arg5[%c0_28, %c0_29, %c0_30] : memref<1x8x16xf32, #tpu.memory_space<vmem>>, vector<1x8x16xf32>
    %31 = vector.shape_cast %30 : vector<1x8x16xf32> to vector<8x16xf32>
    %cst_31 = arith.constant 0.000000e+00 : f32
    %32 = vector.broadcast %cst_31 : f32 to vector<8x32xf32>
    %33 = vector.extract_strided_slice %19 {offsets = [0, 0], sizes = [8, 8], strides = [1, 1]} : vector<8x32xf32> to vector<8x8xf32>
    %34 = arith.truncf %33 : vector<8x8xf32> to vector<8x8xbf16>
    %35 = vector.extract_strided_slice %24 {offsets = [0, 0], sizes = [16, 8], strides = [1, 1]} : vector<16x32xf32> to vector<16x8xf32>
    %36 = arith.truncf %35 : vector<16x8xf32> to vector<16x8xbf16>
    %37 = vector.extract_strided_slice %29 {offsets = [0, 0], sizes = [16, 8], strides = [1, 1]} : vector<16x32xf32> to vector<16x8xf32>
    %38 = arith.truncf %37 : vector<16x8xf32> to vector<16x8xbf16>
    %cst_32 = arith.constant dense<0.000000e+00> : vector<8x16xf32>
    %39 = tpu.matmul %34, %36, %cst_32 {dimension_numbers = #tpu.dot_dimension_numbers<[1], [1], [0], [0], [0, 0, 1, 0], [], []>} : vector<8x8xbf16>, vector<16x8xbf16>, vector<8x16xf32> -> vector<8x16xf32>
    %40 = arith.addf %39, %31 : vector<8x16xf32>
    %cst_33 = arith.constant dense<0xFF800000> : vector<8xf32>
    %41 = vector.multi_reduction <maximumf>, %40, %cst_33 [1] : vector<8x16xf32> to vector<8xf32>
    %42 = vector.shape_cast %41 : vector<8xf32> to vector<8x1xf32>
    %43 = vector.broadcast %42 : vector<8x1xf32> to vector<8x16xf32>
    %44 = arith.subf %40, %43 : vector<8x16xf32>
    %45 = math.exp %44 : vector<8x16xf32>
    %cst_34 = arith.constant dense<0.000000e+00> : vector<8xf32>
    %46 = vector.multi_reduction <add>, %45, %cst_34 [1] : vector<8x16xf32> to vector<8xf32>
    %47 = vector.shape_cast %46 : vector<8xf32> to vector<8x1xf32>
    %48 = tpu.reciprocal %47 {approx = true} : vector<8x1xf32> -> vector<8x1xf32>
    %49 = arith.truncf %45 : vector<8x16xf32> to vector<8x16xbf16>
    %cst_35 = arith.constant dense<0.000000e+00> : vector<8x8xf32>
    %50 = tpu.matmul %49, %38, %cst_35 {dimension_numbers = #tpu.dot_dimension_numbers<[1], [0], [0], [1], [0, 0, 1, 1], [], []>} : vector<8x16xbf16>, vector<16x8xbf16>, vector<8x8xf32> -> vector<8x8xf32>
    %51 = vector.broadcast %48 : vector<8x1xf32> to vector<8x8xf32>
    %52 = arith.mulf %50, %51 : vector<8x8xf32>
    %53 = arith.truncf %52 : vector<8x8xf32> to vector<8x8xbf16>
    %c0_36 = arith.constant 0 : index
    %c0_37 = arith.constant 0 : index
    %c0_38 = arith.constant 0 : index
    %54 = vector.load %arg9[%c0_36, %c0_37, %c0_38] : memref<4x8x32xbf16, #tpu.memory_space<vmem>>, vector<1x8x32xbf16>
    %55 = vector.shape_cast %54 : vector<1x8x32xbf16> to vector<8x32xbf16>
    %cst_39 = arith.constant dense<0.000000e+00> : vector<8x32xf32>
    %56 = tpu.matmul %53, %55, %cst_39 {dimension_numbers = #tpu.dot_dimension_numbers<[1], [0], [0], [1], [0, 0, 1, 1], [], []>} : vector<8x8xbf16>, vector<8x32xbf16>, vector<8x32xf32> -> vector<8x32xf32>
    %57 = arith.addf %32, %56 : vector<8x32xf32>
    %58 = vector.extract_strided_slice %19 {offsets = [0, 8], sizes = [8, 8], strides = [1, 1]} : vector<8x32xf32> to vector<8x8xf32>
    %59 = arith.truncf %58 : vector<8x8xf32> to vector<8x8xbf16>
    %60 = vector.extract_strided_slice %24 {offsets = [0, 8], sizes = [16, 8], strides = [1, 1]} : vector<16x32xf32> to vector<16x8xf32>
    %61 = arith.truncf %60 : vector<16x8xf32> to vector<16x8xbf16>
    %62 = vector.extract_strided_slice %29 {offsets = [0, 8], sizes = [16, 8], strides = [1, 1]} : vector<16x32xf32> to vector<16x8xf32>
    %63 = arith.truncf %62 : vector<16x8xf32> to vector<16x8xbf16>
    %cst_40 = arith.constant dense<0.000000e+00> : vector<8x16xf32>
    %64 = tpu.matmul %59, %61, %cst_40 {dimension_numbers = #tpu.dot_dimension_numbers<[1], [1], [0], [0], [0, 0, 1, 0], [], []>} : vector<8x8xbf16>, vector<16x8xbf16>, vector<8x16xf32> -> vector<8x16xf32>
    %65 = arith.addf %64, %31 : vector<8x16xf32>
    %cst_41 = arith.constant dense<0xFF800000> : vector<8xf32>
    %66 = vector.multi_reduction <maximumf>, %65, %cst_41 [1] : vector<8x16xf32> to vector<8xf32>
    %67 = vector.shape_cast %66 : vector<8xf32> to vector<8x1xf32>
    %68 = vector.broadcast %67 : vector<8x1xf32> to vector<8x16xf32>
    %69 = arith.subf %65, %68 : vector<8x16xf32>
    %70 = math.exp %69 : vector<8x16xf32>
    %cst_42 = arith.constant dense<0.000000e+00> : vector<8xf32>
    %71 = vector.multi_reduction <add>, %70, %cst_42 [1] : vector<8x16xf32> to vector<8xf32>
    %72 = vector.shape_cast %71 : vector<8xf32> to vector<8x1xf32>
    %73 = tpu.reciprocal %72 {approx = true} : vector<8x1xf32> -> vector<8x1xf32>
    %74 = arith.truncf %70 : vector<8x16xf32> to vector<8x16xbf16>
    %cst_43 = arith.constant dense<0.000000e+00> : vector<8x8xf32>
    %75 = tpu.matmul %74, %63, %cst_43 {dimension_numbers = #tpu.dot_dimension_numbers<[1], [0], [0], [1], [0, 0, 1, 1], [], []>} : vector<8x16xbf16>, vector<16x8xbf16>, vector<8x8xf32> -> vector<8x8xf32>
    %76 = vector.broadcast %73 : vector<8x1xf32> to vector<8x8xf32>
    %77 = arith.mulf %75, %76 : vector<8x8xf32>
    %78 = arith.truncf %77 : vector<8x8xf32> to vector<8x8xbf16>
    %c1 = arith.constant 1 : index
    %c0_44 = arith.constant 0 : index
    %c0_45 = arith.constant 0 : index
    %79 = vector.load %arg9[%c1, %c0_44, %c0_45] : memref<4x8x32xbf16, #tpu.memory_space<vmem>>, vector<1x8x32xbf16>
    %80 = vector.shape_cast %79 : vector<1x8x32xbf16> to vector<8x32xbf16>
    %cst_46 = arith.constant dense<0.000000e+00> : vector<8x32xf32>
    %81 = tpu.matmul %78, %80, %cst_46 {dimension_numbers = #tpu.dot_dimension_numbers<[1], [0], [0], [1], [0, 0, 1, 1], [], []>} : vector<8x8xbf16>, vector<8x32xbf16>, vector<8x32xf32> -> vector<8x32xf32>
    %82 = arith.addf %57, %81 : vector<8x32xf32>
    %83 = vector.extract_strided_slice %19 {offsets = [0, 16], sizes = [8, 8], strides = [1, 1]} : vector<8x32xf32> to vector<8x8xf32>
    %84 = arith.truncf %83 : vector<8x8xf32> to vector<8x8xbf16>
    %85 = vector.extract_strided_slice %24 {offsets = [0, 16], sizes = [16, 8], strides = [1, 1]} : vector<16x32xf32> to vector<16x8xf32>
    %86 = arith.truncf %85 : vector<16x8xf32> to vector<16x8xbf16>
    %87 = vector.extract_strided_slice %29 {offsets = [0, 16], sizes = [16, 8], strides = [1, 1]} : vector<16x32xf32> to vector<16x8xf32>
    %88 = arith.truncf %87 : vector<16x8xf32> to vector<16x8xbf16>
    %cst_47 = arith.constant dense<0.000000e+00> : vector<8x16xf32>
    %89 = tpu.matmul %84, %86, %cst_47 {dimension_numbers = #tpu.dot_dimension_numbers<[1], [1], [0], [0], [0, 0, 1, 0], [], []>} : vector<8x8xbf16>, vector<16x8xbf16>, vector<8x16xf32> -> vector<8x16xf32>
    %90 = arith.addf %89, %31 : vector<8x16xf32>
    %cst_48 = arith.constant dense<0xFF800000> : vector<8xf32>
    %91 = vector.multi_reduction <maximumf>, %90, %cst_48 [1] : vector<8x16xf32> to vector<8xf32>
    %92 = vector.shape_cast %91 : vector<8xf32> to vector<8x1xf32>
    %93 = vector.broadcast %92 : vector<8x1xf32> to vector<8x16xf32>
    %94 = arith.subf %90, %93 : vector<8x16xf32>
    %95 = math.exp %94 : vector<8x16xf32>
    %cst_49 = arith.constant dense<0.000000e+00> : vector<8xf32>
    %96 = vector.multi_reduction <add>, %95, %cst_49 [1] : vector<8x16xf32> to vector<8xf32>
    %97 = vector.shape_cast %96 : vector<8xf32> to vector<8x1xf32>
    %98 = tpu.reciprocal %97 {approx = true} : vector<8x1xf32> -> vector<8x1xf32>
    %99 = arith.truncf %95 : vector<8x16xf32> to vector<8x16xbf16>
    %cst_50 = arith.constant dense<0.000000e+00> : vector<8x8xf32>
    %100 = tpu.matmul %99, %88, %cst_50 {dimension_numbers = #tpu.dot_dimension_numbers<[1], [0], [0], [1], [0, 0, 1, 1], [], []>} : vector<8x16xbf16>, vector<16x8xbf16>, vector<8x8xf32> -> vector<8x8xf32>
    %101 = vector.broadcast %98 : vector<8x1xf32> to vector<8x8xf32>
    %102 = arith.mulf %100, %101 : vector<8x8xf32>
    %103 = arith.truncf %102 : vector<8x8xf32> to vector<8x8xbf16>
    %c2 = arith.constant 2 : index
    %c0_51 = arith.constant 0 : index
    %c0_52 = arith.constant 0 : index
    %104 = vector.load %arg9[%c2, %c0_51, %c0_52] : memref<4x8x32xbf16, #tpu.memory_space<vmem>>, vector<1x8x32xbf16>
    %105 = vector.shape_cast %104 : vector<1x8x32xbf16> to vector<8x32xbf16>
    %cst_53 = arith.constant dense<0.000000e+00> : vector<8x32xf32>
    %106 = tpu.matmul %103, %105, %cst_53 {dimension_numbers = #tpu.dot_dimension_numbers<[1], [0], [0], [1], [0, 0, 1, 1], [], []>} : vector<8x8xbf16>, vector<8x32xbf16>, vector<8x32xf32> -> vector<8x32xf32>
    %107 = arith.addf %82, %106 : vector<8x32xf32>
    %108 = vector.extract_strided_slice %19 {offsets = [0, 24], sizes = [8, 8], strides = [1, 1]} : vector<8x32xf32> to vector<8x8xf32>
    %109 = arith.truncf %108 : vector<8x8xf32> to vector<8x8xbf16>
    %110 = vector.extract_strided_slice %24 {offsets = [0, 24], sizes = [16, 8], strides = [1, 1]} : vector<16x32xf32> to vector<16x8xf32>
    %111 = arith.truncf %110 : vector<16x8xf32> to vector<16x8xbf16>
    %112 = vector.extract_strided_slice %29 {offsets = [0, 24], sizes = [16, 8], strides = [1, 1]} : vector<16x32xf32> to vector<16x8xf32>
    %113 = arith.truncf %112 : vector<16x8xf32> to vector<16x8xbf16>
    %cst_54 = arith.constant dense<0.000000e+00> : vector<8x16xf32>
    %114 = tpu.matmul %109, %111, %cst_54 {dimension_numbers = #tpu.dot_dimension_numbers<[1], [1], [0], [0], [0, 0, 1, 0], [], []>} : vector<8x8xbf16>, vector<16x8xbf16>, vector<8x16xf32> -> vector<8x16xf32>
    %115 = arith.addf %114, %31 : vector<8x16xf32>
    %cst_55 = arith.constant dense<0xFF800000> : vector<8xf32>
    %116 = vector.multi_reduction <maximumf>, %115, %cst_55 [1] : vector<8x16xf32> to vector<8xf32>
    %117 = vector.shape_cast %116 : vector<8xf32> to vector<8x1xf32>
    %118 = vector.broadcast %117 : vector<8x1xf32> to vector<8x16xf32>
    %119 = arith.subf %115, %118 : vector<8x16xf32>
    %120 = math.exp %119 : vector<8x16xf32>
    %cst_56 = arith.constant dense<0.000000e+00> : vector<8xf32>
    %121 = vector.multi_reduction <add>, %120, %cst_56 [1] : vector<8x16xf32> to vector<8xf32>
    %122 = vector.shape_cast %121 : vector<8xf32> to vector<8x1xf32>
    %123 = tpu.reciprocal %122 {approx = true} : vector<8x1xf32> -> vector<8x1xf32>
    %124 = arith.truncf %120 : vector<8x16xf32> to vector<8x16xbf16>
    %cst_57 = arith.constant dense<0.000000e+00> : vector<8x8xf32>
    %125 = tpu.matmul %124, %113, %cst_57 {dimension_numbers = #tpu.dot_dimension_numbers<[1], [0], [0], [1], [0, 0, 1, 1], [], []>} : vector<8x16xbf16>, vector<16x8xbf16>, vector<8x8xf32> -> vector<8x8xf32>
    %126 = vector.broadcast %123 : vector<8x1xf32> to vector<8x8xf32>
    %127 = arith.mulf %125, %126 : vector<8x8xf32>
    %128 = arith.truncf %127 : vector<8x8xf32> to vector<8x8xbf16>
    %c3 = arith.constant 3 : index
    %c0_58 = arith.constant 0 : index
    %c0_59 = arith.constant 0 : index
    %129 = vector.load %arg9[%c3, %c0_58, %c0_59] : memref<4x8x32xbf16, #tpu.memory_space<vmem>>, vector<1x8x32xbf16>
    %130 = vector.shape_cast %129 : vector<1x8x32xbf16> to vector<8x32xbf16>
    %cst_60 = arith.constant dense<0.000000e+00> : vector<8x32xf32>
    %131 = tpu.matmul %128, %130, %cst_60 {dimension_numbers = #tpu.dot_dimension_numbers<[1], [0], [0], [1], [0, 0, 1, 1], [], []>} : vector<8x8xbf16>, vector<8x32xbf16>, vector<8x32xf32> -> vector<8x32xf32>
    %132 = arith.addf %107, %131 : vector<8x32xf32>
    %c0_61 = arith.constant 0 : index
    %c0_62 = arith.constant 0 : index
    %133 = vector.load %arg13[%c0_61, %c0_62] : memref<1x32xf32, #tpu.memory_space<vmem>>, vector<1x32xf32>
    %134 = vector.broadcast %133 : vector<1x32xf32> to vector<8x32xf32>
    %135 = arith.addf %132, %134 : vector<8x32xf32>
    %136 = arith.addf %1, %135 : vector<8x32xf32>
    %cst_63 = arith.constant dense<0.000000e+00> : vector<8xf32>
    %137 = vector.multi_reduction <add>, %136, %cst_63 [1] : vector<8x32xf32> to vector<8xf32>
    %138 = vector.shape_cast %137 : vector<8xf32> to vector<8x1xf32>
    %cst_64 = arith.constant 3.200000e+01 : f32
    %139 = vector.broadcast %cst_64 : f32 to vector<8x1xf32>
    %140 = arith.divf %138, %139 : vector<8x1xf32>
    %141 = vector.broadcast %140 : vector<8x1xf32> to vector<8x32xf32>
    %142 = arith.subf %136, %141 : vector<8x32xf32>
    %143 = arith.mulf %142, %142 : vector<8x32xf32>
    %cst_65 = arith.constant dense<0.000000e+00> : vector<8xf32>
    %144 = vector.multi_reduction <add>, %143, %cst_65 [1] : vector<8x32xf32> to vector<8xf32>
    %145 = vector.shape_cast %144 : vector<8xf32> to vector<8x1xf32>
    %cst_66 = arith.constant 3.200000e+01 : f32
    %146 = vector.broadcast %cst_66 : f32 to vector<8x1xf32>
    %147 = arith.divf %145, %146 : vector<8x1xf32>
    %148 = vector.broadcast %140 : vector<8x1xf32> to vector<8x32xf32>
    %149 = arith.subf %136, %148 : vector<8x32xf32>
    %cst_67 = arith.constant 9.99999974E-6 : f32
    %150 = vector.broadcast %cst_67 : f32 to vector<8x1xf32>
    %151 = arith.addf %147, %150 : vector<8x1xf32>
    %152 = math.rsqrt %151 : vector<8x1xf32>
    %153 = vector.broadcast %152 : vector<8x1xf32> to vector<8x32xf32>
    %154 = arith.mulf %149, %153 : vector<8x32xf32>
    %c0_68 = arith.constant 0 : index
    %c0_69 = arith.constant 0 : index
    %155 = vector.load %arg14[%c0_68, %c0_69] : memref<1x32xf32, #tpu.memory_space<vmem>>, vector<1x32xf32>
    %156 = vector.broadcast %155 : vector<1x32xf32> to vector<8x32xf32>
    %157 = arith.mulf %154, %156 : vector<8x32xf32>
    %c0_70 = arith.constant 0 : index
    %c0_71 = arith.constant 0 : index
    %158 = vector.load %arg15[%c0_70, %c0_71] : memref<1x32xf32, #tpu.memory_space<vmem>>, vector<1x32xf32>
    %159 = vector.broadcast %158 : vector<1x32xf32> to vector<8x32xf32>
    %160 = arith.addf %157, %159 : vector<8x32xf32>
    %c0_72 = arith.constant 0 : index
    %c0_73 = arith.constant 0 : index
    %c0_74 = arith.constant 0 : index
    %161 = vector.load %arg16[%c0_72, %c0_73, %c0_74] : memref<1x8x32xf32, #tpu.memory_space<vmem>>, vector<1x8x32xf32>
    %162 = vector.shape_cast %161 : vector<1x8x32xf32> to vector<8x32xf32>
    %163 = vector.shape_cast %160 : vector<8x32xf32> to vector<1x8x32xf32>
    tpu.vector_store %arg16[%c0_72, %c0_73, %c0_74], %163 {strides = array<i32>} : memref<1x8x32xf32, #tpu.memory_space<vmem>>, vector<1x8x32xf32>,
    return
  }
  func.func @transform_0(%arg0: i32) -> (i32, i32, i32) {
    %c0_i32 = arith.constant 0 : i32
    %c0_i32_0 = arith.constant 0 : i32
    %c0_i32_1 = arith.constant 0 : i32
    return %arg0, %c0_i32, %c0_i32_0 : i32, i32, i32
  }
  func.func @transform_1(%arg0: i32) -> (i32, i32, i32) {
    %c0_i32 = arith.constant 0 : i32
    %c0_i32_0 = arith.constant 0 : i32
    %c0_i32_1 = arith.constant 0 : i32
    return %arg0, %c0_i32, %c0_i32_0 : i32, i32, i32
  }
  func.func @transform_2(%arg0: i32) -> (i32, i32, i32) {
    %c0_i32 = arith.constant 0 : i32
    %c0_i32_0 = arith.constant 0 : i32
    %c0_i32_1 = arith.constant 0 : i32
    return %arg0, %c0_i32, %c0_i32_0 : i32, i32, i32
  }
  func.func @transform_3(%arg0: i32) -> (i32, i32, i32) {
    %c0_i32 = arith.constant 0 : i32
    %c0_i32_0 = arith.constant 0 : i32
    %c0_i32_1 = arith.constant 0 : i32
    return %arg0, %c0_i32, %c0_i32_0 : i32, i32, i32
  }
  func.func @transform_4(%arg0: i32) -> (i32, i32, i32) {
    %c0_i32 = arith.constant 0 : i32
    %c0_i32_0 = arith.constant 0 : i32
    %c0_i32_1 = arith.constant 0 : i32
    return %arg0, %c0_i32, %c0_i32_0 : i32, i32, i32
  }
  func.func @transform_5(%arg0: i32) -> (i32, i32) {
    %c0_i32 = arith.constant 0 : i32
    %c0_i32_0 = arith.constant 0 : i32
    %c0_i32_1 = arith.constant 0 : i32
    return %c0_i32, %c0_i32_0 : i32, i32
  }
  func.func @transform_6(%arg0: i32) -> (i32, i32) {
    %c0_i32 = arith.constant 0 : i32
    %c0_i32_0 = arith.constant 0 : i32
    %c0_i32_1 = arith.constant 0 : i32
    return %c0_i32, %c0_i32_0 : i32, i32
  }
  func.func @transform_7(%arg0: i32) -> (i32, i32) {
    %c0_i32 = arith.constant 0 : i32
    %c0_i32_0 = arith.constant 0 : i32
    %c0_i32_1 = arith.constant 0 : i32
    return %c0_i32, %c0_i32_0 : i32, i32
  }
  func.func @transform_8(%arg0: i32) -> (i32, i32, i32) {
    %c0_i32 = arith.constant 0 : i32
    %c0_i32_0 = arith.constant 0 : i32
    %c0_i32_1 = arith.constant 0 : i32
    %c0_i32_2 = arith.constant 0 : i32
    return %c0_i32, %c0_i32_0, %c0_i32_1 : i32, i32, i32
  }
  func.func @transform_9(%arg0: i32) -> (i32, i32) {
    %c0_i32 = arith.constant 0 : i32
    %c0_i32_0 = arith.constant 0 : i32
    %c0_i32_1 = arith.constant 0 : i32
    return %c0_i32, %c0_i32_0 : i32, i32
  }
  func.func @transform_10(%arg0: i32) -> (i32, i32) {
    %c0_i32 = arith.constant 0 : i32
    %c0_i32_0 = arith.constant 0 : i32
    %c0_i32_1 = arith.constant 0 : i32
    return %c0_i32, %c0_i32_0 : i32, i32
  }
  func.func @transform_11(%arg0: i32) -> (i32, i32) {
    %c0_i32 = arith.constant 0 : i32
    %c0_i32_0 = arith.constant 0 : i32
    %c0_i32_1 = arith.constant 0 : i32
    return %c0_i32, %c0_i32_0 : i32, i32
  }
  func.func @transform_12(%arg0: i32) -> (i32, i32) {
    %c0_i32 = arith.constant 0 : i32
    %c0_i32_0 = arith.constant 0 : i32
    %c0_i32_1 = arith.constant 0 : i32
    return %c0_i32, %c0_i32_0 : i32, i32
  }
  func.func @transform_13(%arg0: i32) -> (i32, i32) {
    %c0_i32 = arith.constant 0 : i32
    %c0_i32_0 = arith.constant 0 : i32
    %c0_i32_1 = arith.constant 0 : i32
    return %c0_i32, %c0_i32_0 : i32, i32
  }
  func.func @transform_14(%arg0: i32) -> (i32, i32) {
    %c0_i32 = arith.constant 0 : i32
    %c0_i32_0 = arith.constant 0 : i32
    %c0_i32_1 = arith.constant 0 : i32
    return %c0_i32, %c0_i32_0 : i32, i32
  }
  func.func @transform_15(%arg0: i32) -> (i32, i32, i32) {
    %c0_i32 = arith.constant 0 : i32
    %c0_i32_0 = arith.constant 0 : i32
    %c0_i32_1 = arith.constant 0 : i32
    return %arg0, %c0_i32, %c0_i32_0 : i32, i32, i32
  }
}

module attributes {stable_mosaic.version = 11 : i64} {
  func.func @_ffn_ln_kernel(%arg0: i32, %arg1: memref<16x32xf32, #tpu.memory_space<vmem>>, %arg2: memref<32x64xbf16, #tpu.memory_space<vmem>>, %arg3: memref<1x64xf32, #tpu.memory_space<vmem>>, %arg4: memref<64x32xbf16, #tpu.memory_space<vmem>>, %arg5: memref<1x32xf32, #tpu.memory_space<vmem>>, %arg6: memref<1x32xf32, #tpu.memory_space<vmem>>, %arg7: memref<1x32xf32, #tpu.memory_space<vmem>>, %arg8: memref<16x32xf32, #tpu.memory_space<vmem>>) attributes {dimension_semantics = [#tpu.dimension_semantics<parallel>], iteration_bounds = array<i64: 1>, scalar_prefetch = 0 : i64, scratch_operands = 0 : i64, tpu.core_type = #tpu.core_type<tc>, window_params = [{transform_indices = @transform_0, window_bounds = array<i64: 16, 32>}, {pipeline_mode = #tpu.pipeline_mode<synchronous>, transform_indices = @transform_1, window_bounds = array<i64: 32, 64>}, {pipeline_mode = #tpu.pipeline_mode<synchronous>, transform_indices = @transform_2, window_bounds = array<i64: 1, 64>}, {pipeline_mode = #tpu.pipeline_mode<synchronous>, transform_indices = @transform_3, window_bounds = array<i64: 64, 32>}, {pipeline_mode = #tpu.pipeline_mode<synchronous>, transform_indices = @transform_4, window_bounds = array<i64: 1, 32>}, {pipeline_mode = #tpu.pipeline_mode<synchronous>, transform_indices = @transform_5, window_bounds = array<i64: 1, 32>}, {pipeline_mode = #tpu.pipeline_mode<synchronous>, transform_indices = @transform_6, window_bounds = array<i64: 1, 32>}, {transform_indices = @transform_7, window_bounds = array<i64: 16, 32>}]} {
    %c0 = arith.constant 0 : index
    %c0_0 = arith.constant 0 : index
    %0 = vector.load %arg1[%c0, %c0_0] : memref<16x32xf32, #tpu.memory_space<vmem>>, vector<16x32xf32>
    %1 = arith.truncf %0 : vector<16x32xf32> to vector<16x32xbf16>
    %c0_1 = arith.constant 0 : index
    %c0_2 = arith.constant 0 : index
    %2 = vector.load %arg2[%c0_1, %c0_2] : memref<32x64xbf16, #tpu.memory_space<vmem>>, vector<32x64xbf16>
    %cst = arith.constant dense<0.000000e+00> : vector<16x64xf32>
    %3 = tpu.matmul %1, %2, %cst {dimension_numbers = #tpu.dot_dimension_numbers<[1], [0], [0], [1], [0, 0, 1, 1], [], []>} : vector<16x32xbf16>, vector<32x64xbf16>, vector<16x64xf32> -> vector<16x64xf32>
    %c0_3 = arith.constant 0 : index
    %c0_4 = arith.constant 0 : index
    %4 = vector.load %arg3[%c0_3, %c0_4] : memref<1x64xf32, #tpu.memory_space<vmem>>, vector<1x64xf32>
    %5 = vector.broadcast %4 : vector<1x64xf32> to vector<16x64xf32>
    %6 = arith.addf %3, %5 : vector<16x64xf32>
    %cst_5 = arith.constant 0.000000e+00 : f32
    %7 = vector.broadcast %cst_5 : f32 to vector<16x64xf32>
    %8 = arith.maximumf %6, %7 : vector<16x64xf32>
    %9 = arith.truncf %8 : vector<16x64xf32> to vector<16x64xbf16>
    %c0_6 = arith.constant 0 : index
    %c0_7 = arith.constant 0 : index
    %10 = vector.load %arg4[%c0_6, %c0_7] : memref<64x32xbf16, #tpu.memory_space<vmem>>, vector<64x32xbf16>
    %cst_8 = arith.constant dense<0.000000e+00> : vector<16x32xf32>
    %11 = tpu.matmul %9, %10, %cst_8 {dimension_numbers = #tpu.dot_dimension_numbers<[1], [0], [0], [1], [0, 0, 1, 1], [], []>} : vector<16x64xbf16>, vector<64x32xbf16>, vector<16x32xf32> -> vector<16x32xf32>
    %c0_9 = arith.constant 0 : index
    %c0_10 = arith.constant 0 : index
    %12 = vector.load %arg5[%c0_9, %c0_10] : memref<1x32xf32, #tpu.memory_space<vmem>>, vector<1x32xf32>
    %13 = vector.broadcast %12 : vector<1x32xf32> to vector<16x32xf32>
    %14 = arith.addf %11, %13 : vector<16x32xf32>
    %15 = arith.addf %0, %14 : vector<16x32xf32>
    %cst_11 = arith.constant dense<0.000000e+00> : vector<16xf32>
    %16 = vector.multi_reduction <add>, %15, %cst_11 [1] : vector<16x32xf32> to vector<16xf32>
    %17 = vector.shape_cast %16 : vector<16xf32> to vector<16x1xf32>
    %cst_12 = arith.constant 3.200000e+01 : f32
    %18 = vector.broadcast %cst_12 : f32 to vector<16x1xf32>
    %19 = arith.divf %17, %18 : vector<16x1xf32>
    %20 = vector.broadcast %19 : vector<16x1xf32> to vector<16x32xf32>
    %21 = arith.subf %15, %20 : vector<16x32xf32>
    %22 = arith.mulf %21, %21 : vector<16x32xf32>
    %cst_13 = arith.constant dense<0.000000e+00> : vector<16xf32>
    %23 = vector.multi_reduction <add>, %22, %cst_13 [1] : vector<16x32xf32> to vector<16xf32>
    %24 = vector.shape_cast %23 : vector<16xf32> to vector<16x1xf32>
    %cst_14 = arith.constant 3.200000e+01 : f32
    %25 = vector.broadcast %cst_14 : f32 to vector<16x1xf32>
    %26 = arith.divf %24, %25 : vector<16x1xf32>
    %27 = vector.broadcast %19 : vector<16x1xf32> to vector<16x32xf32>
    %28 = arith.subf %15, %27 : vector<16x32xf32>
    %cst_15 = arith.constant 9.99999974E-6 : f32
    %29 = vector.broadcast %cst_15 : f32 to vector<16x1xf32>
    %30 = arith.addf %26, %29 : vector<16x1xf32>
    %31 = math.rsqrt %30 : vector<16x1xf32>
    %32 = vector.broadcast %31 : vector<16x1xf32> to vector<16x32xf32>
    %33 = arith.mulf %28, %32 : vector<16x32xf32>
    %c0_16 = arith.constant 0 : index
    %c0_17 = arith.constant 0 : index
    %34 = vector.load %arg6[%c0_16, %c0_17] : memref<1x32xf32, #tpu.memory_space<vmem>>, vector<1x32xf32>
    %35 = vector.broadcast %34 : vector<1x32xf32> to vector<16x32xf32>
    %36 = arith.mulf %33, %35 : vector<16x32xf32>
    %c0_18 = arith.constant 0 : index
    %c0_19 = arith.constant 0 : index
    %37 = vector.load %arg7[%c0_18, %c0_19] : memref<1x32xf32, #tpu.memory_space<vmem>>, vector<1x32xf32>
    %38 = vector.broadcast %37 : vector<1x32xf32> to vector<16x32xf32>
    %39 = arith.addf %36, %38 : vector<16x32xf32>
    %c0_20 = arith.constant 0 : index
    %c0_21 = arith.constant 0 : index
    %40 = vector.load %arg8[%c0_20, %c0_21] : memref<16x32xf32, #tpu.memory_space<vmem>>, vector<16x32xf32>
    tpu.vector_store %arg8[%c0_20, %c0_21], %39 {strides = array<i32>} : memref<16x32xf32, #tpu.memory_space<vmem>>, vector<16x32xf32>,
    return
  }
  func.func @transform_0(%arg0: i32) -> (i32, i32) {
    %c0_i32 = arith.constant 0 : i32
    %c0_i32_0 = arith.constant 0 : i32
    return %arg0, %c0_i32 : i32, i32
  }
  func.func @transform_1(%arg0: i32) -> (i32, i32) {
    %c0_i32 = arith.constant 0 : i32
    %c0_i32_0 = arith.constant 0 : i32
    %c0_i32_1 = arith.constant 0 : i32
    return %c0_i32, %c0_i32_0 : i32, i32
  }
  func.func @transform_2(%arg0: i32) -> (i32, i32) {
    %c0_i32 = arith.constant 0 : i32
    %c0_i32_0 = arith.constant 0 : i32
    %c0_i32_1 = arith.constant 0 : i32
    return %c0_i32, %c0_i32_0 : i32, i32
  }
  func.func @transform_3(%arg0: i32) -> (i32, i32) {
    %c0_i32 = arith.constant 0 : i32
    %c0_i32_0 = arith.constant 0 : i32
    %c0_i32_1 = arith.constant 0 : i32
    return %c0_i32, %c0_i32_0 : i32, i32
  }
  func.func @transform_4(%arg0: i32) -> (i32, i32) {
    %c0_i32 = arith.constant 0 : i32
    %c0_i32_0 = arith.constant 0 : i32
    %c0_i32_1 = arith.constant 0 : i32
    return %c0_i32, %c0_i32_0 : i32, i32
  }
  func.func @transform_5(%arg0: i32) -> (i32, i32) {
    %c0_i32 = arith.constant 0 : i32
    %c0_i32_0 = arith.constant 0 : i32
    %c0_i32_1 = arith.constant 0 : i32
    return %c0_i32, %c0_i32_0 : i32, i32
  }
  func.func @transform_6(%arg0: i32) -> (i32, i32) {
    %c0_i32 = arith.constant 0 : i32
    %c0_i32_0 = arith.constant 0 : i32
    %c0_i32_1 = arith.constant 0 : i32
    return %c0_i32, %c0_i32_0 : i32, i32
  }
  func.func @transform_7(%arg0: i32) -> (i32, i32) {
    %c0_i32 = arith.constant 0 : i32
    %c0_i32_0 = arith.constant 0 : i32
    return %arg0, %c0_i32 : i32, i32
  }
}

module attributes {stable_mosaic.version = 11 : i64} {
  func.func @_mha_ln_kernel(%arg0: i32, %arg1: memref<1x8x32xf32, #tpu.memory_space<vmem>>, %arg2: memref<1x8x32xf32, #tpu.memory_space<vmem>>, %arg3: memref<32x32xbf16, #tpu.memory_space<vmem>>, %arg4: memref<32x32xbf16, #tpu.memory_space<vmem>>, %arg5: memref<32x32xbf16, #tpu.memory_space<vmem>>, %arg6: memref<4x8x32xbf16, #tpu.memory_space<vmem>>, %arg7: memref<1x32xf32, #tpu.memory_space<vmem>>, %arg8: memref<1x32xf32, #tpu.memory_space<vmem>>, %arg9: memref<1x32xf32, #tpu.memory_space<vmem>>, %arg10: memref<1x32xf32, #tpu.memory_space<vmem>>, %arg11: memref<1x32xf32, #tpu.memory_space<vmem>>, %arg12: memref<1x32xf32, #tpu.memory_space<vmem>>, %arg13: memref<1x8x32xf32, #tpu.memory_space<vmem>>) attributes {dimension_semantics = [#tpu.dimension_semantics<parallel>], iteration_bounds = array<i64: 2>, scalar_prefetch = 0 : i64, scratch_operands = 0 : i64, tpu.core_type = #tpu.core_type<tc>, window_params = [{transform_indices = @transform_0, window_bounds = array<i64: 1, 8, 32>}, {transform_indices = @transform_1, window_bounds = array<i64: 1, 8, 32>}, {pipeline_mode = #tpu.pipeline_mode<synchronous>, transform_indices = @transform_2, window_bounds = array<i64: 32, 32>}, {pipeline_mode = #tpu.pipeline_mode<synchronous>, transform_indices = @transform_3, window_bounds = array<i64: 32, 32>}, {pipeline_mode = #tpu.pipeline_mode<synchronous>, transform_indices = @transform_4, window_bounds = array<i64: 32, 32>}, {pipeline_mode = #tpu.pipeline_mode<synchronous>, transform_indices = @transform_5, window_bounds = array<i64: 4, 8, 32>}, {pipeline_mode = #tpu.pipeline_mode<synchronous>, transform_indices = @transform_6, window_bounds = array<i64: 1, 32>}, {pipeline_mode = #tpu.pipeline_mode<synchronous>, transform_indices = @transform_7, window_bounds = array<i64: 1, 32>}, {pipeline_mode = #tpu.pipeline_mode<synchronous>, transform_indices = @transform_8, window_bounds = array<i64: 1, 32>}, {pipeline_mode = #tpu.pipeline_mode<synchronous>, transform_indices = @transform_9, window_bounds = array<i64: 1, 32>}, {pipeline_mode = #tpu.pipeline_mode<synchronous>, transform_indices = @transform_10, window_bounds = array<i64: 1, 32>}, {pipeline_mode = #tpu.pipeline_mode<synchronous>, transform_indices = @transform_11, window_bounds = array<i64: 1, 32>}, {transform_indices = @transform_12, window_bounds = array<i64: 1, 8, 32>}]} {
    %c0 = arith.constant 0 : index
    %c0_0 = arith.constant 0 : index
    %c0_1 = arith.constant 0 : index
    %0 = vector.load %arg1[%c0, %c0_0, %c0_1] : memref<1x8x32xf32, #tpu.memory_space<vmem>>, vector<1x8x32xf32>
    %1 = vector.shape_cast %0 : vector<1x8x32xf32> to vector<8x32xf32>
    %c0_2 = arith.constant 0 : index
    %c0_3 = arith.constant 0 : index
    %c0_4 = arith.constant 0 : index
    %2 = vector.load %arg2[%c0_2, %c0_3, %c0_4] : memref<1x8x32xf32, #tpu.memory_space<vmem>>, vector<1x8x32xf32>
    %3 = vector.shape_cast %2 : vector<1x8x32xf32> to vector<8x32xf32>
    %4 = arith.addf %1, %3 : vector<8x32xf32>
    %5 = arith.truncf %4 : vector<8x32xf32> to vector<8x32xbf16>
    %6 = arith.truncf %1 : vector<8x32xf32> to vector<8x32xbf16>
    %c0_5 = arith.constant 0 : index
    %c0_6 = arith.constant 0 : index
    %7 = vector.load %arg3[%c0_5, %c0_6] : memref<32x32xbf16, #tpu.memory_space<vmem>>, vector<32x32xbf16>
    %cst = arith.constant dense<0.000000e+00> : vector<8x32xf32>
    %8 = tpu.matmul %5, %7, %cst {dimension_numbers = #tpu.dot_dimension_numbers<[1], [0], [0], [1], [0, 0, 1, 1], [], []>} : vector<8x32xbf16>, vector<32x32xbf16>, vector<8x32xf32> -> vector<8x32xf32>
    %c0_7 = arith.constant 0 : index
    %c0_8 = arith.constant 0 : index
    %9 = vector.load %arg7[%c0_7, %c0_8] : memref<1x32xf32, #tpu.memory_space<vmem>>, vector<1x32xf32>
    %10 = vector.broadcast %9 : vector<1x32xf32> to vector<8x32xf32>
    %11 = arith.addf %8, %10 : vector<8x32xf32>
    %c0_9 = arith.constant 0 : index
    %c0_10 = arith.constant 0 : index
    %12 = vector.load %arg4[%c0_9, %c0_10] : memref<32x32xbf16, #tpu.memory_space<vmem>>, vector<32x32xbf16>
    %cst_11 = arith.constant dense<0.000000e+00> : vector<8x32xf32>
    %13 = tpu.matmul %5, %12, %cst_11 {dimension_numbers = #tpu.dot_dimension_numbers<[1], [0], [0], [1], [0, 0, 1, 1], [], []>} : vector<8x32xbf16>, vector<32x32xbf16>, vector<8x32xf32> -> vector<8x32xf32>
    %c0_12 = arith.constant 0 : index
    %c0_13 = arith.constant 0 : index
    %14 = vector.load %arg8[%c0_12, %c0_13] : memref<1x32xf32, #tpu.memory_space<vmem>>, vector<1x32xf32>
    %15 = vector.broadcast %14 : vector<1x32xf32> to vector<8x32xf32>
    %16 = arith.addf %13, %15 : vector<8x32xf32>
    %c0_14 = arith.constant 0 : index
    %c0_15 = arith.constant 0 : index
    %17 = vector.load %arg5[%c0_14, %c0_15] : memref<32x32xbf16, #tpu.memory_space<vmem>>, vector<32x32xbf16>
    %cst_16 = arith.constant dense<0.000000e+00> : vector<8x32xf32>
    %18 = tpu.matmul %6, %17, %cst_16 {dimension_numbers = #tpu.dot_dimension_numbers<[1], [0], [0], [1], [0, 0, 1, 1], [], []>} : vector<8x32xbf16>, vector<32x32xbf16>, vector<8x32xf32> -> vector<8x32xf32>
    %c0_17 = arith.constant 0 : index
    %c0_18 = arith.constant 0 : index
    %19 = vector.load %arg9[%c0_17, %c0_18] : memref<1x32xf32, #tpu.memory_space<vmem>>, vector<1x32xf32>
    %20 = vector.broadcast %19 : vector<1x32xf32> to vector<8x32xf32>
    %21 = arith.addf %18, %20 : vector<8x32xf32>
    %cst_19 = arith.constant 0.000000e+00 : f32
    %22 = vector.broadcast %cst_19 : f32 to vector<8x32xf32>
    %23 = vector.extract_strided_slice %11 {offsets = [0, 0], sizes = [8, 8], strides = [1, 1]} : vector<8x32xf32> to vector<8x8xf32>
    %24 = arith.truncf %23 : vector<8x8xf32> to vector<8x8xbf16>
    %25 = vector.extract_strided_slice %16 {offsets = [0, 0], sizes = [8, 8], strides = [1, 1]} : vector<8x32xf32> to vector<8x8xf32>
    %26 = arith.truncf %25 : vector<8x8xf32> to vector<8x8xbf16>
    %27 = vector.extract_strided_slice %21 {offsets = [0, 0], sizes = [8, 8], strides = [1, 1]} : vector<8x32xf32> to vector<8x8xf32>
    %28 = arith.truncf %27 : vector<8x8xf32> to vector<8x8xbf16>
    %cst_20 = arith.constant dense<0.000000e+00> : vector<8x8xf32>
    %29 = tpu.matmul %24, %26, %cst_20 {dimension_numbers = #tpu.dot_dimension_numbers<[1], [1], [0], [0], [0, 0, 1, 0], [], []>} : vector<8x8xbf16>, vector<8x8xbf16>, vector<8x8xf32> -> vector<8x8xf32>
    %cst_21 = arith.constant dense<0xFF800000> : vector<8xf32>
    %30 = vector.multi_reduction <maximumf>, %29, %cst_21 [1] : vector<8x8xf32> to vector<8xf32>
    %31 = vector.shape_cast %30 : vector<8xf32> to vector<8x1xf32>
    %32 = vector.broadcast %31 : vector<8x1xf32> to vector<8x8xf32>
    %33 = arith.subf %29, %32 : vector<8x8xf32>
    %34 = math.exp %33 : vector<8x8xf32>
    %cst_22 = arith.constant dense<0.000000e+00> : vector<8xf32>
    %35 = vector.multi_reduction <add>, %34, %cst_22 [1] : vector<8x8xf32> to vector<8xf32>
    %36 = vector.shape_cast %35 : vector<8xf32> to vector<8x1xf32>
    %37 = tpu.reciprocal %36 {approx = true} : vector<8x1xf32> -> vector<8x1xf32>
    %38 = arith.truncf %34 : vector<8x8xf32> to vector<8x8xbf16>
    %cst_23 = arith.constant dense<0.000000e+00> : vector<8x8xf32>
    %39 = tpu.matmul %38, %28, %cst_23 {dimension_numbers = #tpu.dot_dimension_numbers<[1], [0], [0], [1], [0, 0, 1, 1], [], []>} : vector<8x8xbf16>, vector<8x8xbf16>, vector<8x8xf32> -> vector<8x8xf32>
    %40 = vector.broadcast %37 : vector<8x1xf32> to vector<8x8xf32>
    %41 = arith.mulf %39, %40 : vector<8x8xf32>
    %42 = arith.truncf %41 : vector<8x8xf32> to vector<8x8xbf16>
    %c0_24 = arith.constant 0 : index
    %c0_25 = arith.constant 0 : index
    %c0_26 = arith.constant 0 : index
    %43 = vector.load %arg6[%c0_24, %c0_25, %c0_26] : memref<4x8x32xbf16, #tpu.memory_space<vmem>>, vector<1x8x32xbf16>
    %44 = vector.shape_cast %43 : vector<1x8x32xbf16> to vector<8x32xbf16>
    %cst_27 = arith.constant dense<0.000000e+00> : vector<8x32xf32>
    %45 = tpu.matmul %42, %44, %cst_27 {dimension_numbers = #tpu.dot_dimension_numbers<[1], [0], [0], [1], [0, 0, 1, 1], [], []>} : vector<8x8xbf16>, vector<8x32xbf16>, vector<8x32xf32> -> vector<8x32xf32>
    %46 = arith.addf %22, %45 : vector<8x32xf32>
    %47 = vector.extract_strided_slice %11 {offsets = [0, 8], sizes = [8, 8], strides = [1, 1]} : vector<8x32xf32> to vector<8x8xf32>
    %48 = arith.truncf %47 : vector<8x8xf32> to vector<8x8xbf16>
    %49 = vector.extract_strided_slice %16 {offsets = [0, 8], sizes = [8, 8], strides = [1, 1]} : vector<8x32xf32> to vector<8x8xf32>
    %50 = arith.truncf %49 : vector<8x8xf32> to vector<8x8xbf16>
    %51 = vector.extract_strided_slice %21 {offsets = [0, 8], sizes = [8, 8], strides = [1, 1]} : vector<8x32xf32> to vector<8x8xf32>
    %52 = arith.truncf %51 : vector<8x8xf32> to vector<8x8xbf16>
    %cst_28 = arith.constant dense<0.000000e+00> : vector<8x8xf32>
    %53 = tpu.matmul %48, %50, %cst_28 {dimension_numbers = #tpu.dot_dimension_numbers<[1], [1], [0], [0], [0, 0, 1, 0], [], []>} : vector<8x8xbf16>, vector<8x8xbf16>, vector<8x8xf32> -> vector<8x8xf32>
    %cst_29 = arith.constant dense<0xFF800000> : vector<8xf32>
    %54 = vector.multi_reduction <maximumf>, %53, %cst_29 [1] : vector<8x8xf32> to vector<8xf32>
    %55 = vector.shape_cast %54 : vector<8xf32> to vector<8x1xf32>
    %56 = vector.broadcast %55 : vector<8x1xf32> to vector<8x8xf32>
    %57 = arith.subf %53, %56 : vector<8x8xf32>
    %58 = math.exp %57 : vector<8x8xf32>
    %cst_30 = arith.constant dense<0.000000e+00> : vector<8xf32>
    %59 = vector.multi_reduction <add>, %58, %cst_30 [1] : vector<8x8xf32> to vector<8xf32>
    %60 = vector.shape_cast %59 : vector<8xf32> to vector<8x1xf32>
    %61 = tpu.reciprocal %60 {approx = true} : vector<8x1xf32> -> vector<8x1xf32>
    %62 = arith.truncf %58 : vector<8x8xf32> to vector<8x8xbf16>
    %cst_31 = arith.constant dense<0.000000e+00> : vector<8x8xf32>
    %63 = tpu.matmul %62, %52, %cst_31 {dimension_numbers = #tpu.dot_dimension_numbers<[1], [0], [0], [1], [0, 0, 1, 1], [], []>} : vector<8x8xbf16>, vector<8x8xbf16>, vector<8x8xf32> -> vector<8x8xf32>
    %64 = vector.broadcast %61 : vector<8x1xf32> to vector<8x8xf32>
    %65 = arith.mulf %63, %64 : vector<8x8xf32>
    %66 = arith.truncf %65 : vector<8x8xf32> to vector<8x8xbf16>
    %c1 = arith.constant 1 : index
    %c0_32 = arith.constant 0 : index
    %c0_33 = arith.constant 0 : index
    %67 = vector.load %arg6[%c1, %c0_32, %c0_33] : memref<4x8x32xbf16, #tpu.memory_space<vmem>>, vector<1x8x32xbf16>
    %68 = vector.shape_cast %67 : vector<1x8x32xbf16> to vector<8x32xbf16>
    %cst_34 = arith.constant dense<0.000000e+00> : vector<8x32xf32>
    %69 = tpu.matmul %66, %68, %cst_34 {dimension_numbers = #tpu.dot_dimension_numbers<[1], [0], [0], [1], [0, 0, 1, 1], [], []>} : vector<8x8xbf16>, vector<8x32xbf16>, vector<8x32xf32> -> vector<8x32xf32>
    %70 = arith.addf %46, %69 : vector<8x32xf32>
    %71 = vector.extract_strided_slice %11 {offsets = [0, 16], sizes = [8, 8], strides = [1, 1]} : vector<8x32xf32> to vector<8x8xf32>
    %72 = arith.truncf %71 : vector<8x8xf32> to vector<8x8xbf16>
    %73 = vector.extract_strided_slice %16 {offsets = [0, 16], sizes = [8, 8], strides = [1, 1]} : vector<8x32xf32> to vector<8x8xf32>
    %74 = arith.truncf %73 : vector<8x8xf32> to vector<8x8xbf16>
    %75 = vector.extract_strided_slice %21 {offsets = [0, 16], sizes = [8, 8], strides = [1, 1]} : vector<8x32xf32> to vector<8x8xf32>
    %76 = arith.truncf %75 : vector<8x8xf32> to vector<8x8xbf16>
    %cst_35 = arith.constant dense<0.000000e+00> : vector<8x8xf32>
    %77 = tpu.matmul %72, %74, %cst_35 {dimension_numbers = #tpu.dot_dimension_numbers<[1], [1], [0], [0], [0, 0, 1, 0], [], []>} : vector<8x8xbf16>, vector<8x8xbf16>, vector<8x8xf32> -> vector<8x8xf32>
    %cst_36 = arith.constant dense<0xFF800000> : vector<8xf32>
    %78 = vector.multi_reduction <maximumf>, %77, %cst_36 [1] : vector<8x8xf32> to vector<8xf32>
    %79 = vector.shape_cast %78 : vector<8xf32> to vector<8x1xf32>
    %80 = vector.broadcast %79 : vector<8x1xf32> to vector<8x8xf32>
    %81 = arith.subf %77, %80 : vector<8x8xf32>
    %82 = math.exp %81 : vector<8x8xf32>
    %cst_37 = arith.constant dense<0.000000e+00> : vector<8xf32>
    %83 = vector.multi_reduction <add>, %82, %cst_37 [1] : vector<8x8xf32> to vector<8xf32>
    %84 = vector.shape_cast %83 : vector<8xf32> to vector<8x1xf32>
    %85 = tpu.reciprocal %84 {approx = true} : vector<8x1xf32> -> vector<8x1xf32>
    %86 = arith.truncf %82 : vector<8x8xf32> to vector<8x8xbf16>
    %cst_38 = arith.constant dense<0.000000e+00> : vector<8x8xf32>
    %87 = tpu.matmul %86, %76, %cst_38 {dimension_numbers = #tpu.dot_dimension_numbers<[1], [0], [0], [1], [0, 0, 1, 1], [], []>} : vector<8x8xbf16>, vector<8x8xbf16>, vector<8x8xf32> -> vector<8x8xf32>
    %88 = vector.broadcast %85 : vector<8x1xf32> to vector<8x8xf32>
    %89 = arith.mulf %87, %88 : vector<8x8xf32>
    %90 = arith.truncf %89 : vector<8x8xf32> to vector<8x8xbf16>
    %c2 = arith.constant 2 : index
    %c0_39 = arith.constant 0 : index
    %c0_40 = arith.constant 0 : index
    %91 = vector.load %arg6[%c2, %c0_39, %c0_40] : memref<4x8x32xbf16, #tpu.memory_space<vmem>>, vector<1x8x32xbf16>
    %92 = vector.shape_cast %91 : vector<1x8x32xbf16> to vector<8x32xbf16>
    %cst_41 = arith.constant dense<0.000000e+00> : vector<8x32xf32>
    %93 = tpu.matmul %90, %92, %cst_41 {dimension_numbers = #tpu.dot_dimension_numbers<[1], [0], [0], [1], [0, 0, 1, 1], [], []>} : vector<8x8xbf16>, vector<8x32xbf16>, vector<8x32xf32> -> vector<8x32xf32>
    %94 = arith.addf %70, %93 : vector<8x32xf32>
    %95 = vector.extract_strided_slice %11 {offsets = [0, 24], sizes = [8, 8], strides = [1, 1]} : vector<8x32xf32> to vector<8x8xf32>
    %96 = arith.truncf %95 : vector<8x8xf32> to vector<8x8xbf16>
    %97 = vector.extract_strided_slice %16 {offsets = [0, 24], sizes = [8, 8], strides = [1, 1]} : vector<8x32xf32> to vector<8x8xf32>
    %98 = arith.truncf %97 : vector<8x8xf32> to vector<8x8xbf16>
    %99 = vector.extract_strided_slice %21 {offsets = [0, 24], sizes = [8, 8], strides = [1, 1]} : vector<8x32xf32> to vector<8x8xf32>
    %100 = arith.truncf %99 : vector<8x8xf32> to vector<8x8xbf16>
    %cst_42 = arith.constant dense<0.000000e+00> : vector<8x8xf32>
    %101 = tpu.matmul %96, %98, %cst_42 {dimension_numbers = #tpu.dot_dimension_numbers<[1], [1], [0], [0], [0, 0, 1, 0], [], []>} : vector<8x8xbf16>, vector<8x8xbf16>, vector<8x8xf32> -> vector<8x8xf32>
    %cst_43 = arith.constant dense<0xFF800000> : vector<8xf32>
    %102 = vector.multi_reduction <maximumf>, %101, %cst_43 [1] : vector<8x8xf32> to vector<8xf32>
    %103 = vector.shape_cast %102 : vector<8xf32> to vector<8x1xf32>
    %104 = vector.broadcast %103 : vector<8x1xf32> to vector<8x8xf32>
    %105 = arith.subf %101, %104 : vector<8x8xf32>
    %106 = math.exp %105 : vector<8x8xf32>
    %cst_44 = arith.constant dense<0.000000e+00> : vector<8xf32>
    %107 = vector.multi_reduction <add>, %106, %cst_44 [1] : vector<8x8xf32> to vector<8xf32>
    %108 = vector.shape_cast %107 : vector<8xf32> to vector<8x1xf32>
    %109 = tpu.reciprocal %108 {approx = true} : vector<8x1xf32> -> vector<8x1xf32>
    %110 = arith.truncf %106 : vector<8x8xf32> to vector<8x8xbf16>
    %cst_45 = arith.constant dense<0.000000e+00> : vector<8x8xf32>
    %111 = tpu.matmul %110, %100, %cst_45 {dimension_numbers = #tpu.dot_dimension_numbers<[1], [0], [0], [1], [0, 0, 1, 1], [], []>} : vector<8x8xbf16>, vector<8x8xbf16>, vector<8x8xf32> -> vector<8x8xf32>
    %112 = vector.broadcast %109 : vector<8x1xf32> to vector<8x8xf32>
    %113 = arith.mulf %111, %112 : vector<8x8xf32>
    %114 = arith.truncf %113 : vector<8x8xf32> to vector<8x8xbf16>
    %c3 = arith.constant 3 : index
    %c0_46 = arith.constant 0 : index
    %c0_47 = arith.constant 0 : index
    %115 = vector.load %arg6[%c3, %c0_46, %c0_47] : memref<4x8x32xbf16, #tpu.memory_space<vmem>>, vector<1x8x32xbf16>
    %116 = vector.shape_cast %115 : vector<1x8x32xbf16> to vector<8x32xbf16>
    %cst_48 = arith.constant dense<0.000000e+00> : vector<8x32xf32>
    %117 = tpu.matmul %114, %116, %cst_48 {dimension_numbers = #tpu.dot_dimension_numbers<[1], [0], [0], [1], [0, 0, 1, 1], [], []>} : vector<8x8xbf16>, vector<8x32xbf16>, vector<8x32xf32> -> vector<8x32xf32>
    %118 = arith.addf %94, %117 : vector<8x32xf32>
    %c0_49 = arith.constant 0 : index
    %c0_50 = arith.constant 0 : index
    %119 = vector.load %arg10[%c0_49, %c0_50] : memref<1x32xf32, #tpu.memory_space<vmem>>, vector<1x32xf32>
    %120 = vector.broadcast %119 : vector<1x32xf32> to vector<8x32xf32>
    %121 = arith.addf %118, %120 : vector<8x32xf32>
    %122 = arith.addf %1, %121 : vector<8x32xf32>
    %cst_51 = arith.constant dense<0.000000e+00> : vector<8xf32>
    %123 = vector.multi_reduction <add>, %122, %cst_51 [1] : vector<8x32xf32> to vector<8xf32>
    %124 = vector.shape_cast %123 : vector<8xf32> to vector<8x1xf32>
    %cst_52 = arith.constant 3.200000e+01 : f32
    %125 = vector.broadcast %cst_52 : f32 to vector<8x1xf32>
    %126 = arith.divf %124, %125 : vector<8x1xf32>
    %127 = vector.broadcast %126 : vector<8x1xf32> to vector<8x32xf32>
    %128 = arith.subf %122, %127 : vector<8x32xf32>
    %129 = arith.mulf %128, %128 : vector<8x32xf32>
    %cst_53 = arith.constant dense<0.000000e+00> : vector<8xf32>
    %130 = vector.multi_reduction <add>, %129, %cst_53 [1] : vector<8x32xf32> to vector<8xf32>
    %131 = vector.shape_cast %130 : vector<8xf32> to vector<8x1xf32>
    %cst_54 = arith.constant 3.200000e+01 : f32
    %132 = vector.broadcast %cst_54 : f32 to vector<8x1xf32>
    %133 = arith.divf %131, %132 : vector<8x1xf32>
    %134 = vector.broadcast %126 : vector<8x1xf32> to vector<8x32xf32>
    %135 = arith.subf %122, %134 : vector<8x32xf32>
    %cst_55 = arith.constant 9.99999974E-6 : f32
    %136 = vector.broadcast %cst_55 : f32 to vector<8x1xf32>
    %137 = arith.addf %133, %136 : vector<8x1xf32>
    %138 = math.rsqrt %137 : vector<8x1xf32>
    %139 = vector.broadcast %138 : vector<8x1xf32> to vector<8x32xf32>
    %140 = arith.mulf %135, %139 : vector<8x32xf32>
    %c0_56 = arith.constant 0 : index
    %c0_57 = arith.constant 0 : index
    %141 = vector.load %arg11[%c0_56, %c0_57] : memref<1x32xf32, #tpu.memory_space<vmem>>, vector<1x32xf32>
    %142 = vector.broadcast %141 : vector<1x32xf32> to vector<8x32xf32>
    %143 = arith.mulf %140, %142 : vector<8x32xf32>
    %c0_58 = arith.constant 0 : index
    %c0_59 = arith.constant 0 : index
    %144 = vector.load %arg12[%c0_58, %c0_59] : memref<1x32xf32, #tpu.memory_space<vmem>>, vector<1x32xf32>
    %145 = vector.broadcast %144 : vector<1x32xf32> to vector<8x32xf32>
    %146 = arith.addf %143, %145 : vector<8x32xf32>
    %c0_60 = arith.constant 0 : index
    %c0_61 = arith.constant 0 : index
    %c0_62 = arith.constant 0 : index
    %147 = vector.load %arg13[%c0_60, %c0_61, %c0_62] : memref<1x8x32xf32, #tpu.memory_space<vmem>>, vector<1x8x32xf32>
    %148 = vector.shape_cast %147 : vector<1x8x32xf32> to vector<8x32xf32>
    %149 = vector.shape_cast %146 : vector<8x32xf32> to vector<1x8x32xf32>
    tpu.vector_store %arg13[%c0_60, %c0_61, %c0_62], %149 {strides = array<i32>} : memref<1x8x32xf32, #tpu.memory_space<vmem>>, vector<1x8x32xf32>,
    return
  }
  func.func @transform_0(%arg0: i32) -> (i32, i32, i32) {
    %c0_i32 = arith.constant 0 : i32
    %c0_i32_0 = arith.constant 0 : i32
    %c0_i32_1 = arith.constant 0 : i32
    return %arg0, %c0_i32, %c0_i32_0 : i32, i32, i32
  }
  func.func @transform_1(%arg0: i32) -> (i32, i32, i32) {
    %c0_i32 = arith.constant 0 : i32
    %c0_i32_0 = arith.constant 0 : i32
    %c0_i32_1 = arith.constant 0 : i32
    return %arg0, %c0_i32, %c0_i32_0 : i32, i32, i32
  }
  func.func @transform_2(%arg0: i32) -> (i32, i32) {
    %c0_i32 = arith.constant 0 : i32
    %c0_i32_0 = arith.constant 0 : i32
    %c0_i32_1 = arith.constant 0 : i32
    return %c0_i32, %c0_i32_0 : i32, i32
  }
  func.func @transform_3(%arg0: i32) -> (i32, i32) {
    %c0_i32 = arith.constant 0 : i32
    %c0_i32_0 = arith.constant 0 : i32
    %c0_i32_1 = arith.constant 0 : i32
    return %c0_i32, %c0_i32_0 : i32, i32
  }
  func.func @transform_4(%arg0: i32) -> (i32, i32) {
    %c0_i32 = arith.constant 0 : i32
    %c0_i32_0 = arith.constant 0 : i32
    %c0_i32_1 = arith.constant 0 : i32
    return %c0_i32, %c0_i32_0 : i32, i32
  }
  func.func @transform_5(%arg0: i32) -> (i32, i32, i32) {
    %c0_i32 = arith.constant 0 : i32
    %c0_i32_0 = arith.constant 0 : i32
    %c0_i32_1 = arith.constant 0 : i32
    %c0_i32_2 = arith.constant 0 : i32
    return %c0_i32, %c0_i32_0, %c0_i32_1 : i32, i32, i32
  }
  func.func @transform_6(%arg0: i32) -> (i32, i32) {
    %c0_i32 = arith.constant 0 : i32
    %c0_i32_0 = arith.constant 0 : i32
    %c0_i32_1 = arith.constant 0 : i32
    return %c0_i32, %c0_i32_0 : i32, i32
  }
  func.func @transform_7(%arg0: i32) -> (i32, i32) {
    %c0_i32 = arith.constant 0 : i32
    %c0_i32_0 = arith.constant 0 : i32
    %c0_i32_1 = arith.constant 0 : i32
    return %c0_i32, %c0_i32_0 : i32, i32
  }
  func.func @transform_8(%arg0: i32) -> (i32, i32) {
    %c0_i32 = arith.constant 0 : i32
    %c0_i32_0 = arith.constant 0 : i32
    %c0_i32_1 = arith.constant 0 : i32
    return %c0_i32, %c0_i32_0 : i32, i32
  }
  func.func @transform_9(%arg0: i32) -> (i32, i32) {
    %c0_i32 = arith.constant 0 : i32
    %c0_i32_0 = arith.constant 0 : i32
    %c0_i32_1 = arith.constant 0 : i32
    return %c0_i32, %c0_i32_0 : i32, i32
  }
  func.func @transform_10(%arg0: i32) -> (i32, i32) {
    %c0_i32 = arith.constant 0 : i32
    %c0_i32_0 = arith.constant 0 : i32
    %c0_i32_1 = arith.constant 0 : i32
    return %c0_i32, %c0_i32_0 : i32, i32
  }
  func.func @transform_11(%arg0: i32) -> (i32, i32) {
    %c0_i32 = arith.constant 0 : i32
    %c0_i32_0 = arith.constant 0 : i32
    %c0_i32_1 = arith.constant 0 : i32
    return %c0_i32, %c0_i32_0 : i32, i32
  }
  func.func @transform_12(%arg0: i32) -> (i32, i32, i32) {
    %c0_i32 = arith.constant 0 : i32
    %c0_i32_0 = arith.constant 0 : i32
    %c0_i32_1 = arith.constant 0 : i32
    return %arg0, %c0_i32, %c0_i32_0 : i32, i32, i32
  }
}

module attributes {stable_mosaic.version = 11 : i64} {
  func.func @_ffn_ln_kernel(%arg0: i32, %arg1: memref<16x32xf32, #tpu.memory_space<vmem>>, %arg2: memref<32x64xbf16, #tpu.memory_space<vmem>>, %arg3: memref<1x64xf32, #tpu.memory_space<vmem>>, %arg4: memref<64x32xbf16, #tpu.memory_space<vmem>>, %arg5: memref<1x32xf32, #tpu.memory_space<vmem>>, %arg6: memref<1x32xf32, #tpu.memory_space<vmem>>, %arg7: memref<1x32xf32, #tpu.memory_space<vmem>>, %arg8: memref<1x32xf32, #tpu.memory_space<vmem>>, %arg9: memref<1x32xf32, #tpu.memory_space<vmem>>, %arg10: memref<16x32xf32, #tpu.memory_space<vmem>>) attributes {dimension_semantics = [#tpu.dimension_semantics<parallel>], iteration_bounds = array<i64: 1>, scalar_prefetch = 0 : i64, scratch_operands = 0 : i64, tpu.core_type = #tpu.core_type<tc>, window_params = [{transform_indices = @transform_0, window_bounds = array<i64: 16, 32>}, {pipeline_mode = #tpu.pipeline_mode<synchronous>, transform_indices = @transform_1, window_bounds = array<i64: 32, 64>}, {pipeline_mode = #tpu.pipeline_mode<synchronous>, transform_indices = @transform_2, window_bounds = array<i64: 1, 64>}, {pipeline_mode = #tpu.pipeline_mode<synchronous>, transform_indices = @transform_3, window_bounds = array<i64: 64, 32>}, {pipeline_mode = #tpu.pipeline_mode<synchronous>, transform_indices = @transform_4, window_bounds = array<i64: 1, 32>}, {pipeline_mode = #tpu.pipeline_mode<synchronous>, transform_indices = @transform_5, window_bounds = array<i64: 1, 32>}, {pipeline_mode = #tpu.pipeline_mode<synchronous>, transform_indices = @transform_6, window_bounds = array<i64: 1, 32>}, {pipeline_mode = #tpu.pipeline_mode<synchronous>, transform_indices = @transform_7, window_bounds = array<i64: 1, 32>}, {pipeline_mode = #tpu.pipeline_mode<synchronous>, transform_indices = @transform_8, window_bounds = array<i64: 1, 32>}, {transform_indices = @transform_9, window_bounds = array<i64: 16, 32>}]} {
    %c0 = arith.constant 0 : index
    %c0_0 = arith.constant 0 : index
    %0 = vector.load %arg1[%c0, %c0_0] : memref<16x32xf32, #tpu.memory_space<vmem>>, vector<16x32xf32>
    %1 = arith.truncf %0 : vector<16x32xf32> to vector<16x32xbf16>
    %c0_1 = arith.constant 0 : index
    %c0_2 = arith.constant 0 : index
    %2 = vector.load %arg2[%c0_1, %c0_2] : memref<32x64xbf16, #tpu.memory_space<vmem>>, vector<32x64xbf16>
    %cst = arith.constant dense<0.000000e+00> : vector<16x64xf32>
    %3 = tpu.matmul %1, %2, %cst {dimension_numbers = #tpu.dot_dimension_numbers<[1], [0], [0], [1], [0, 0, 1, 1], [], []>} : vector<16x32xbf16>, vector<32x64xbf16>, vector<16x64xf32> -> vector<16x64xf32>
    %c0_3 = arith.constant 0 : index
    %c0_4 = arith.constant 0 : index
    %4 = vector.load %arg3[%c0_3, %c0_4] : memref<1x64xf32, #tpu.memory_space<vmem>>, vector<1x64xf32>
    %5 = vector.broadcast %4 : vector<1x64xf32> to vector<16x64xf32>
    %6 = arith.addf %3, %5 : vector<16x64xf32>
    %cst_5 = arith.constant 0.000000e+00 : f32
    %7 = vector.broadcast %cst_5 : f32 to vector<16x64xf32>
    %8 = arith.maximumf %6, %7 : vector<16x64xf32>
    %9 = arith.truncf %8 : vector<16x64xf32> to vector<16x64xbf16>
    %c0_6 = arith.constant 0 : index
    %c0_7 = arith.constant 0 : index
    %10 = vector.load %arg4[%c0_6, %c0_7] : memref<64x32xbf16, #tpu.memory_space<vmem>>, vector<64x32xbf16>
    %cst_8 = arith.constant dense<0.000000e+00> : vector<16x32xf32>
    %11 = tpu.matmul %9, %10, %cst_8 {dimension_numbers = #tpu.dot_dimension_numbers<[1], [0], [0], [1], [0, 0, 1, 1], [], []>} : vector<16x64xbf16>, vector<64x32xbf16>, vector<16x32xf32> -> vector<16x32xf32>
    %c0_9 = arith.constant 0 : index
    %c0_10 = arith.constant 0 : index
    %12 = vector.load %arg5[%c0_9, %c0_10] : memref<1x32xf32, #tpu.memory_space<vmem>>, vector<1x32xf32>
    %13 = vector.broadcast %12 : vector<1x32xf32> to vector<16x32xf32>
    %14 = arith.addf %11, %13 : vector<16x32xf32>
    %15 = arith.addf %0, %14 : vector<16x32xf32>
    %cst_11 = arith.constant dense<0.000000e+00> : vector<16xf32>
    %16 = vector.multi_reduction <add>, %15, %cst_11 [1] : vector<16x32xf32> to vector<16xf32>
    %17 = vector.shape_cast %16 : vector<16xf32> to vector<16x1xf32>
    %cst_12 = arith.constant 3.200000e+01 : f32
    %18 = vector.broadcast %cst_12 : f32 to vector<16x1xf32>
    %19 = arith.divf %17, %18 : vector<16x1xf32>
    %20 = vector.broadcast %19 : vector<16x1xf32> to vector<16x32xf32>
    %21 = arith.subf %15, %20 : vector<16x32xf32>
    %22 = arith.mulf %21, %21 : vector<16x32xf32>
    %cst_13 = arith.constant dense<0.000000e+00> : vector<16xf32>
    %23 = vector.multi_reduction <add>, %22, %cst_13 [1] : vector<16x32xf32> to vector<16xf32>
    %24 = vector.shape_cast %23 : vector<16xf32> to vector<16x1xf32>
    %cst_14 = arith.constant 3.200000e+01 : f32
    %25 = vector.broadcast %cst_14 : f32 to vector<16x1xf32>
    %26 = arith.divf %24, %25 : vector<16x1xf32>
    %27 = vector.broadcast %19 : vector<16x1xf32> to vector<16x32xf32>
    %28 = arith.subf %15, %27 : vector<16x32xf32>
    %cst_15 = arith.constant 9.99999974E-6 : f32
    %29 = vector.broadcast %cst_15 : f32 to vector<16x1xf32>
    %30 = arith.addf %26, %29 : vector<16x1xf32>
    %31 = math.rsqrt %30 : vector<16x1xf32>
    %32 = vector.broadcast %31 : vector<16x1xf32> to vector<16x32xf32>
    %33 = arith.mulf %28, %32 : vector<16x32xf32>
    %c0_16 = arith.constant 0 : index
    %c0_17 = arith.constant 0 : index
    %34 = vector.load %arg6[%c0_16, %c0_17] : memref<1x32xf32, #tpu.memory_space<vmem>>, vector<1x32xf32>
    %35 = vector.broadcast %34 : vector<1x32xf32> to vector<16x32xf32>
    %36 = arith.mulf %33, %35 : vector<16x32xf32>
    %c0_18 = arith.constant 0 : index
    %c0_19 = arith.constant 0 : index
    %37 = vector.load %arg7[%c0_18, %c0_19] : memref<1x32xf32, #tpu.memory_space<vmem>>, vector<1x32xf32>
    %38 = vector.broadcast %37 : vector<1x32xf32> to vector<16x32xf32>
    %39 = arith.addf %36, %38 : vector<16x32xf32>
    %cst_20 = arith.constant dense<0.000000e+00> : vector<16xf32>
    %40 = vector.multi_reduction <add>, %39, %cst_20 [1] : vector<16x32xf32> to vector<16xf32>
    %41 = vector.shape_cast %40 : vector<16xf32> to vector<16x1xf32>
    %cst_21 = arith.constant 3.200000e+01 : f32
    %42 = vector.broadcast %cst_21 : f32 to vector<16x1xf32>
    %43 = arith.divf %41, %42 : vector<16x1xf32>
    %44 = vector.broadcast %43 : vector<16x1xf32> to vector<16x32xf32>
    %45 = arith.subf %39, %44 : vector<16x32xf32>
    %46 = arith.mulf %45, %45 : vector<16x32xf32>
    %cst_22 = arith.constant dense<0.000000e+00> : vector<16xf32>
    %47 = vector.multi_reduction <add>, %46, %cst_22 [1] : vector<16x32xf32> to vector<16xf32>
    %48 = vector.shape_cast %47 : vector<16xf32> to vector<16x1xf32>
    %cst_23 = arith.constant 3.200000e+01 : f32
    %49 = vector.broadcast %cst_23 : f32 to vector<16x1xf32>
    %50 = arith.divf %48, %49 : vector<16x1xf32>
    %51 = vector.broadcast %43 : vector<16x1xf32> to vector<16x32xf32>
    %52 = arith.subf %39, %51 : vector<16x32xf32>
    %cst_24 = arith.constant 9.99999974E-6 : f32
    %53 = vector.broadcast %cst_24 : f32 to vector<16x1xf32>
    %54 = arith.addf %50, %53 : vector<16x1xf32>
    %55 = math.rsqrt %54 : vector<16x1xf32>
    %56 = vector.broadcast %55 : vector<16x1xf32> to vector<16x32xf32>
    %57 = arith.mulf %52, %56 : vector<16x32xf32>
    %c0_25 = arith.constant 0 : index
    %c0_26 = arith.constant 0 : index
    %58 = vector.load %arg8[%c0_25, %c0_26] : memref<1x32xf32, #tpu.memory_space<vmem>>, vector<1x32xf32>
    %59 = vector.broadcast %58 : vector<1x32xf32> to vector<16x32xf32>
    %60 = arith.mulf %57, %59 : vector<16x32xf32>
    %c0_27 = arith.constant 0 : index
    %c0_28 = arith.constant 0 : index
    %61 = vector.load %arg9[%c0_27, %c0_28] : memref<1x32xf32, #tpu.memory_space<vmem>>, vector<1x32xf32>
    %62 = vector.broadcast %61 : vector<1x32xf32> to vector<16x32xf32>
    %63 = arith.addf %60, %62 : vector<16x32xf32>
    %c0_29 = arith.constant 0 : index
    %c0_30 = arith.constant 0 : index
    %64 = vector.load %arg10[%c0_29, %c0_30] : memref<16x32xf32, #tpu.memory_space<vmem>>, vector<16x32xf32>
    tpu.vector_store %arg10[%c0_29, %c0_30], %63 {strides = array<i32>} : memref<16x32xf32, #tpu.memory_space<vmem>>, vector<16x32xf32>,
    return
  }
  func.func @transform_0(%arg0: i32) -> (i32, i32) {
    %c0_i32 = arith.constant 0 : i32
    %c0_i32_0 = arith.constant 0 : i32
    return %arg0, %c0_i32 : i32, i32
  }
  func.func @transform_1(%arg0: i32) -> (i32, i32) {
    %c0_i32 = arith.constant 0 : i32
    %c0_i32_0 = arith.constant 0 : i32
    %c0_i32_1 = arith.constant 0 : i32
    return %c0_i32, %c0_i32_0 : i32, i32
  }
  func.func @transform_2(%arg0: i32) -> (i32, i32) {
    %c0_i32 = arith.constant 0 : i32
    %c0_i32_0 = arith.constant 0 : i32
    %c0_i32_1 = arith.constant 0 : i32
    return %c0_i32, %c0_i32_0 : i32, i32
  }
  func.func @transform_3(%arg0: i32) -> (i32, i32) {
    %c0_i32 = arith.constant 0 : i32
    %c0_i32_0 = arith.constant 0 : i32
    %c0_i32_1 = arith.constant 0 : i32
    return %c0_i32, %c0_i32_0 : i32, i32
  }
  func.func @transform_4(%arg0: i32) -> (i32, i32) {
    %c0_i32 = arith.constant 0 : i32
    %c0_i32_0 = arith.constant 0 : i32
    %c0_i32_1 = arith.constant 0 : i32
    return %c0_i32, %c0_i32_0 : i32, i32
  }
  func.func @transform_5(%arg0: i32) -> (i32, i32) {
    %c0_i32 = arith.constant 0 : i32
    %c0_i32_0 = arith.constant 0 : i32
    %c0_i32_1 = arith.constant 0 : i32
    return %c0_i32, %c0_i32_0 : i32, i32
  }
  func.func @transform_6(%arg0: i32) -> (i32, i32) {
    %c0_i32 = arith.constant 0 : i32
    %c0_i32_0 = arith.constant 0 : i32
    %c0_i32_1 = arith.constant 0 : i32
    return %c0_i32, %c0_i32_0 : i32, i32
  }
  func.func @transform_7(%arg0: i32) -> (i32, i32) {
    %c0_i32 = arith.constant 0 : i32
    %c0_i32_0 = arith.constant 0 : i32
    %c0_i32_1 = arith.constant 0 : i32
    return %c0_i32, %c0_i32_0 : i32, i32
  }
  func.func @transform_8(%arg0: i32) -> (i32, i32) {
    %c0_i32 = arith.constant 0 : i32
    %c0_i32_0 = arith.constant 0 : i32
    %c0_i32_1 = arith.constant 0 : i32
    return %c0_i32, %c0_i32_0 : i32, i32
  }
  func.func @transform_9(%arg0: i32) -> (i32, i32) {
    %c0_i32 = arith.constant 0 : i32
    %c0_i32_0 = arith.constant 0 : i32
    return %arg0, %c0_i32 : i32, i32
  }
}

</mosaic_0001>

<bundles_post_ra>
// kernel: transformer_forward.13
= control target key start
LH: loop header
LB: loop body
LE: loop exit
PB: predicated region body
PF: predicated region fallthrough
CT: control target
= control target key end

     0   :  { %vm56_vm0 = vcmask 261120   ;;  %vm157_vm1 = vcmask 523264   ;;  %s466_s1 = inlined_call_operand.vmem [shape: bf16[32,64], index: 1, kind: input, shape index: {}]   ;;  %s467_s0 = inlined_call_operand.vmem [shape: f32[32,32], index: 0, kind: input, shape index: {}]   ;;  %s468_s3 = inlined_call_operand.vmem [shape: bf16[64,32], index: 3, kind: input, shape index: {}]   ;;  %s469_s2 = inlined_call_operand.vmem [shape: f32[1,64], index: 2, kind: input, shape index: {}]   ;;  %s470_s4 = inlined_call_operand.vmem [shape: f32[1,32], index: 4, kind: input, shape index: {}]   ;;  %s471_s5 = inlined_call_operand.vmem [shape: f32[1,32], index: 5, kind: input, shape index: {}]   ;;  %s472_s6 = inlined_call_operand.vmem [shape: f32[1,32], index: 6, kind: input, shape index: {}]   ;;  %s473_s7 = inlined_call_operand.vmem [shape: f32[32,32], index: 7, kind: output, shape index: {}]  }
   0x1   :  { %v344_v0 = vld [vmem:[%s466_s1] sm:$0xff]   ;;  %v345_v1 = vld [vmem:[%s466_s1 + $0x8] sm:$0xff]   ;;  %v29_v4 = vld [vmem:[%s467_s0 + $0x10] sm:$0xff] }
   0x2   :  { %324 = vmatprep.subr.bf16.mxu0 %v344_v0  ;;  %v27_v2 = vld [vmem:[%s467_s0] sm:$0xff]  ;;  %v28_v3 = vld [vmem:[%s467_s0 + $0x8] sm:$0xff]  ;;  %v30_v6 = vld [vmem:[%s467_s0 + $0x18] sm:$0xff] }
   0x3   :  { %325 = vmatpush3.bf16.msra.mxu0 %v344_v0  ;;  %v31_v5 = vpack.c.bf16 %v28_v3, %v27_v2  ;;  %v346_v7 = vld [vmem:[%s468_s3] sm:$0xff]   ;;  %v347_v8 = vld [vmem:[%s468_s3 + $0x8] sm:$0xff]   ;;  %v32_v9 = vpack.c.bf16 %v30_v6, %v29_v4  ;;  %v348_v10 = vld [vmem:[%s468_s3 + $0x10] sm:$0xff]  }
   0x4   :  { %326 = vmatprep.subr.bf16.mxu0 %v345_v1  ;;  %332 = vmatprep.subr.bf16.mxu1 %v346_v7  ;;  %v349_v11 = vld [vmem:[%s468_s3 + $0x18] sm:$0xff]   ;;  %v300_v12 = vld [vmem:[%s469_s2] ss:$0 sm:$0xff] }
   0x5   :  { %328 = vmatprep.mubr.msk.bf16.mxu0 %vm56_vm0, %v31_v5  ;;  %333 = vmatpush3.bf16.msra.mxu1 %v346_v7  ;;  %v305_v27 = vld [vmem:[%s470_s4] ss:$0 sm:$0xff] }
   0x6   :  { %334 = vmatprep.subr.bf16.mxu1 %v347_v8 }
   0x7   :  { %327 = vmatpush3.bf16.msra.mxu0 %v345_v1 }
   0x9   :  { %335 = vmatpush3.bf16.msra.mxu1 %v347_v8 }
   0xa   :  { %329 = vmatmul.mubr.msk.bf16.vlgmr.msra.gmra.mrb[0].mxu0 %vm56_vm0, %v32_v9  ;;  %336 = vmatprep.subr.bf16.mxu1 %v348_v10 }
   0xd   :  { %337 = vmatpush3.bf16.msra.mxu1 %v348_v10 }
   0xe   :  { %338 = vmatprep.subr.bf16.mxu1 %v349_v11 }
  0x11   :  { %339 = vmatpush3.bf16.msra.mxu1 %v349_v11 }
  0xdd   :  { %v330_v13 = vpop.f32.mrb[0].mxu0 }
  0xde   :  { %v106_v14 = vadd.f32 %v330_v13, %v300_v12  ;;  %v97_v15 = vpop.f32.mrb[1].mxu0  ;;  %v312_v13 = vld [vmem:[%s471_s5] ss:$0 sm:$0xff] }
  0xdf   :  { %v98_v16 = vadd.f32 %v300_v12, %v97_v15  ;;  %v331_v17 = vpop.f32.mrb[2].mxu0  ;;  %v313_v15 = vld [vmem:[%s472_s6] ss:$0 sm:$0xff] }
  0xe0   :  { %v109_v18 = vadd.f32 %v331_v17, %v300_v12  ;;  %v100_v19 = vpop.f32.mrb[3].mxu0  ;;  %v114_v21 = vmax.f32 %v106_v14, 0.0 }
  0xe1   :  { %v101_v20 = vadd.f32 %v300_v12, %v100_v19  ;;  %v112_v23 = vmax.f32 %v98_v16, 0.0 }
  0xe2   :  { %v115_v22 = vmax.f32 %v109_v18, 0.0 }
  0xe3   :  { %v113_v24 = vmax.f32 %v101_v20, 0.0 }
  0xe4   :  { %v117_v25 = vpack.c.bf16 %v115_v22, %v114_v21 }
  0xe5   :  { %v116_v26 = vpack.c.bf16 %v113_v24, %v112_v23 }
  0xe7   :  { %340 = vmatprep.mubr.msk.bf16.mxu1 %vm157_vm1, %v116_v26 }
  0xe8   :  { %341 = vmatmul.mubr.msk.bf16.vlgmr.msra.gmra.mrb[0].mxu1 %vm157_vm1, %v117_v25 }
 0x1bb   :  { %v342_v28 = vpop.f32.mrb[0].mxu1 }
 0x1bc   :  { %v207_v29 = vadd.f32 %v342_v28, %v305_v27  ;;  %v198_v30 = vpop.f32.mrb[1].mxu1 }
 0x1bd   :  { %v199_v31 = vadd.f32 %v305_v27, %v198_v30  ;;  %v343_v32 = vpop.f32.mrb[2].mxu1 }
 0x1be   :  { %v210_v33 = vadd.f32 %v343_v32, %v305_v27  ;;  %v201_v34 = vpop.f32.mrb[3].mxu1  ;;  %v215_v35 = vadd.f32 %v207_v29, %v29_v4 }
 0x1bf   :  { %v202_v36 = vadd.f32 %v305_v27, %v201_v34  ;;  %v213_v37 = vadd.f32 %v199_v31, %v27_v2 }
 0x1c0   :  { %v223_v38 = vsel %vm56_vm0, %v215_v35, 0.0  ;;  %v216_v39 = vadd.f32 %v210_v33, %v30_v6 }
 0x1c1   :  { %224 = vadd.xlane.f32.xlu1 %v223_v38  ;;  %v217_v40 = vsel %vm56_vm0, %v213_v37, 0.0  ;;  %v214_v41 = vadd.f32 %v202_v36, %v28_v3 }
 0x1c2   :  { %218 = vadd.xlane.f32.xlu0 %v217_v40  ;;  %v226_v42 = vsel %vm56_vm0, %v216_v39, 0.0 }
 0x1c3   :  { %v220_v43 = vsel %vm56_vm0, %v214_v41, 0.0 }
 0x1c5   :  { %227 = vadd.xlane.f32.xlu1 %v226_v42 }
 0x1c6   :  { %221 = vadd.xlane.f32.xlu0 %v220_v43 }
 0x24e   :  { %v225_v44 = vpop.xlane.xlu1 %224 }
 0x24f   :  { %v232_v45 = vmul.f32 0.03125, %v225_v44  ;;  %v219_v46 = vpop.xlane.xlu0 %218 }
 0x250   :  { %v230_v47 = vmul.f32 0.03125, %v219_v46 }
 0x251   :  { %v236_v48 = vsub.f32 %v215_v35, %v232_v45 }
 0x252   :  { %v234_v49 = vsub.f32 %v213_v37, %v230_v47  ;;  %v228_v50 = vpop.xlane.xlu1 %227 }
 0x253   :  { %v233_v51 = vmul.f32 0.03125, %v228_v50  ;;  %v222_v52 = vpop.xlane.xlu0 %221  ;;  %v240_v58 = vmul.f32 %v236_v48, %v236_v48 }
 0x254   :  { %v231_v53 = vmul.f32 0.03125, %v222_v52  ;;  %v238_v54 = vmul.f32 %v234_v49, %v234_v49 }
 0x255   :  { %v237_v55 = vsub.f32 %v216_v39, %v233_v51  ;;  %v248_v60 = vsel %vm56_vm0, %v240_v58, 0.0 }
 0x256   :  { %v235_v56 = vsub.f32 %v214_v41, %v231_v53  ;;  %v242_v57 = vsel %vm56_vm0, %v238_v54, 0.0 }
 0x257   :  { %243 = vadd.xlane.f32.xlu0 %v242_v57  ;;  %v241_v62 = vmul.f32 %v237_v55, %v237_v55 }
 0x258   :  { %v239_v59 = vmul.f32 %v235_v56, %v235_v56 }
 0x259   :  { %v251_v63 = vsel %vm56_vm0, %v241_v62, 0.0 }
 0x25a   :  { %v245_v61 = vsel %vm56_vm0, %v239_v59, 0.0 }
 0x25b   :  { %249 = vadd.xlane.f32.xlu0 %v248_v60  ;;  %246 = vadd.xlane.f32.xlu1 %v245_v61 }
 0x25f   :  { %252 = vadd.xlane.f32.xlu1 %v251_v63 }
 0x2e4   :  { %v244_v0 = vpop.xlane.xlu0 %243 }
 0x2e5   :  { %v254_v1 = vmul.f32 0.03125, %v244_v0 }
 0x2e7   :  { %v258_v2 = vadd.f32 1e-05, %v254_v1 }
 0x2e8   :  { %v247_v3 = vpop.xlane.xlu1 %246  ;;  %v250_v4 = vpop.xlane.xlu0 %249 }
 0x2e9   :  { %350 = vrsqrt.f32 %v258_v2  ;;  %v255_v5 = vmul.f32 0.03125, %v247_v3  ;;  %v256_v6 = vmul.f32 0.03125, %v250_v4 }
 0x2eb   :  { %v259_v7 = vadd.f32 1e-05, %v255_v5  ;;  %v260_v8 = vadd.f32 1e-05, %v256_v6 }
 0x2ec   :  { %v253_v9 = vpop.xlane.xlu1 %252 }
 0x2ed   :  { %352 = vrsqrt.f32 %v259_v7  ;;  %v257_v10 = vmul.f32 0.03125, %v253_v9 }
 0x2ee   :  { %354 = vrsqrt.f32 %v260_v8 }
 0x2ef   :  { %v261_v11 = vadd.f32 1e-05, %v257_v10 }
 0x2f1   :  { %356 = vrsqrt.f32 %v261_v11 }
 0x2f3   :  { %v351_v12 = vpop.eup %350 }
 0x2f4   :  { %v266_v14 = vmul.f32 %v351_v12, %v234_v49 }
 0x2f6   :  { %v277_v16 = vmul.f32 %v312_v13, %v266_v14 }
 0x2f7   :  { %v353_v17 = vpop.eup %352 }
 0x2f8   :  { %v355_v18 = vpop.eup %354  ;;  %v288_v19 = vadd.f32 %v313_v15, %v277_v16  ;;  %v267_v20 = vmul.f32 %v353_v17, %v235_v56 }
 0x2f9   :  { %v268_v21 = vmul.f32 %v355_v18, %v236_v48 }
 0x2fa   :  { %292 = vst.msk [vmem:[%s473_s7] sm:$0xff] %vm56_vm0, %v288_v19  ;;  %v278_v22 = vmul.f32 %v312_v13, %v267_v20 }
 0x2fb   :  { %v357_v23 = vpop.eup %356  ;;  %v279_v24 = vmul.f32 %v312_v13, %v268_v21 }
 0x2fc   :  { %v289_v25 = vadd.f32 %v313_v15, %v278_v22  ;;  %v269_v26 = vmul.f32 %v357_v23, %v237_v55 }
 0x2fd   :  { %v290_v27 = vadd.f32 %v313_v15, %v279_v24 }
 0x2fe   :  { %293 = vst.msk [vmem:[%s473_s7 + $0x8] sm:$0xff] %vm56_vm0, %v289_v25  ;;  %v280_v28 = vmul.f32 %v312_v13, %v269_v26 }
 0x2ff   :  { %294 = vst.msk [vmem:[%s473_s7 + $0x10] sm:$0xff] %vm56_vm0, %v290_v27 }
 0x300   :  { %v291_v29 = vadd.f32 %v313_v15, %v280_v28 }
 0x302   :  { %295 = vst.msk [vmem:[%s473_s7 + $0x18] sm:$0xff] %vm56_vm0, %v291_v29 }

// kernel: transformer_forward.11
= control target key start
LH: loop header
LB: loop body
LE: loop exit
PB: predicated region body
PF: predicated region fallthrough
CT: control target
= control target key end

     0   :  { %s307_s9 = smov 0   ;;  %s327_s0 = inlined_call_operand.vmem [shape: f32[2,32,16], index: 0, kind: input, shape index: {}]   ;;  %s328_s1 = inlined_call_operand.vmem [shape: bf16[8,32], index: 1, kind: input, shape index: {}]   ;;  %s329_s2 = inlined_call_operand.vmem [shape: f32[2,8,16], index: 2, kind: output, shape index: {}]  }
   0x1 LB: > { %s249_s10 = sadd.s32 4294967295, %s288_s9   ;;  %p253_p0 = scmp.ge.s32.totalorder %s288_s9, 1  ;;  %s288_s9 = sphi %s307_s9, %s12_s9  }
   0x2   : > { %p112_p1 = scmp.lt.s32.totalorder %s288_s9, 3 }
   0x4   : > { %p113_p2 = pnand %p253_p0, %p112_p1 }
   0x5   : > { %p133_p3 = scmp.lt.s32.totalorder (!%p113_p2), %s249_s10, 1  ;;  %v290_v0 = vmov (!%p113_p2), 0.0   ;;  %vm291_vm0 = vmmov (!%p113_p2), 0   ;;  %v149_v7 = vld [vmem:[%s328_s1] sm:$0xf] (!%p113_p2)  ;;  %vm150_vm1 = vcmask (!%p113_p2), 261120  }
   0x6   : > { %116 = sbr.rel (%p113_p2) target bundleno = 241 (0xf1), region = 28  ;;  %264 = vmatprep.subr.bf16.mxu0 (!%p113_p2), %v290_v0  ;;  %268 = vmatprep.mubr.msk.bf16.mxu0 (!%p113_p2), %vm291_vm0, %v290_v0  ;;  %vm194_vm2 = vcmask (!%p113_p2), 130048  }
   0xd   : > { %s331_s10 = smov (!%p133_p3, %s249_s10), 1 }
   0xe   : > { %s260_s11 = sshll.u32 %s331_s10, 5  ;;  %s256_s17 = sshll.u32 %s331_s10, 3 }
   0xf   : > { %s137_s14 = scalar_lea.vmem %s327_s0, %s260_s11  ;;  %s141_s20 = scalar_lea.vmem %s329_s2, %s256_s17 }
  0x10   : > { %v143_v1 = vld [vmem:[%s137_s14] sm:$0xff]  ;;  %v144_v2 = vld [vmem:[%s137_s14 + $0x8] sm:$0xff]  ;;  %v145_v3 = vld [vmem:[%s137_s14 + $0x10] sm:$0xff] }
  0x11   : > { %v147_v4 = vpack.c.bf16 %v144_v2, %v143_v1  ;;  %v146_v5 = vld [vmem:[%s137_s14 + $0x18] sm:$0xff] }
  0x12   : > { %v148_v6 = vpack.c.bf16 %v146_v5, %v145_v3 }
  0x13   : > { %265 = vmatpush3.bf16.msra.mxu0 %v147_v4 }
  0x14   : > { %266 = vmatprep.subr.bf16.mxu0 %v290_v0 }
  0x17   : > { %267 = vmatpush3.bf16.msra.mxu0 %v148_v6 }
  0x1a   : > { %269 = vmatmul.mubr.msk.bf16.vlgmr.msra.gmra.mrb[0].mxu0 %vm150_vm1, %v149_v7 }
  0xed   : > { %v188_v8 = vpop.f32.mrb[0].mxu0 }
  0xee   : > { %195 = vst.msk [vmem:[%s141_s20] sm:$0xff] %vm194_vm2, %v188_v8  ;;  %v270_v9 = vpop.f32.mrb[1].mxu0 }
  0xef   : > { %v191_v10 = vpop.f32.mrb[2].mxu0 }
  0xf0   : > { %v271_v11 = vpop.f32.mrb[3].mxu0 }
  0xf1 PF: > { %s12_s9 = sadd.s32 1, %s288_s9  }
  0xf2   : > { %p9_p4 = scmp.ge.s32.totalorder %s12_s9, 4  }
  0xf4   :  { %11 = sbr.rel (!%p9_p4) target bundleno = 1 (0x1), region = 58 }

// kernel: transformer_forward.12
= control target key start
LH: loop header
LB: loop body
LE: loop exit
PB: predicated region body
PF: predicated region fallthrough
CT: control target
= control target key end

     0   :  { %s1764_s21 = smov 0   ;;  %s1970_s0 = inlined_call_operand.vmem [shape: f32[2,16,32], index: 0, kind: input, shape index: {}]   ;;  %s1971_s1 = inlined_call_operand.vmem [shape: f32[2,16,32], index: 1, kind: input, shape index: {}]   ;;  %s1972_s2 = inlined_call_operand.vmem [shape: bf16[32,32], index: 2, kind: input, shape index: {}]   ;;  %s1973_s3 = inlined_call_operand.vmem [shape: bf16[32,32], index: 3, kind: input, shape index: {}]   ;;  %s1974_s4 = inlined_call_operand.vmem [shape: bf16[32,32], index: 4, kind: input, shape index: {}]   ;;  %s1975_s5 = inlined_call_operand.vmem [shape: bf16[4,8,32], index: 5, kind: input, shape index: {}]   ;;  %s1976_s6 = inlined_call_operand.vmem [shape: f32[1,32], index: 6, kind: input, shape index: {}]   ;;  %s1977_s7 = inlined_call_operand.vmem [shape: f32[1,32], index: 7, kind: input, shape index: {}]   ;;  %s1978_s8 = inlined_call_operand.vmem [shape: f32[1,32], index: 8, kind: input, shape index: {}]   ;;  %s1979_s9 = inlined_call_operand.vmem [shape: f32[1,32], index: 9, kind: input, shape index: {}]   ;;  %s1980_s10 = inlined_call_operand.vmem [shape: f32[1,32], index: 10, kind: input, shape index: {}]   ;;  %s1981_s11 = inlined_call_operand.vmem [shape: f32[1,32], index: 11, kind: input, shape index: {}]   ;;  %s1982_s12 = inlined_call_operand.vmem [shape: f32[2,16,32], index: 12, kind: output, shape index: {}]  }
   0x1 LB: > { %s1456_s22 = sadd.s32 4294967295, %s1692_s21   ;;  %p1460_p0 = scmp.ge.s32.totalorder %s1692_s21, 1  ;;  %s1692_s21 = sphi %s1764_s21, %s22_s21  }
   0x2   : > { %p372_p1 = scmp.lt.s32.totalorder %s1692_s21, 3 }
   0x4   : > { %p373_p2 = pnand %p1460_p0, %p372_p1 }
   0x5   : > { %v1644_v0 = vld [vmem:[%s1973_s3] sm:$0xff] (!%p373_p2)   ;;  %v1694_v1 = vmov (!%p373_p2), 0.0   ;;  %v1645_v2 = vld [vmem:[%s1973_s3 + $0x8] sm:$0xff] (!%p373_p2)   ;;  %vm1695_vm0 = vmmov (!%p373_p2), 0   ;;  %p419_p3 = scmp.lt.s32.totalorder (!%p373_p2), %s1456_s22, 1  ;;  %vm466_vm1 = vcmask (!%p373_p2), 261120  }
   0x6   : > { %376 = sbr.rel (%p373_p2) target bundleno = 2477 (0x9ad), region = 68  ;;  %1543 = vmatprep.subr.bf16.mxu1 (!%p373_p2), %v1694_v1  ;;  %1535 = vmatprep.subr.bf16.mxu0 (!%p373_p2), %v1694_v1  ;;  %v1646_v3 = vld [vmem:[%s1972_s2] sm:$0xff] (!%p373_p2)   ;;  %v1647_v4 = vld [vmem:[%s1972_s2 + $0x8] sm:$0xff] (!%p373_p2)   ;;  %vm645_vm2 = vcmask (!%p373_p2), 64512   ;;  %s1696_s29 = smov (!%p373_p2), 120   ;;  %vm693_vm3 = vcmask (!%p373_p2), 130048  }
   0x7   : > { %1544 = vmatpush3.bf16.msra.mxu1 (!%p373_p2), %v1644_v0  ;;  %1547 = vmatprep.mubr.msk.bf16.mxu1 (!%p373_p2), %vm1695_vm0, %v1694_v1  ;;  %v1467_v12 = vld [vmem:[%s1976_s6] ss:$0 sm:$0xff] (!%p373_p2)  ;;  %v1649_v27 = vld [vmem:[%s1974_s4 + $0x8] sm:$0xff] (!%p373_p2)   ;;  %s1697_s15 = smov (!%p373_p2), 112   ;;  %vm893_vm4 = vcmask (!%p373_p2), 1043456   ;;  %s1698_s20 = smov (!%p373_p2), 104  }
   0x8   : > { %1545 = vmatprep.subr.bf16.mxu1 (!%p373_p2), %v1694_v1  ;;  %1539 = vmatprep.mubr.msk.bf16.mxu0 (!%p373_p2), %vm1695_vm0, %v1694_v1  ;;  %v1471_v13 = vld [vmem:[%s1977_s7] ss:$0 sm:$0xff] (!%p373_p2) }
   0x9   : > { %1536 = vmatpush3.bf16.msra.mxu0 (!%p373_p2), %v1646_v3  ;;  %v1648_v21 = vld [vmem:[%s1974_s4] sm:$0xff] (!%p373_p2)  }
   0xa   : > { %1537 = vmatprep.subr.bf16.mxu0 (!%p373_p2), %v1694_v1  ;;  %v1475_v41 = vld [vmem:[%s1978_s8] ss:$0 sm:$0xff] (!%p373_p2) }
   0xb   : > { %1546 = vmatpush3.bf16.msra.mxu1 (!%p373_p2), %v1645_v2 }
   0xc   : > { %1559 = vmatprep.subr.bf16.mxu1 (!%p373_p2), %v1694_v1 }
   0xd   : > { %s1984_s22 = smov (!%p419_p3, %s1456_s22), 1  ;;  %1538 = vmatpush3.bf16.msra.mxu0 %v1647_v4 }
   0xe   : > { %s1792_s13 = sshll.u32 %s1984_s22, 4  ;;  %1551 = vmatprep.subr.bf16.mxu0 %v1694_v1 }
   0xf   : > { %s423_s16 = scalar_lea.vmem %s1970_s0, %s1792_s13  ;;  %s428_s19 = scalar_lea.vmem %s1971_s1, %s1792_s13 }
  0x10   : > { %v1803_v5 = vld [vmem:[%s423_s16] sm:$0xff]  ;;  %v1805_v6 = vld [vmem:[%s423_s16 + $0x8] sm:$0xff]  ;;  %s433_s17 = scalar_lea.vmem %s1982_s12, %s1792_s13 }
  0x11   : > { %v437_v7 = vld [vmem:[%s428_s19] sm:$0xff]  ;;  %v438_v8 = vld [vmem:[%s428_s19 + $0x8] sm:$0xff]  ;;  %v442_v31 = vpack.c.bf16 %v1805_v6, %v1803_v5 }
  0x12   : > { %v439_v9 = vadd.f32 %v437_v7, %v1803_v5  ;;  %v440_v10 = vadd.f32 %v438_v8, %v1805_v6 }
  0x14   : > { %v441_v11 = vpack.c.bf16 %v440_v10, %v439_v9 }
  0x16   : > { %1548 = vmatmul.mubr.msk.bf16.vlgmr.msra.gmra.mrb[0].mxu1 %vm466_vm1, %v441_v11  ;;  %1540 = vmatmul.mubr.msk.bf16.vlgmr.msra.gmra.mrb[0].mxu0 %vm466_vm1, %v441_v11 }
  0x17   : > { %1561 = vmatprep.mubr.msk.bf16.mxu1 %vm1695_vm0, %v1694_v1  ;;  %1555 = vmatprep.mubr.msk.bf16.mxu0 %vm1695_vm0, %v1694_v1 }
  0x18   : > { %1552 = vmatpush3.bf16.msra.mxu0 %v1648_v21 }
  0x19   : > { %1553 = vmatprep.subr.bf16.mxu0 %v1694_v1 }
  0x1c   : > { %1554 = vmatpush3.bf16.msra.mxu0 %v1649_v27 }
  0x1d   : > { %1565 = vmatprep.subr.bf16.mxu0 %v1694_v1 }
  0x1f   : > { %1556 = vmatmul.mubr.msk.bf16.vlgmr.msra.gmra.mrb[4].mxu0 %vm466_vm1, %v442_v31 }
  0x20   : > { %1567 = vmatprep.mubr.msk.bf16.mxu0 %vm1695_vm0, %v1694_v1 }
  0xe9   : > { %v568_v14 = vpop.f32.mrb[0].mxu1  ;;  %v504_v15 = vpop.f32.mrb[0].mxu0 }
  0xea   : > { %v1549_v16 = vpop.f32.mrb[1].mxu1  ;;  %v505_v17 = vadd.f32 %v1467_v12, %v504_v15  ;;  %v1541_v18 = vpop.f32.mrb[1].mxu0  ;;  %v569_v22 = vadd.f32 %v1471_v13, %v568_v14 }
  0xeb   : > { %v571_v19 = vpop.f32.mrb[2].mxu1  ;;  %v507_v20 = vpop.f32.mrb[2].mxu0  ;;  %v762_v18 = vld [vmem:[%s1975_s5] sm:$0xf] }
  0xec   : > { %v572_v23 = vadd.f32 %v1471_v13, %v571_v19  ;;  %v1550_v24 = vpop.f32.mrb[3].mxu1  ;;  %v508_v25 = vadd.f32 %v1467_v12, %v507_v20  ;;  %v1542_v26 = vpop.f32.mrb[3].mxu0  ;;  %v942_v20 = vsel %vm893_vm4, %v762_v18, 0 }
  0xee   : > { %v1828_v28 = vpack.c.bf16 %v572_v23, %v569_v22  ;;  %v1830_v29 = vpack.c.bf16 %v508_v25, %v505_v17  ;;  %v1483_v17 = vld [vmem:[%s1975_s5 + $0x4] sm:$0xf] }
  0xef   : > { %v895_v19 = vsel %vm893_vm4, %v1483_v17, 0  ;;  %v1488_v17 = vld [vmem:[%s1975_s5 + $0x8] sm:$0xf] }
  0xf0   : > { %767 = vrot.lane.b32.xlu0 %v1828_v28, %s1696_s29  ;;  %v650_v30 = vsel %vm645_vm2, %v1828_v28, 0  ;;  %v1113_v18 = vsel %vm893_vm4, %v1488_v17, 0 }
  0xf1   : > { %1560 = vmatpush3.bf16.xpose.msra.mxu1 %v650_v30 }
  0xf2   : > { %1571 = vmatprep.subr.bf16.mxu1 %v1694_v1  ;;  %v635_v42 = vpop.f32.mrb[4].mxu0 }
  0xf3   : > { %v1557_v43 = vpop.f32.mrb[5].mxu0  ;;  %v636_v44 = vadd.f32 %v1475_v41, %v635_v42 }
  0xf4   : > { %764 = vrot.lane.b32.xlu0 %v1830_v29, %s1696_s29  ;;  %v638_v45 = vpop.f32.mrb[6].mxu0 }
  0xf5   : > { %v639_v46 = vadd.f32 %v1475_v41, %v638_v45  ;;  %v1558_v47 = vpop.f32.mrb[7].mxu0 }
  0xf7   : > { %v1860_v48 = vpack.c.bf16 %v639_v46, %v636_v44 }
  0xf8   : > { %1562 = vmatmul.mubr.msk.bf16.vlgmr.msra.gmra.mrb[4].mxu1 %vm645_vm2, %v1830_v29 }
  0xf9   : > { %1573 = vmatprep.mubr.msk.bf16.mxu1 %vm1695_vm0, %v1694_v1  ;;  %1566 = vmatpush3.bf16.msra.mxu0 %v1860_v48 }
  0xfa   : > { %1577 = vmatprep.subr.bf16.mxu0 %v1694_v1 }
 0x162   : > { %v768_v32 = vpop.permute.xlu0 %767 }
 0x163   : > { %v773_v33 = vsel %vm645_vm2, %v768_v32, 0 }
 0x164   : > { %1572 = vmatpush3.bf16.xpose.msra.mxu1 %v773_v33 }
 0x165   : > { %1583 = vmatprep.subr.bf16.mxu1 %v1694_v1 }
 0x166   : > { %v765_v34 = vpop.permute.xlu0 %764 }
 0x16b   : > { %1574 = vmatmul.mubr.msk.bf16.vlgmr.msra.gmra.mrb[8].mxu1 %vm645_vm2, %v765_v34 }
 0x16c   : > { %1585 = vmatprep.mubr.msk.bf16.mxu1 %vm1695_vm0, %v1694_v1  ;;  %1584 = vmatpush3.bf16.msra.mxu1 %v895_v19 }
 0x16d   : > { %1595 = vmatprep.subr.bf16.mxu1 %v1694_v1 }
 0x1cb   : > { %v686_v35 = vpop.f32.mrb[4].mxu1 }
 0x1cc   : > { %v1563_v36 = vpop.f32.mrb[5].mxu1  ;;  %v694_v37 = vsel %vm693_vm3, %v686_v35, -inf }
 0x1cd   : > { %695 = vmax.xlane.f32.xlu1 %v694_v37  ;;  %v689_v38 = vpop.f32.mrb[6].mxu1 }
 0x1ce   : > { %v1564_v39 = vpop.f32.mrb[7].mxu1  ;;  %v697_v40 = vsel %vm693_vm3, %v689_v38, -inf }
 0x1d1   : > { %698 = vmax.xlane.f32.xlu1 %v697_v40 }
 0x23e   : > { %v809_v49 = vpop.f32.mrb[8].mxu1 }
 0x23f   : > { %v1575_v50 = vpop.f32.mrb[9].mxu1  ;;  %v816_v51 = vsel %vm693_vm3, %v809_v49, -inf }
 0x240   : > { %817 = vmax.xlane.f32.xlu0 %v816_v51  ;;  %v812_v52 = vpop.f32.mrb[10].mxu1 }
 0x241   : > { %v1576_v53 = vpop.f32.mrb[11].mxu1  ;;  %v819_v54 = vsel %vm693_vm3, %v812_v52, -inf }
 0x242   : > { %820 = vmax.xlane.f32.xlu1 %v819_v54 }
 0x253   : > { %838 = vrot.lane.b32.xlu1 %v1860_v48, %s1696_s29 }
 0x25a   : > { %v696_v55 = vpop.xlane.xlu1 %695 }
 0x25b   : > { %v700_v56 = vsub.f32 %v686_v35, %v696_v55 }
 0x25d   : > { %v702_v57 = vmul.f32 1.442695, %v700_v56 }
 0x25e   : > { %v699_v58 = vpop.xlane.xlu1 %698 }
 0x25f   : > { %v701_v59 = vsub.f32 %v689_v38, %v699_v58  ;;  %1650 = vpow2.f32 %v702_v57 }
 0x261   : > { %v704_v60 = vmul.f32 1.442695, %v701_v59 }
 0x263   : > { %1652 = vpow2.f32 %v704_v60 }
 0x269   : > { %v1651_v61 = vpop.eup %1650 }
 0x26a   : > { %v706_v15 = vsel %vm693_vm3, %v1651_v61, 0.0 }
 0x26d   : > { %v1653_v62 = vpop.eup %1652 }
 0x26e   : > { %v714_v63 = vpack.c.bf16 %v1653_v62, %v1651_v61  ;;  %v709_v16 = vsel %vm693_vm3, %v1653_v62, 0.0 }
 0x270   : > { %1568 = vmatmul.mubr.msk.bf16.vlgmr.msra.gmra.mrb[8].mxu0 %vm693_vm3, %v714_v63 }
 0x271   : > { %1579 = vmatprep.mubr.msk.bf16.mxu0 %vm1695_vm0, %v1694_v1 }
 0x2cd   : > { %v818_v0 = vpop.xlane.xlu0 %817 }
 0x2ce   : > { %v822_v2 = vsub.f32 %v809_v49, %v818_v0 }
 0x2cf   : > { %v821_v3 = vpop.xlane.xlu1 %820 }
 0x2d0   : > { %v824_v4 = vmul.f32 1.442695, %v822_v2  ;;  %v823_v7 = vsub.f32 %v812_v52, %v821_v3 }
 0x2d2   : > { %1654 = vpow2.f32 %v824_v4  ;;  %v826_v8 = vmul.f32 1.442695, %v823_v7 }
 0x2d3   : > { %v839_v9 = vpop.permute.xlu1 %838 }
 0x2d4   : > { %1656 = vpow2.f32 %v826_v8  ;;  %1578 = vmatpush3.bf16.msra.mxu0 %v839_v9 }
 0x2d5   : > { %1589 = vmatprep.subr.bf16.mxu0 %v1694_v1 }
 0x2dc   : > { %v1655_v10 = vpop.eup %1654 }
 0x2dd   : > { %v828_v11 = vsel %vm693_vm3, %v1655_v10, 0.0 }
 0x2de   : > { %v1657_v12 = vpop.eup %1656  ;;  %829 = vadd.xlane.f32.xlu1 %v828_v11 }
 0x2df   : > { %v831_v13 = vsel %vm693_vm3, %v1657_v12, 0.0  ;;  %v836_v14 = vpack.c.bf16 %v1657_v12, %v1655_v10 }
 0x2e0   : > { %832 = vadd.xlane.f32.xlu0 %v831_v13 }
 0x2e1   : > { %1580 = vmatmul.mubr.msk.bf16.vlgmr.msra.gmra.mrb[12].mxu0 %vm693_vm3, %v836_v14 }
 0x2e2   : > { %707 = vadd.xlane.f32.xlu1 %v706_v15  ;;  %1591 = vmatprep.mubr.msk.bf16.mxu0 %vm1695_vm0, %v1694_v1 }
 0x2e3   : > { %1590 = vmatpush3.bf16.msra.mxu0 %v942_v20 }
 0x2e4   : > { %1601 = vmatprep.subr.bf16.mxu0 %v1694_v1 }
 0x2f3   : > { %1057 = vrot.lane.b32.xlu1 %v1860_v48, %s1697_s15 }
 0x2f6   : > { %987 = vrot.lane.b32.xlu0 %v1828_v28, %s1697_s15 }
 0x2fa   : > { %985 = vrot.lane.b32.xlu0 %v1830_v29, %s1697_s15 }
 0x319   : > { %710 = vadd.xlane.f32.xlu0 %v709_v16 }
 0x343   : > { %v752_v21 = vpop.f32.mrb[8].mxu0 }
 0x344   : > { %v1569_v22 = vpop.f32.mrb[9].mxu0 }
 0x345   : > { %v755_v23 = vpop.f32.mrb[10].mxu0 }
 0x346   : > { %v1570_v24 = vpop.f32.mrb[11].mxu0 }
 0x36b   : > { %v830_v26 = vpop.xlane.xlu1 %829 }
 0x36d   : > { %v833_v25 = vpop.xlane.xlu0 %832 }
 0x36f   : > { %v708_v30 = vpop.xlane.xlu1 %707 }
 0x370   : > { %1658 = vrcp.f32 %v708_v30 }
 0x371   : > { %v988_v27 = vpop.permute.xlu0 %987 }
 0x372   : > { %v993_v49 = vsel %vm645_vm2, %v988_v27, 0 }
 0x373   : > { %v1058_v42 = vpop.permute.xlu1 %1057 }
 0x375   : > { %v986_v31 = vpop.permute.xlu0 %985 }
 0x37a   : > { %v1659_v33 = vpop.eup %1658 }
 0x37b   : > { %v759_v35 = vmul.f32 %v1659_v33, %v752_v21 }
 0x3a6   : > { %v711_v32 = vpop.xlane.xlu0 %710 }
 0x3a7   : > { %1660 = vrcp.f32 %v711_v32 }
 0x3a8   : > { %1662 = vrcp.f32 %v830_v26 }
 0x3a9   : > { %1664 = vrcp.f32 %v833_v25 }
 0x3b1   : > { %v1661_v34 = vpop.eup %1660 }
 0x3b2   : > { %v760_v36 = vmul.f32 %v1661_v34, %v755_v23  ;;  %v1663_v39 = vpop.eup %1662 }
 0x3b3   : > { %v1665_v41 = vpop.eup %1664 }
 0x3b4   : > { %v878_v37 = vpop.f32.mrb[12].mxu0  ;;  %v761_v38 = vpack.c.bf16 %v760_v36, %v759_v35 }
 0x3b5   : > { %v1581_v40 = vpop.f32.mrb[13].mxu0  ;;  %v885_v44 = vmul.f32 %v1663_v39, %v878_v37 }
 0x3b6   : > { %v881_v43 = vpop.f32.mrb[14].mxu0  ;;  %1592 = vmatmul.mubr.msk.bf16.vlgmr.msra.gmra.mrb[16].mxu0 %vm645_vm2, %v761_v38 }
 0x3b7   : > { %v886_v45 = vmul.f32 %v1665_v41, %v881_v43  ;;  %1602 = vmatpush3.bf16.msra.mxu0 %v1058_v42  ;;  %v1582_v46 = vpop.f32.mrb[15].mxu0  ;;  %1603 = vmatprep.mubr.msk.bf16.mxu0 %vm1695_vm0, %v1694_v1 }
 0x3b8   : > { %1613 = vmatprep.subr.bf16.mxu0 %v1694_v1 }
 0x3b9   : > { %v887_v47 = vpack.c.bf16 %v886_v45, %v885_v44 }
 0x3bb   : > { %1586 = vmatmul.mubr.msk.bf16.vlgmr.msra.gmra.mrb[12].mxu1 %vm645_vm2, %v887_v47 }
 0x3bc   : > { %1596 = vmatpush3.bf16.xpose.msra.mxu1 %v993_v49  ;;  %1597 = vmatprep.mubr.msk.bf16.mxu1 %vm1695_vm0, %v1694_v1 }
 0x3bd   : > { %1607 = vmatprep.subr.bf16.mxu1 %v1694_v1 }
 0x3c3   : > { %1598 = vmatmul.mubr.msk.bf16.vlgmr.msra.gmra.mrb[16].mxu1 %vm645_vm2, %v986_v31 }
 0x3c4   : > { %1609 = vmatprep.mubr.msk.bf16.mxu1 %vm1695_vm0, %v1694_v1  ;;  %1608 = vmatpush3.bf16.msra.mxu1 %v1113_v18 }
 0x3c5   : > { %1619 = vmatprep.subr.bf16.mxu1 %v1694_v1 }
 0x489   : > { %v978_v50 = vpop.f32.mrb[16].mxu0 }
 0x48a   : > { %v1593_v51 = vpop.f32.mrb[17].mxu0 }
 0x48b   : > { %v981_v52 = vpop.f32.mrb[18].mxu0 }
 0x48c   : > { %v1594_v53 = vpop.f32.mrb[19].mxu0 }
 0x48e   : > { %v931_v54 = vpop.f32.mrb[12].mxu1 }
 0x48f   : > { %v1904_v55 = vadd.f32 %v978_v50, %v931_v54  ;;  %v1587_v56 = vpop.f32.mrb[13].mxu1 }
 0x490   : > { %v934_v57 = vpop.f32.mrb[14].mxu1  ;;  %v1492_v56 = vld [vmem:[%s1975_s5 + $0xc] sm:$0xf] }
 0x491   : > { %v1906_v58 = vadd.f32 %v981_v52, %v934_v57  ;;  %v1588_v59 = vpop.f32.mrb[15].mxu1  ;;  %v1286_v57 = vsel %vm893_vm4, %v1492_v56, 0 }
 0x496   : > { %v1029_v60 = vpop.f32.mrb[16].mxu1 }
 0x497   : > { %v1599_v61 = vpop.f32.mrb[17].mxu1  ;;  %v1036_v62 = vsel %vm693_vm3, %v1029_v60, -inf }
 0x498   : > { %1037 = vmax.xlane.f32.xlu1 %v1036_v62  ;;  %v1032_v63 = vpop.f32.mrb[18].mxu1 }
 0x499   : > { %v1600_v0 = vpop.f32.mrb[19].mxu1  ;;  %v1039_v2 = vsel %vm693_vm3, %v1032_v63, -inf }
 0x49c   : > { %1040 = vmax.xlane.f32.xlu1 %v1039_v2 }
 0x4ad   : > { %1160 = vrot.lane.b32.xlu1 %v1828_v28, %s1698_s20 }
 0x4b1   : > { %1158 = vrot.lane.b32.xlu1 %v1830_v29, %s1698_s20 }
 0x525   : > { %v1038_v3 = vpop.xlane.xlu1 %1037 }
 0x526   : > { %v1042_v4 = vsub.f32 %v1029_v60, %v1038_v3 }
 0x528   : > { %v1044_v7 = vmul.f32 1.442695, %v1042_v4 }
 0x529   : > { %v1041_v8 = vpop.xlane.xlu1 %1040 }
 0x52a   : > { %1666 = vpow2.f32 %v1044_v7  ;;  %v1043_v9 = vsub.f32 %v1032_v63, %v1041_v8  ;;  %v1494_v8 = vld [vmem:[%s1979_s9] ss:$0 sm:$0xff] }
 0x52c   : > { %v1046_v10 = vmul.f32 1.442695, %v1043_v9 }
 0x52d   : > { %v1161_v14 = vpop.permute.xlu1 %1160 }
 0x52e   : > { %1668 = vpow2.f32 %v1046_v10  ;;  %v1166_v29 = vsel %vm645_vm2, %v1161_v14, 0 }
 0x531   : > { %v1159_v16 = vpop.permute.xlu1 %1158 }
 0x534   : > { %v1667_v11 = vpop.eup %1666 }
 0x535   : > { %v1048_v12 = vsel %vm693_vm3, %v1667_v11, 0.0 }
 0x536   : > { %1049 = vadd.xlane.f32.xlu0 %v1048_v12 }
 0x538   : > { %v1669_v13 = vpop.eup %1668 }
 0x539   : > { %v1051_v15 = vsel %vm693_vm3, %v1669_v13, 0.0  ;;  %v1056_v28 = vpack.c.bf16 %v1669_v13, %v1667_v11 }
 0x53a   : > { %1052 = vadd.xlane.f32.xlu1 %v1051_v15 }
 0x53b   : > { %1604 = vmatmul.mubr.msk.bf16.vlgmr.msra.gmra.mrb[20].mxu0 %vm693_vm3, %v1056_v28 }
 0x53c   : > { %1614 = vmatpush3.bf16.xpose.msra.mxu0 %v1166_v29  ;;  %1615 = vmatprep.mubr.msk.bf16.mxu0 %vm1695_vm0, %v1694_v1 }
 0x53d   : > { %1625 = vmatprep.subr.bf16.mxu0 %v1694_v1 }
 0x543   : > { %1616 = vmatmul.mubr.msk.bf16.vlgmr.msra.gmra.mrb[24].mxu0 %vm645_vm2, %v1159_v16 }
 0x544   : > { %1627 = vmatprep.mubr.msk.bf16.mxu0 %vm1695_vm0, %v1694_v1  ;;  %1626 = vmatpush3.bf16.msra.mxu0 %v1286_v57 }
 0x5c3   : > { %v1050_v19 = vpop.xlane.xlu0 %1049 }
 0x5c4   : > { %1670 = vrcp.f32 %v1050_v19 }
 0x5c7   : > { %v1053_v20 = vpop.xlane.xlu1 %1052 }
 0x5c8   : > { %1672 = vrcp.f32 %v1053_v20 }
 0x5ce   : > { %v1671_v22 = vpop.eup %1670 }
 0x5d2   : > { %v1673_v24 = vpop.eup %1672 }
 0x60e   : > { %v1097_v21 = vpop.f32.mrb[20].mxu0 }
 0x60f   : > { %v1605_v23 = vpop.f32.mrb[21].mxu0  ;;  %v1104_v26 = vmul.f32 %v1671_v22, %v1097_v21 }
 0x610   : > { %v1100_v25 = vpop.f32.mrb[22].mxu0 }
 0x611   : > { %v1105_v27 = vmul.f32 %v1673_v24, %v1100_v25  ;;  %v1606_v30 = vpop.f32.mrb[23].mxu0 }
 0x613   : > { %v1106_v31 = vpack.c.bf16 %v1105_v27, %v1104_v26 }
 0x615   : > { %1610 = vmatmul.mubr.msk.bf16.vlgmr.msra.gmra.mrb[20].mxu1 %vm645_vm2, %v1106_v31 }
 0x616   : > { %v1202_v32 = vpop.f32.mrb[24].mxu0  ;;  %1621 = vmatprep.mubr.msk.bf16.mxu1 %vm1695_vm0, %v1694_v1 }
 0x617   : > { %v1617_v33 = vpop.f32.mrb[25].mxu0  ;;  %v1209_v34 = vsel %vm693_vm3, %v1202_v32, -inf }
 0x618   : > { %1210 = vmax.xlane.f32.xlu0 %v1209_v34  ;;  %v1205_v35 = vpop.f32.mrb[26].mxu0 }
 0x619   : > { %v1618_v36 = vpop.f32.mrb[27].mxu0  ;;  %v1212_v37 = vsel %vm693_vm3, %v1205_v35, -inf }
 0x61c   : > { %1213 = vmax.xlane.f32.xlu0 %v1212_v37  ;;  %v1496_v37 = vld [vmem:[%s1981_s11] ss:$0 sm:$0xff] }
 0x632   : > { %1230 = vrot.lane.b32.xlu0 %v1860_v48, %s1698_s20 }
 0x6a5   : > { %v1211_v38 = vpop.xlane.xlu0 %1210 }
 0x6a6   : > { %v1215_v39 = vsub.f32 %v1202_v32, %v1211_v38 }
 0x6a8   : > { %v1217_v40 = vmul.f32 1.442695, %v1215_v39 }
 0x6a9   : > { %v1214_v41 = vpop.xlane.xlu0 %1213 }
 0x6aa   : > { %1674 = vpow2.f32 %v1217_v40  ;;  %v1216_v42 = vsub.f32 %v1205_v35, %v1214_v41  ;;  %v1495_v35 = vld [vmem:[%s1980_s10] ss:$0 sm:$0xff] }
 0x6ac   : > { %v1219_v43 = vmul.f32 1.442695, %v1216_v42 }
 0x6ad   : > { %v1231_v1 = vpop.permute.xlu0 %1230 }
 0x6ae   : > { %1676 = vpow2.f32 %v1219_v43  ;;  %1620 = vmatpush3.bf16.msra.mxu1 %v1231_v1 }
 0x6b4   : > { %v1675_v44 = vpop.eup %1674 }
 0x6b5   : > { %v1221_v45 = vsel %vm693_vm3, %v1675_v44, 0.0 }
 0x6b6   : > { %1222 = vadd.xlane.f32.xlu0 %v1221_v45 }
 0x6b8   : > { %v1677_v46 = vpop.eup %1676 }
 0x6b9   : > { %v1224_v47 = vsel %vm693_vm3, %v1677_v46, 0.0  ;;  %v1229_v49 = vpack.c.bf16 %v1677_v46, %v1675_v44 }
 0x6ba   : > { %1225 = vadd.xlane.f32.xlu1 %v1224_v47 }
 0x6bb   : > { %1622 = vmatmul.mubr.msk.bf16.vlgmr.msra.gmra.mrb[24].mxu1 %vm693_vm3, %v1229_v49 }
 0x6e8   : > { %v1149_v48 = vpop.f32.mrb[20].mxu1 }
 0x6e9   : > { %v1156_v50 = vadd.f32 %v1149_v48, %v1904_v55  ;;  %v1611_v51 = vpop.f32.mrb[21].mxu1 }
 0x6ea   : > { %v1152_v52 = vpop.f32.mrb[22].mxu1 }
 0x6eb   : > { %v1157_v53 = vadd.f32 %v1152_v52, %v1906_v58  ;;  %v1612_v54 = vpop.f32.mrb[23].mxu1 }
 0x743   : > { %v1223_v59 = vpop.xlane.xlu0 %1222 }
 0x744   : > { %1678 = vrcp.f32 %v1223_v59 }
 0x747   : > { %v1226_v60 = vpop.xlane.xlu1 %1225 }
 0x748   : > { %1680 = vrcp.f32 %v1226_v60 }
 0x74e   : > { %v1679_v62 = vpop.eup %1678 }
 0x752   : > { %v1681_v55 = vpop.eup %1680 }
 0x78e   : > { %v1270_v61 = vpop.f32.mrb[24].mxu1 }
 0x78f   : > { %v1623_v63 = vpop.f32.mrb[25].mxu1  ;;  %v1277_v2 = vmul.f32 %v1679_v62, %v1270_v61 }
 0x790   : > { %v1273_v0 = vpop.f32.mrb[26].mxu1 }
 0x791   : > { %v1278_v3 = vmul.f32 %v1681_v55, %v1273_v0  ;;  %v1624_v58 = vpop.f32.mrb[27].mxu1 }
 0x793   : > { %v1279_v4 = vpack.c.bf16 %v1278_v3, %v1277_v2 }
 0x795   : > { %1628 = vmatmul.mubr.msk.bf16.vlgmr.msra.gmra.mrb[28].mxu0 %vm645_vm2, %v1279_v4 }
 0x868   : > { %v1322_v7 = vpop.f32.mrb[28].mxu0 }
 0x869   : > { %v1329_v9 = vadd.f32 %v1322_v7, %v1156_v50  ;;  %v1629_v10 = vpop.f32.mrb[29].mxu0 }
 0x86a   : > { %v1325_v11 = vpop.f32.mrb[30].mxu0 }
 0x86b   : > { %v1338_v12 = vadd.f32 %v1494_v8, %v1329_v9  ;;  %v1330_v13 = vadd.f32 %v1325_v11, %v1157_v53  ;;  %v1630_v14 = vpop.f32.mrb[31].mxu0 }
 0x86d   : > { %v1339_v15 = vadd.f32 %v1494_v8, %v1330_v13  ;;  %v1340_v28 = vadd.f32 %v1338_v12, %v1803_v5 }
 0x86f   : > { %v1342_v29 = vsel %vm466_vm1, %v1340_v28, 0.0  ;;  %v1341_v16 = vadd.f32 %v1339_v15, %v1805_v6 }
 0x870   : > { %1343 = vadd.xlane.f32.xlu1 %v1342_v29 }
 0x871   : > { %v1345_v17 = vsel %vm466_vm1, %v1341_v16, 0.0 }
 0x874   : > { %1346 = vadd.xlane.f32.xlu1 %v1345_v17 }
 0x8fd   : > { %v1344_v18 = vpop.xlane.xlu1 %1343 }
 0x8fe   : > { %v1349_v19 = vmul.f32 0.03125, %v1344_v18 }
 0x900   : > { %v1351_v20 = vsub.f32 %v1340_v28, %v1349_v19 }
 0x901   : > { %v1347_v21 = vpop.xlane.xlu1 %1346 }
 0x902   : > { %v1350_v22 = vmul.f32 0.03125, %v1347_v21  ;;  %v1353_v23 = vmul.f32 %v1351_v20, %v1351_v20 }
 0x904   : > { %v1352_v24 = vsub.f32 %v1341_v16, %v1350_v22  ;;  %v1355_v25 = vsel %vm466_vm1, %v1353_v23, 0.0 }
 0x905   : > { %1356 = vadd.xlane.f32.xlu1 %v1355_v25 }
 0x906   : > { %v1354_v26 = vmul.f32 %v1352_v24, %v1352_v24 }
 0x908   : > { %v1358_v5 = vsel %vm466_vm1, %v1354_v26, 0.0 }
 0x909   : > { %1359 = vadd.xlane.f32.xlu1 %v1358_v5 }
 0x992   : > { %v1357_v6 = vpop.xlane.xlu1 %1356 }
 0x993   : > { %v1361_v27 = vmul.f32 0.03125, %v1357_v6 }
 0x995   : > { %v1363_v30 = vadd.f32 1e-05, %v1361_v27 }
 0x996   : > { %v1360_v31 = vpop.xlane.xlu1 %1359 }
 0x997   : > { %1682 = vrsqrt.f32 %v1363_v30  ;;  %v1362_v32 = vmul.f32 0.03125, %v1360_v31 }
 0x999   : > { %v1364_v33 = vadd.f32 1e-05, %v1362_v32 }
 0x99b   : > { %1684 = vrsqrt.f32 %v1364_v33 }
 0x9a1   : > { %v1683_v34 = vpop.eup %1682 }
 0x9a2   : > { %v1367_v36 = vmul.f32 %v1683_v34, %v1351_v20 }
 0x9a4   : > { %v1376_v38 = vmul.f32 %v1495_v35, %v1367_v36 }
 0x9a5   : > { %v1685_v39 = vpop.eup %1684 }
 0x9a6   : > { %v1385_v40 = vadd.f32 %v1496_v37, %v1376_v38  ;;  %v1368_v41 = vmul.f32 %v1685_v39, %v1352_v24 }
 0x9a8   : > { %1387 = vst.msk [vmem:[%s433_s17] sm:$0xff] %vm466_vm1, %v1385_v40  ;;  %v1377_v42 = vmul.f32 %v1495_v35, %v1368_v41 }
 0x9aa   : > { %v1386_v43 = vadd.f32 %v1496_v37, %v1377_v42 }
 0x9ac   : > { %1388 = vst.msk [vmem:[%s433_s17 + $0x8] sm:$0xff] %vm466_vm1, %v1386_v43 }
 0x9ad PF: > { %s22_s21 = sadd.s32 1, %s1692_s21  }
 0x9ae   : > { %p19_p4 = scmp.ge.s32.totalorder %s22_s21, 4  }
 0x9b0   :  { %21 = sbr.rel (!%p19_p4) target bundleno = 1 (0x1), region = 104 }

// kernel: transformer_forward.16
= control target key start
LH: loop header
LB: loop body
LE: loop exit
PB: predicated region body
PF: predicated region fallthrough
CT: control target
= control target key end

     0   :  { %s1857_s18 = smov 0   ;;  %s2059_s0 = inlined_call_operand.vmem [shape: f32[2,8,32], index: 0, kind: input, shape index: {}]   ;;  %s2060_s1 = inlined_call_operand.vmem [shape: f32[2,8,32], index: 1, kind: input, shape index: {}]   ;;  %s2061_s2 = inlined_call_operand.vmem [shape: f32[2,16,32], index: 2, kind: input, shape index: {}]   ;;  %s2062_s3 = inlined_call_operand.vmem [shape: f32[2,16,32], index: 3, kind: input, shape index: {}]   ;;  %s2063_s4 = inlined_call_operand.vmem [shape: f32[2,8,16], index: 4, kind: input, shape index: {}]   ;;  %s2064_s5 = inlined_call_operand.vmem [shape: bf16[32,32], index: 5, kind: input, shape index: {}]   ;;  %s2065_s6 = inlined_call_operand.vmem [shape: bf16[32,32], index: 6, kind: input, shape index: {}]   ;;  %s2066_s7 = inlined_call_operand.vmem [shape: bf16[32,32], index: 7, kind: input, shape index: {}]   ;;  %s2067_s8 = inlined_call_operand.vmem [shape: bf16[4,8,32], index: 8, kind: input, shape index: {}]   ;;  %s2068_s9 = inlined_call_operand.vmem [shape: f32[1,32], index: 9, kind: input, shape index: {}]   ;;  %s2069_s10 = inlined_call_operand.vmem [shape: f32[1,32], index: 10, kind: input, shape index: {}]   ;;  %s2070_s11 = inlined_call_operand.vmem [shape: f32[1,32], index: 11, kind: input, shape index: {}]   ;;  %s2071_s12 = inlined_call_operand.vmem [shape: f32[1,32], index: 12, kind: input, shape index: {}]   ;;  %s2072_s13 = inlined_call_operand.vmem [shape: f32[1,32], index: 13, kind: input, shape index: {}]   ;;  %s2073_s14 = inlined_call_operand.vmem [shape: f32[1,32], index: 14, kind: input, shape index: {}]   ;;  %s2074_s15 = inlined_call_operand.vmem [shape: f32[2,8,32], index: 15, kind: output, shape index: {}]  }
   0x1 LB: > { %s1551_s19 = sadd.s32 4294967295, %s1770_s18   ;;  %p1555_p0 = scmp.ge.s32.totalorder %s1770_s18, 1  ;;  %s1770_s18 = sphi %s1857_s18, %s25_s18  }
   0x2   : > { %p474_p1 = scmp.lt.s32.totalorder %s1770_s18, 3 }
   0x4   : > { %p475_p2 = pnand %p1555_p0, %p474_p1 }
   0x5   : > { %v1740_v0 = vld [vmem:[%s2064_s5] sm:$0xff] (!%p475_p2)   ;;  %v1772_v1 = vmov (!%p475_p2), 0.0   ;;  %v1742_v3 = vld [vmem:[%s2064_s5 + $0x8] sm:$0xff] (!%p475_p2)   ;;  %vm1773_vm0 = vmmov (!%p475_p2), 0   ;;  %p538_p3 = scmp.lt.s32.totalorder (!%p475_p2), %s1551_s19, 1  ;;  %vm600_vm1 = vcmask (!%p475_p2), 261120  }
   0x6   : > { %478 = sbr.rel (%p475_p2) target bundleno = 2467 (0x9a3), region = 80  ;;  %1631 = vmatprep.subr.bf16.mxu0 (!%p475_p2), %v1772_v1  ;;  %1639 = vmatprep.subr.bf16.mxu1 (!%p475_p2), %v1772_v1  ;;  %v1741_v2 = vld [vmem:[%s2065_s6] sm:$0xff] (!%p475_p2)   ;;  %v1743_v4 = vld [vmem:[%s2065_s6 + $0x8] sm:$0xff] (!%p475_p2)   ;;  %vm782_vm2 = vcmask (!%p475_p2), 64512   ;;  %s1775_s26 = smov (!%p475_p2), 112   ;;  %vm829_vm3 = vcmask (!%p475_p2), 130048  }
   0x7   : > { %1632 = vmatpush3.bf16.msra.mxu0 (!%p475_p2), %v1740_v0  ;;  %1635 = vmatprep.mubr.msk.bf16.mxu0 (!%p475_p2), %vm1773_vm0, %v1772_v1  ;;  %v1744_v12 = vld [vmem:[%s2066_s7] sm:$0xff] (!%p475_p2)   ;;  %v1745_v17 = vld [vmem:[%s2066_s7 + $0x8] sm:$0xff] (!%p475_p2)   ;;  %vm1004_vm4 = vcmask (!%p475_p2), 1043456  }
   0x8   : > { %1640 = vmatpush3.bf16.msra.mxu1 (!%p475_p2), %v1741_v2  ;;  %1633 = vmatprep.subr.bf16.mxu0 (!%p475_p2), %v1772_v1  ;;  %v1568_v21 = vld [vmem:[%s2069_s10] ss:$0 sm:$0xff] (!%p475_p2) }
   0x9   : > { %1641 = vmatprep.subr.bf16.mxu1 (!%p475_p2), %v1772_v1  ;;  %1643 = vmatprep.mubr.msk.bf16.mxu1 (!%p475_p2), %vm1773_vm0, %v1772_v1  ;;  %v1564_v23 = vld [vmem:[%s2068_s9] ss:$0 sm:$0xff] (!%p475_p2) }
   0xa   : > { %v1572_v32 = vld [vmem:[%s2070_s11] ss:$0 sm:$0xff] (!%p475_p2) }
   0xb   : > { %1634 = vmatpush3.bf16.msra.mxu0 (!%p475_p2), %v1742_v3 }
   0xc   : > { %1642 = vmatpush3.bf16.msra.mxu1 (!%p475_p2), %v1743_v4  ;;  %1647 = vmatprep.subr.bf16.mxu0 (!%p475_p2), %v1772_v1 }
   0xd   : > { %s2076_s19 = smov (!%p538_p3, %s1551_s19), 1  ;;  %1655 = vmatprep.subr.bf16.mxu1 %v1772_v1 }
   0xe   : > { %s1885_s28 = sshll.u32 %s2076_s19, 3  ;;  %s1596_s29 = sshll.u32 %s2076_s19, 4 }
   0xf   : > { %s541_s17 = scalar_lea.vmem %s2059_s0, %s1885_s28  ;;  %s545_s22 = scalar_lea.vmem %s2060_s1, %s1885_s28 }
  0x10   : > { %v1896_v5 = vld [vmem:[%s541_s17] sm:$0xff]  ;;  %s550_s25 = scalar_lea.vmem %s2061_s2, %s1596_s29  ;;  %s555_s27 = scalar_lea.vmem %s2062_s3, %s1596_s29 }
  0x11   : > { %v566_v6 = vld [vmem:[%s545_s22] sm:$0xff]  ;;  %v570_v9 = vld [vmem:[%s550_s25 + $0x8] sm:$0xff]  ;;  %s1774_s19 = smov 120   ;;  %s559_s16 = scalar_lea.vmem %s2063_s4, %s1885_s28 }
  0x12   : > { %v567_v7 = vadd.f32 %v566_v6, %v1896_v5  ;;  %v569_v8 = vld [vmem:[%s550_s25] sm:$0xff]  ;;  %v572_v11 = vld [vmem:[%s555_s27 + $0x8] sm:$0xff]  ;;  %s1776_s17 = smov 104   ;;  %s563_s22 = scalar_lea.vmem %s2074_s15, %s1885_s28 }
  0x13   : > { %v571_v10 = vld [vmem:[%s555_s27] sm:$0xff]  ;;  %v574_v15 = vadd.f32 %v572_v11, %v570_v9  ;;  %v576_v18 = vpack.c.bf16 %v570_v9, %v569_v8 }
  0x14   : > { %v568_v13 = vpack.c.bf16 %v567_v7, %v567_v7  ;;  %v573_v14 = vadd.f32 %v571_v10, %v569_v8  ;;  %v1961_v46 = vld [vmem:[%s559_s16] sm:$0xff] }
  0x15   : > { %v886_v7 = vld [vmem:[%s2067_s8] sm:$0xf] }
  0x16   : > { %1636 = vmatmul.mubr.msk.bf16.vlgmr.msra.gmra.mrb[0].mxu0 %vm600_vm1, %v568_v13  ;;  %v575_v16 = vpack.c.bf16 %v574_v15, %v573_v14  ;;  %v1052_v11 = vsel %vm1004_vm4, %v886_v7, 0 }
  0x17   : > { %1648 = vmatpush3.bf16.msra.mxu0 %v1744_v12  ;;  %1651 = vmatprep.mubr.msk.bf16.mxu0 %vm1773_vm0, %v1772_v1  ;;  %v1580_v12 = vld [vmem:[%s2067_s8 + $0x4] sm:$0xf] }
  0x18   : > { %1644 = vmatmul.mubr.msk.bf16.vlgmr.msra.gmra.mrb[0].mxu1 %vm600_vm1, %v575_v16  ;;  %1649 = vmatprep.subr.bf16.mxu0 %v1772_v1  ;;  %v1006_v13 = vsel %vm1004_vm4, %v1580_v12, 0 }
  0x19   : > { %1657 = vmatprep.mubr.msk.bf16.mxu1 %vm1773_vm0, %v1772_v1 }
  0x1b   : > { %1650 = vmatpush3.bf16.msra.mxu0 %v1745_v17 }
  0x1c   : > { %1661 = vmatprep.subr.bf16.mxu0 %v1772_v1 }
  0x1e   : > { %1652 = vmatmul.mubr.msk.bf16.vlgmr.msra.gmra.mrb[4].mxu0 %vm600_vm1, %v576_v18 }
  0x1f   : > { %1663 = vmatprep.mubr.msk.bf16.mxu0 %vm1773_vm0, %v1772_v1 }
  0xe9   : > { %v638_v19 = vpop.f32.mrb[0].mxu0 }
  0xea   : > { %v1637_v20 = vpop.f32.mrb[1].mxu0  ;;  %v639_v31 = vadd.f32 %v1564_v23, %v638_v19 }
  0xeb   : > { %v704_v22 = vpop.f32.mrb[0].mxu1  ;;  %v641_v24 = vpop.f32.mrb[2].mxu0 }
  0xec   : > { %v1645_v25 = vpop.f32.mrb[1].mxu1  ;;  %v1638_v26 = vpop.f32.mrb[3].mxu0  ;;  %v705_v28 = vadd.f32 %v1568_v21, %v704_v22  ;;  %v1934_v35 = vpack.c.bf16 %v639_v31, %v639_v31 }
  0xed   : > { %v707_v27 = vpop.f32.mrb[2].mxu1 }
  0xee   : > { %v708_v29 = vadd.f32 %v1568_v21, %v707_v27  ;;  %v1646_v30 = vpop.f32.mrb[3].mxu1 }
  0xf0   : > { %v1932_v33 = vpack.c.bf16 %v708_v29, %v705_v28 }
  0xf1   : > { %v771_v34 = vpop.f32.mrb[4].mxu0 }
  0xf2   : > { %891 = vrot.lane.b32.xlu0 %v1932_v33, %s1774_s19  ;;  %v772_v36 = vadd.f32 %v1572_v32, %v771_v34  ;;  %v787_v37 = vsel %vm782_vm2, %v1932_v33, 0  ;;  %v1653_v38 = vpop.f32.mrb[5].mxu0 }
  0xf3   : > { %1656 = vmatpush3.bf16.xpose.msra.mxu1 %v787_v37  ;;  %v774_v39 = vpop.f32.mrb[6].mxu0 }
  0xf4   : > { %v775_v40 = vadd.f32 %v1572_v32, %v774_v39  ;;  %1667 = vmatprep.subr.bf16.mxu1 %v1772_v1  ;;  %v1654_v41 = vpop.f32.mrb[7].mxu0 }
  0xf6   : > { %v1940_v42 = vpack.c.bf16 %v775_v40, %v772_v36  ;;  %888 = vrot.lane.b32.xlu0 %v1934_v35, %s1774_s19 }
  0xf8   : > { %1662 = vmatpush3.bf16.msra.mxu0 %v1940_v42 }
  0xf9   : > { %1673 = vmatprep.subr.bf16.mxu0 %v1772_v1 }
  0xfa   : > { %1658 = vmatmul.mubr.msk.bf16.vlgmr.msra.gmra.mrb[4].mxu1 %vm782_vm2, %v1934_v35  ;;  %951 = vrot.lane.b32.xlu0 %v1940_v42, %s1774_s19 }
  0xfb   : > { %1669 = vmatprep.mubr.msk.bf16.mxu1 %vm1773_vm0, %v1772_v1 }
  0xfe   : > { %1096 = vrot.lane.b32.xlu0 %v1932_v33, %s1775_s26 }
 0x164   : > { %v892_v43 = vpop.permute.xlu0 %891 }
 0x165   : > { %v897_v44 = vsel %vm782_vm2, %v892_v43, 0 }
 0x166   : > { %1668 = vmatpush3.bf16.xpose.msra.mxu1 %v897_v44 }
 0x167   : > { %1679 = vmatprep.subr.bf16.mxu1 %v1772_v1 }
 0x168   : > { %v889_v45 = vpop.permute.xlu0 %888 }
 0x16c   : > { %v952_v2 = vpop.permute.xlu0 %951 }
 0x16d   : > { %1670 = vmatmul.mubr.msk.bf16.vlgmr.msra.gmra.mrb[8].mxu1 %vm782_vm2, %v889_v45 }
 0x16e   : > { %1681 = vmatprep.mubr.msk.bf16.mxu1 %vm1773_vm0, %v1772_v1  ;;  %1680 = vmatpush3.bf16.msra.mxu1 %v1006_v13 }
 0x16f   : > { %1691 = vmatprep.subr.bf16.mxu1 %v1772_v1 }
 0x170   : > { %v1097_v14 = vpop.permute.xlu0 %1096 }
 0x171   : > { %v1102_v32 = vsel %vm782_vm2, %v1097_v14, 0 }
 0x1cd   : > { %v823_v47 = vpop.f32.mrb[4].mxu1 }
 0x1ce   : > { %v824_v48 = vadd.f32 %v823_v47, %v1961_v46  ;;  %v1659_v49 = vpop.f32.mrb[5].mxu1 }
 0x1cf   : > { %v826_v50 = vpop.f32.mrb[6].mxu1 }
 0x1d0   : > { %v1660_v51 = vpop.f32.mrb[7].mxu1  ;;  %v830_v52 = vsel %vm829_vm3, %v824_v48, -inf }
 0x1d1   : > { %831 = vmax.xlane.f32.xlu1 %v830_v52 }
 0x240   : > { %v933_v53 = vpop.f32.mrb[8].mxu1 }
 0x241   : > { %v934_v54 = vadd.f32 %v933_v53, %v1961_v46  ;;  %v1671_v55 = vpop.f32.mrb[9].mxu1 }
 0x242   : > { %v936_v56 = vpop.f32.mrb[10].mxu1 }
 0x243   : > { %v1672_v57 = vpop.f32.mrb[11].mxu1  ;;  %v939_v58 = vsel %vm829_vm3, %v934_v54, -inf }
 0x244   : > { %940 = vmax.xlane.f32.xlu1 %v939_v58 }
 0x25e   : > { %v832_v59 = vpop.xlane.xlu1 %831 }
 0x25f   : > { %v833_v60 = vsub.f32 %v824_v48, %v832_v59 }
 0x261   : > { %v834_v61 = vmul.f32 1.442695, %v833_v60  ;;  %v1585_v60 = vld [vmem:[%s2067_s8 + $0x8] sm:$0xf] }
 0x263   : > { %1746 = vpow2.f32 %v834_v61  ;;  %v1209_v61 = vsel %vm1004_vm4, %v1585_v60, 0 }
 0x26d   : > { %v1747_v62 = vpop.eup %1746 }
 0x26e   : > { %v836_v63 = vsel %vm829_vm3, %v1747_v62, 0.0  ;;  %v840_v0 = vpack.c.bf16 %v1747_v62, %v1747_v62 }
 0x26f   : > { %837 = vadd.xlane.f32.xlu0 %v836_v63 }
 0x270   : > { %1664 = vmatmul.mubr.msk.bf16.vlgmr.msra.gmra.mrb[8].mxu0 %vm829_vm3, %v840_v0 }
 0x271   : > { %1674 = vmatpush3.bf16.msra.mxu0 %v952_v2  ;;  %1675 = vmatprep.mubr.msk.bf16.mxu0 %vm1773_vm0, %v1772_v1 }
 0x272   : > { %1685 = vmatprep.subr.bf16.mxu0 %v1772_v1 }
 0x285   : > { %1155 = vrot.lane.b32.xlu0 %v1940_v42, %s1775_s26 }
 0x289   : > { %1252 = vrot.lane.b32.xlu0 %v1934_v35, %s1776_s17 }
 0x2d1   : > { %v941_v3 = vpop.xlane.xlu1 %940 }
 0x2d2   : > { %v942_v4 = vsub.f32 %v934_v54, %v941_v3 }
 0x2d4   : > { %v943_v6 = vmul.f32 1.442695, %v942_v4 }
 0x2d6   : > { %1748 = vpow2.f32 %v943_v6 }
 0x2e0   : > { %v1749_v8 = vpop.eup %1748 }
 0x2e1   : > { %v945_v9 = vsel %vm829_vm3, %v1749_v8, 0.0  ;;  %v949_v10 = vpack.c.bf16 %v1749_v8, %v1749_v8 }
 0x2e2   : > { %946 = vadd.xlane.f32.xlu1 %v945_v9 }
 0x2e3   : > { %1676 = vmatmul.mubr.msk.bf16.vlgmr.msra.gmra.mrb[12].mxu0 %vm829_vm3, %v949_v10 }
 0x2e4   : > { %1686 = vmatpush3.bf16.msra.mxu0 %v1052_v11  ;;  %1687 = vmatprep.mubr.msk.bf16.mxu0 %vm1773_vm0, %v1772_v1 }
 0x2e5   : > { %1697 = vmatprep.subr.bf16.mxu0 %v1772_v1 }
 0x2f3   : > { %1094 = vrot.lane.b32.xlu1 %v1934_v35, %s1775_s26 }
 0x2fc   : > { %v838_v15 = vpop.xlane.xlu0 %837 }
 0x2fd   : > { %1750 = vrcp.f32 %v838_v15 }
 0x300   : > { %v1156_v23 = vpop.permute.xlu0 %1155 }
 0x307   : > { %v1751_v16 = vpop.eup %1750 }
 0x343   : > { %v878_v17 = vpop.f32.mrb[8].mxu0 }
 0x344   : > { %v884_v18 = vmul.f32 %v1751_v16, %v878_v17  ;;  %v1665_v19 = vpop.f32.mrb[9].mxu0 }
 0x345   : > { %v881_v20 = vpop.f32.mrb[10].mxu0 }
 0x346   : > { %v885_v21 = vpack.c.bf16 %v884_v18, %v884_v18  ;;  %v1666_v22 = vpop.f32.mrb[11].mxu0 }
 0x348   : > { %1688 = vmatmul.mubr.msk.bf16.vlgmr.msra.gmra.mrb[16].mxu0 %vm782_vm2, %v885_v21 }
 0x349   : > { %1698 = vmatpush3.bf16.msra.mxu0 %v1156_v23  ;;  %1699 = vmatprep.mubr.msk.bf16.mxu0 %vm1773_vm0, %v1772_v1 }
 0x34a   : > { %1709 = vmatprep.subr.bf16.mxu0 %v1772_v1 }
 0x36f   : > { %v947_v24 = vpop.xlane.xlu1 %946 }
 0x370   : > { %1752 = vrcp.f32 %v947_v24 }
 0x373   : > { %v1095_v34 = vpop.permute.xlu1 %1094 }
 0x37a   : > { %v1753_v25 = vpop.eup %1752 }
 0x3b6   : > { %v991_v26 = vpop.f32.mrb[12].mxu0 }
 0x3b7   : > { %v997_v27 = vmul.f32 %v1753_v25, %v991_v26  ;;  %v1677_v28 = vpop.f32.mrb[13].mxu0 }
 0x3b8   : > { %v994_v29 = vpop.f32.mrb[14].mxu0 }
 0x3b9   : > { %v998_v30 = vpack.c.bf16 %v997_v27, %v997_v27  ;;  %v1678_v31 = vpop.f32.mrb[15].mxu0 }
 0x3bb   : > { %1682 = vmatmul.mubr.msk.bf16.vlgmr.msra.gmra.mrb[12].mxu1 %vm782_vm2, %v998_v30 }
 0x3bc   : > { %1692 = vmatpush3.bf16.xpose.msra.mxu1 %v1102_v32  ;;  %1693 = vmatprep.mubr.msk.bf16.mxu1 %vm1773_vm0, %v1772_v1 }
 0x3bd   : > { %1703 = vmatprep.subr.bf16.mxu1 %v1772_v1 }
 0x3c3   : > { %1694 = vmatmul.mubr.msk.bf16.vlgmr.msra.gmra.mrb[16].mxu1 %vm782_vm2, %v1095_v34 }
 0x3c4   : > { %1705 = vmatprep.mubr.msk.bf16.mxu1 %vm1773_vm0, %v1772_v1  ;;  %1704 = vmatpush3.bf16.msra.mxu1 %v1209_v61 }
 0x3c5   : > { %1715 = vmatprep.subr.bf16.mxu1 %v1772_v1 }
 0x41b   : > { %v1088_v35 = vpop.f32.mrb[16].mxu0 }
 0x41c   : > { %v1689_v36 = vpop.f32.mrb[17].mxu0 }
 0x41d   : > { %v1091_v37 = vpop.f32.mrb[18].mxu0 }
 0x41e   : > { %v1690_v38 = vpop.f32.mrb[19].mxu0 }
 0x48e   : > { %v1042_v39 = vpop.f32.mrb[12].mxu1 }
 0x48f   : > { %v2004_v40 = vadd.f32 %v1088_v35, %v1042_v39  ;;  %v1683_v41 = vpop.f32.mrb[13].mxu1  ;;  %v1591_v35 = vld [vmem:[%s2071_s12] ss:$0 sm:$0xff] }
 0x490   : > { %v1045_v43 = vpop.f32.mrb[14].mxu1 }
 0x491   : > { %v1684_v44 = vpop.f32.mrb[15].mxu1 }
 0x496   : > { %v1138_v45 = vpop.f32.mrb[16].mxu1 }
 0x497   : > { %v1139_v47 = vadd.f32 %v1138_v45, %v1961_v46  ;;  %v1695_v48 = vpop.f32.mrb[17].mxu1 }
 0x498   : > { %v1141_v49 = vpop.f32.mrb[18].mxu1 }
 0x499   : > { %v1696_v50 = vpop.f32.mrb[19].mxu1  ;;  %v1144_v51 = vsel %vm829_vm3, %v1139_v47, -inf }
 0x49a   : > { %1145 = vmax.xlane.f32.xlu1 %v1144_v51 }
 0x4ab   : > { %1254 = vrot.lane.b32.xlu1 %v1932_v33, %s1776_s17  ;;  %v1253_v33 = vpop.permute.xlu0 %1252 }
 0x527   : > { %v1146_v52 = vpop.xlane.xlu1 %1145 }
 0x528   : > { %v1147_v53 = vsub.f32 %v1139_v47, %v1146_v52 }
 0x52a   : > { %v1148_v54 = vmul.f32 1.442695, %v1147_v53 }
 0x52b   : > { %v1255_v56 = vpop.permute.xlu1 %1254 }
 0x52c   : > { %1754 = vpow2.f32 %v1148_v54  ;;  %v1260_v59 = vsel %vm782_vm2, %v1255_v56, 0 }
 0x536   : > { %v1755_v55 = vpop.eup %1754 }
 0x537   : > { %v1150_v57 = vsel %vm829_vm3, %v1755_v55, 0.0  ;;  %v1154_v58 = vpack.c.bf16 %v1755_v55, %v1755_v55  ;;  %v1593_v55 = vld [vmem:[%s2073_s14] ss:$0 sm:$0xff] }
 0x538   : > { %1151 = vadd.xlane.f32.xlu0 %v1150_v57 }
 0x539   : > { %1700 = vmatmul.mubr.msk.bf16.vlgmr.msra.gmra.mrb[20].mxu0 %vm829_vm3, %v1154_v58 }
 0x53a   : > { %1710 = vmatpush3.bf16.xpose.msra.mxu0 %v1260_v59  ;;  %1711 = vmatprep.mubr.msk.bf16.mxu0 %vm1773_vm0, %v1772_v1 }
 0x53b   : > { %1721 = vmatprep.subr.bf16.mxu0 %v1772_v1 }
 0x541   : > { %1712 = vmatmul.mubr.msk.bf16.vlgmr.msra.gmra.mrb[24].mxu0 %vm782_vm2, %v1253_v33 }
 0x542   : > { %1723 = vmatprep.mubr.msk.bf16.mxu0 %vm1773_vm0, %v1772_v1 }
 0x54e   : > { %1313 = vrot.lane.b32.xlu0 %v1940_v42, %s1776_s17 }
 0x5c5   : > { %v1152_v62 = vpop.xlane.xlu0 %1151 }
 0x5c6   : > { %1756 = vrcp.f32 %v1152_v62 }
 0x5c9   : > { %v1314_v8 = vpop.permute.xlu0 %1313 }
 0x5d0   : > { %v1757_v63 = vpop.eup %1756 }
 0x60c   : > { %v1195_v0 = vpop.f32.mrb[20].mxu0 }
 0x60d   : > { %v1201_v2 = vmul.f32 %v1757_v63, %v1195_v0  ;;  %v1701_v3 = vpop.f32.mrb[21].mxu0 }
 0x60e   : > { %v1198_v4 = vpop.f32.mrb[22].mxu0 }
 0x60f   : > { %v1202_v6 = vpack.c.bf16 %v1201_v2, %v1201_v2  ;;  %v1702_v7 = vpop.f32.mrb[23].mxu0 }
 0x611   : > { %1706 = vmatmul.mubr.msk.bf16.vlgmr.msra.gmra.mrb[20].mxu1 %vm782_vm2, %v1202_v6 }
 0x612   : > { %1716 = vmatpush3.bf16.msra.mxu1 %v1314_v8  ;;  %1717 = vmatprep.mubr.msk.bf16.mxu1 %vm1773_vm0, %v1772_v1  ;;  %v1589_v1 = vld [vmem:[%s2067_s8 + $0xc] sm:$0xf] }
 0x614   : > { %v1296_v42 = vpop.f32.mrb[24].mxu0 }
 0x615   : > { %v1297_v9 = vadd.f32 %v1296_v42, %v1961_v46  ;;  %v1713_v10 = vpop.f32.mrb[25].mxu0  ;;  %v1367_v46 = vsel %vm1004_vm4, %v1589_v1, 0 }
 0x616   : > { %v1299_v11 = vpop.f32.mrb[26].mxu0  ;;  %1722 = vmatpush3.bf16.msra.mxu0 %v1367_v46 }
 0x617   : > { %v1714_v12 = vpop.f32.mrb[27].mxu0  ;;  %v1302_v13 = vsel %vm829_vm3, %v1297_v9, -inf }
 0x618   : > { %1303 = vmax.xlane.f32.xlu1 %v1302_v13 }
 0x6a5   : > { %v1304_v14 = vpop.xlane.xlu1 %1303 }
 0x6a6   : > { %v1305_v15 = vsub.f32 %v1297_v9, %v1304_v14 }
 0x6a8   : > { %v1306_v16 = vmul.f32 1.442695, %v1305_v15 }
 0x6aa   : > { %1758 = vpow2.f32 %v1306_v16 }
 0x6b4   : > { %v1759_v17 = vpop.eup %1758 }
 0x6b5   : > { %v1308_v18 = vsel %vm829_vm3, %v1759_v17, 0.0  ;;  %v1312_v19 = vpack.c.bf16 %v1759_v17, %v1759_v17 }
 0x6b6   : > { %1309 = vadd.xlane.f32.xlu1 %v1308_v18 }
 0x6b7   : > { %1718 = vmatmul.mubr.msk.bf16.vlgmr.msra.gmra.mrb[24].mxu1 %vm829_vm3, %v1312_v19 }
 0x6e4   : > { %v1245_v20 = vpop.f32.mrb[20].mxu1 }
 0x6e5   : > { %v1251_v21 = vadd.f32 %v1245_v20, %v2004_v40  ;;  %v1707_v22 = vpop.f32.mrb[21].mxu1 }
 0x6e6   : > { %v1248_v23 = vpop.f32.mrb[22].mxu1 }
 0x6e7   : > { %v1708_v24 = vpop.f32.mrb[23].mxu1 }
 0x743   : > { %v1310_v25 = vpop.xlane.xlu1 %1309 }
 0x744   : > { %1760 = vrcp.f32 %v1310_v25 }
 0x74e   : > { %v1761_v26 = vpop.eup %1760 }
 0x78a   : > { %v1353_v27 = vpop.f32.mrb[24].mxu1 }
 0x78b   : > { %v1359_v28 = vmul.f32 %v1761_v26, %v1353_v27  ;;  %v1719_v29 = vpop.f32.mrb[25].mxu1 }
 0x78c   : > { %v1356_v30 = vpop.f32.mrb[26].mxu1 }
 0x78d   : > { %v1360_v31 = vpack.c.bf16 %v1359_v28, %v1359_v28  ;;  %v1720_v32 = vpop.f32.mrb[27].mxu1 }
 0x78f   : > { %1724 = vmatmul.mubr.msk.bf16.vlgmr.msra.gmra.mrb[28].mxu0 %vm782_vm2, %v1360_v31 }
 0x862   : > { %v1403_v34 = vpop.f32.mrb[28].mxu0 }
 0x863   : > { %v1409_v36 = vadd.f32 %v1403_v34, %v1251_v21  ;;  %v1725_v37 = vpop.f32.mrb[29].mxu0 }
 0x864   : > { %v1406_v38 = vpop.f32.mrb[30].mxu0 }
 0x865   : > { %v1417_v39 = vadd.f32 %v1591_v35, %v1409_v36  ;;  %v1726_v40 = vpop.f32.mrb[31].mxu0 }
 0x867   : > { %v1418_v41 = vadd.f32 %v1417_v39, %v1896_v5  ;;  %v1592_v5 = vld [vmem:[%s2072_s13] ss:$0 sm:$0xff] }
 0x869   : > { %v1419_v43 = vsel %vm600_vm1, %v1418_v41, 0.0 }
 0x86a   : > { %1420 = vadd.xlane.f32.xlu1 %v1419_v43 }
 0x8f7   : > { %v1421_v44 = vpop.xlane.xlu1 %1420 }
 0x8f8   : > { %v1423_v45 = vmul.f32 0.03125, %v1421_v44 }
 0x8fa   : > { %v1424_v47 = vsub.f32 %v1418_v41, %v1423_v45 }
 0x8fc   : > { %v1425_v48 = vmul.f32 %v1424_v47, %v1424_v47 }
 0x8fe   : > { %v1426_v49 = vsel %vm600_vm1, %v1425_v48, 0.0 }
 0x8ff   : > { %1427 = vadd.xlane.f32.xlu0 %v1426_v49 }
 0x98c   : > { %v1428_v50 = vpop.xlane.xlu0 %1427 }
 0x98d   : > { %v1429_v51 = vmul.f32 0.03125, %v1428_v50 }
 0x98f   : > { %v1430_v52 = vadd.f32 1e-05, %v1429_v51 }
 0x991   : > { %1762 = vrsqrt.f32 %v1430_v52 }
 0x99b   : > { %v1763_v53 = vpop.eup %1762 }
 0x99c   : > { %v1432_v54 = vmul.f32 %v1763_v53, %v1424_v47 }
 0x99e   : > { %v1440_v56 = vmul.f32 %v1592_v5, %v1432_v54 }
 0x9a0   : > { %v1448_v57 = vadd.f32 %v1593_v55, %v1440_v56 }
 0x9a2   : > { %1449 = vst.msk [vmem:[%s563_s22] sm:$0xff] %vm600_vm1, %v1448_v57 }
 0x9a3 PF: > { %s25_s18 = sadd.s32 1, %s1770_s18  }
 0x9a4   : > { %p22_p4 = scmp.ge.s32.totalorder %s25_s18, 4  }
 0x9a6   :  { %24 = sbr.rel (!%p22_p4) target bundleno = 1 (0x1), region = 125 }

// kernel: transformer_forward.18
= control target key start
LH: loop header
LB: loop body
LE: loop exit
PB: predicated region body
PF: predicated region fallthrough
CT: control target
= control target key end

     0   :  { %v290_v0 = vmov 0.0   ;;  %vm291_vm0 = vmmov 0   ;;  %vm53_vm1 = vcmask 261120   ;;  %vm140_vm2 = vcmask 523264   ;;  %s381_s1 = inlined_call_operand.vmem [shape: bf16[32,64], index: 1, kind: input, shape index: {}]   ;;  %s382_s0 = inlined_call_operand.vmem [shape: f32[16,32], index: 0, kind: input, shape index: {}]   ;;  %s383_s3 = inlined_call_operand.vmem [shape: bf16[64,32], index: 3, kind: input, shape index: {}]   ;;  %s384_s2 = inlined_call_operand.vmem [shape: f32[1,64], index: 2, kind: input, shape index: {}]   ;;  %s385_s4 = inlined_call_operand.vmem [shape: f32[1,32], index: 4, kind: input, shape index: {}]   ;;  %s386_s5 = inlined_call_operand.vmem [shape: f32[1,32], index: 5, kind: input, shape index: {}]   ;;  %s387_s6 = inlined_call_operand.vmem [shape: f32[1,32], index: 6, kind: input, shape index: {}]   ;;  %s388_s7 = inlined_call_operand.vmem [shape: f32[16,32], index: 7, kind: output, shape index: {}]  }
   0x1   :  { %258 = vmatprep.subr.bf16.mxu0 %v290_v0  ;;  %v280_v1 = vld [vmem:[%s381_s1] sm:$0xff]   ;;  %262 = vmatprep.mubr.msk.bf16.mxu0 %vm291_vm0, %v290_v0  ;;  %v281_v2 = vld [vmem:[%s381_s1 + $0x8] sm:$0xff]   ;;  %v284_v8 = vld [vmem:[%s383_s3 + $0x10] sm:$0xff]  }
   0x2   :  { %266 = vmatprep.subr.bf16.mxu1 %v290_v0  ;;  %274 = vmatprep.mubr.msk.bf16.mxu1 %vm291_vm0, %v290_v0  ;;  %v27_v3 = vld [vmem:[%s382_s0] sm:$0xff]  ;;  %v28_v4 = vld [vmem:[%s382_s0 + $0x8] sm:$0xff]  ;;  %v285_v9 = vld [vmem:[%s383_s3 + $0x18] sm:$0xff]  }
   0x3   :  { %259 = vmatpush3.bf16.msra.mxu0 %v280_v1  ;;  %v282_v5 = vld [vmem:[%s383_s3] sm:$0xff]   ;;  %v283_v6 = vld [vmem:[%s383_s3 + $0x8] sm:$0xff]   ;;  %v29_v7 = vpack.c.bf16 %v28_v4, %v27_v3 }
   0x4   :  { %260 = vmatprep.subr.bf16.mxu0 %v290_v0  ;;  %267 = vmatpush3.bf16.msra.mxu1 %v282_v5  ;;  %v238_v10 = vld [vmem:[%s384_s2] ss:$0 sm:$0xff] }
   0x5   :  { %268 = vmatprep.subr.bf16.mxu1 %v290_v0  ;;  %v242_v20 = vld [vmem:[%s385_s4] ss:$0 sm:$0xff] }
   0x6   :  { %v248_v48 = vld [vmem:[%s386_s5] ss:$0 sm:$0xff] }
   0x7   :  { %261 = vmatpush3.bf16.msra.mxu0 %v281_v2  ;;  %v249_v50 = vld [vmem:[%s387_s6] ss:$0 sm:$0xff] }
   0x8   :  { %269 = vmatpush3.bf16.msra.mxu1 %v283_v6 }
   0x9   :  { %270 = vmatprep.subr.bf16.mxu1 %v290_v0 }
   0xa   :  { %263 = vmatmul.mubr.msk.bf16.vlgmr.msra.gmra.mrb[0].mxu0 %vm53_vm1, %v29_v7 }
   0xc   :  { %271 = vmatpush3.bf16.msra.mxu1 %v284_v8 }
   0xd   :  { %272 = vmatprep.subr.bf16.mxu1 %v290_v0 }
  0x10   :  { %273 = vmatpush3.bf16.msra.mxu1 %v285_v9 }
  0xdd   :  { %v91_v11 = vpop.f32.mrb[0].mxu0 }
  0xde   :  { %v92_v12 = vadd.f32 %v238_v10, %v91_v11  ;;  %v264_v13 = vpop.f32.mrb[1].mxu0 }
  0xdf   :  { %v94_v14 = vpop.f32.mrb[2].mxu0 }
  0xe0   :  { %v95_v15 = vadd.f32 %v238_v10, %v94_v14  ;;  %v265_v16 = vpop.f32.mrb[3].mxu0  ;;  %v98_v17 = vmax.f32 %v92_v12, 0.0 }
  0xe2   :  { %v99_v18 = vmax.f32 %v95_v15, 0.0 }
  0xe4   :  { %v100_v19 = vpack.c.bf16 %v99_v18, %v98_v17 }
  0xe6   :  { %275 = vmatmul.mubr.msk.bf16.vlgmr.msra.gmra.mrb[0].mxu1 %vm140_vm2, %v100_v19 }
 0x1b9   :  { %v178_v21 = vpop.f32.mrb[0].mxu1 }
 0x1ba   :  { %v179_v22 = vadd.f32 %v242_v20, %v178_v21  ;;  %v276_v23 = vpop.f32.mrb[1].mxu1 }
 0x1bb   :  { %v181_v24 = vpop.f32.mrb[2].mxu1 }
 0x1bc   :  { %v182_v25 = vadd.f32 %v242_v20, %v181_v24  ;;  %v277_v26 = vpop.f32.mrb[3].mxu1  ;;  %v185_v27 = vadd.f32 %v179_v22, %v27_v3 }
 0x1be   :  { %v187_v28 = vsel %vm53_vm1, %v185_v27, 0.0  ;;  %v186_v29 = vadd.f32 %v182_v25, %v28_v4 }
 0x1bf   :  { %188 = vadd.xlane.f32.xlu0 %v187_v28 }
 0x1c0   :  { %v190_v30 = vsel %vm53_vm1, %v186_v29, 0.0 }
 0x1c3   :  { %191 = vadd.xlane.f32.xlu0 %v190_v30 }
 0x24c   :  { %v189_v31 = vpop.xlane.xlu0 %188 }
 0x24d   :  { %v194_v32 = vmul.f32 0.03125, %v189_v31 }
 0x24f   :  { %v196_v33 = vsub.f32 %v185_v27, %v194_v32 }
 0x250   :  { %v192_v34 = vpop.xlane.xlu0 %191 }
 0x251   :  { %v195_v35 = vmul.f32 0.03125, %v192_v34  ;;  %v198_v36 = vmul.f32 %v196_v33, %v196_v33 }
 0x253   :  { %v197_v37 = vsub.f32 %v186_v29, %v195_v35  ;;  %v200_v38 = vsel %vm53_vm1, %v198_v36, 0.0 }
 0x254   :  { %201 = vadd.xlane.f32.xlu1 %v200_v38 }
 0x255   :  { %v199_v39 = vmul.f32 %v197_v37, %v197_v37 }
 0x257   :  { %v203_v40 = vsel %vm53_vm1, %v199_v39, 0.0 }
 0x258   :  { %204 = vadd.xlane.f32.xlu1 %v203_v40 }
 0x2e1   :  { %v202_v41 = vpop.xlane.xlu1 %201 }
 0x2e2   :  { %v206_v42 = vmul.f32 0.03125, %v202_v41 }
 0x2e4   :  { %v208_v43 = vadd.f32 1e-05, %v206_v42 }
 0x2e5   :  { %v205_v44 = vpop.xlane.xlu1 %204 }
 0x2e6   :  { %286 = vrsqrt.f32 %v208_v43  ;;  %v207_v45 = vmul.f32 0.03125, %v205_v44 }
 0x2e8   :  { %v209_v46 = vadd.f32 1e-05, %v207_v45 }
 0x2ea   :  { %288 = vrsqrt.f32 %v209_v46 }
 0x2f0   :  { %v287_v47 = vpop.eup %286 }
 0x2f1   :  { %v212_v49 = vmul.f32 %v287_v47, %v196_v33 }
 0x2f3   :  { %v221_v51 = vmul.f32 %v248_v48, %v212_v49 }
 0x2f4   :  { %v289_v52 = vpop.eup %288 }
 0x2f5   :  { %v230_v53 = vadd.f32 %v249_v50, %v221_v51  ;;  %v213_v54 = vmul.f32 %v289_v52, %v197_v37 }
 0x2f7   :  { %232 = vst.msk [vmem:[%s388_s7] sm:$0xff] %vm53_vm1, %v230_v53  ;;  %v222_v55 = vmul.f32 %v248_v48, %v213_v54 }
 0x2f9   :  { %v231_v56 = vadd.f32 %v249_v50, %v222_v55 }
 0x2fb   :  { %233 = vst.msk [vmem:[%s388_s7 + $0x8] sm:$0xff] %vm53_vm1, %v231_v56 }

// kernel: transformer_forward.21
= control target key start
LH: loop header
LB: loop body
LE: loop exit
PB: predicated region body
PF: predicated region fallthrough
CT: control target
= control target key end

     0   :  { %v386_v1 = vmov 0.0   ;;  %vm387_vm0 = vmmov 0   ;;  %vm60_vm1 = vcmask 261120   ;;  %s506_s0 = inlined_call_operand.vmem [shape: f32[16,32], index: 0, kind: input, shape index: {}]   ;;  %s507_s1 = inlined_call_operand.vmem [shape: bf16[32,64], index: 1, kind: input, shape index: {}]   ;;  %s508_s2 = inlined_call_operand.vmem [shape: f32[1,64], index: 2, kind: input, shape index: {}]   ;;  %s509_s3 = inlined_call_operand.vmem [shape: bf16[64,32], index: 3, kind: input, shape index: {}]   ;;  %s510_s4 = inlined_call_operand.vmem [shape: f32[1,32], index: 4, kind: input, shape index: {}]   ;;  %s511_s5 = inlined_call_operand.vmem [shape: f32[1,32], index: 5, kind: input, shape index: {}]   ;;  %s512_s6 = inlined_call_operand.vmem [shape: f32[1,32], index: 6, kind: input, shape index: {}]   ;;  %s513_s7 = inlined_call_operand.vmem [shape: f32[1,32], index: 7, kind: input, shape index: {}]   ;;  %s514_s8 = inlined_call_operand.vmem [shape: f32[1,32], index: 8, kind: input, shape index: {}]   ;;  %s515_s9 = inlined_call_operand.hbm [shape: f32[16,32], index: 9, kind: output, shape index: {}]  }
   0x1   :  { %v348_v0 = vld [vmem:[%s507_s1] sm:$0xff]   ;;  %323 = vmatprep.subr.bf16.mxu0 %v386_v1  ;;  %v349_v2 = vld [vmem:[%s507_s1 + $0x8] sm:$0xff]   ;;  %331 = vmatprep.subr.bf16.mxu1 %v386_v1 }
   0x2   :  { %324 = vmatpush3.bf16.msra.mxu0 %v348_v0  ;;  %327 = vmatprep.mubr.msk.bf16.mxu0 %vm387_vm0, %v386_v1  ;;  %v34_v3 = vld [vmem:[%s506_s0] sm:$0xff]  ;;  %v35_v4 = vld [vmem:[%s506_s0 + $0x8] sm:$0xff] }
   0x3   :  { %325 = vmatprep.subr.bf16.mxu0 %v386_v1  ;;  %v350_v5 = vld [vmem:[%s509_s3] sm:$0xff]   ;;  %339 = vmatprep.mubr.msk.bf16.mxu1 %vm387_vm0, %v386_v1  ;;  %v351_v6 = vld [vmem:[%s509_s3 + $0x8] sm:$0xff]   ;;  %v36_v7 = vpack.c.bf16 %v35_v4, %v34_v3 }
   0x4   :  { %332 = vmatpush3.bf16.msra.mxu1 %v350_v5 }
   0x5   :  { %333 = vmatprep.subr.bf16.mxu1 %v386_v1 }
   0x6   :  { %326 = vmatpush3.bf16.msra.mxu0 %v349_v2 }
   0x7   :  { %14 = vsyncpa [#allocation3], 0  ;;  %v352_v8 = vld [vmem:[%s509_s3 + $0x10] sm:$0xff]   ;;  %v353_v9 = vld [vmem:[%s509_s3 + $0x18] sm:$0xff]   ;;  %vm147_vm2 = vcmask 523264   ;;  %s388_s30 = smov [#allocation2]  }
   0x8   :  { %334 = vmatpush3.bf16.msra.mxu1 %v351_v6  ;;  %v301_v10 = vld [vmem:[%s508_s2] ss:$0 sm:$0xff]  ;;  %s290_s10 = sshll.u32 %s388_s30, 4  ;;  %s291_s10 = int_to_ptr.vmem [resolvable:$true] %s290_s10 }
   0x9   :  { %328 = vmatmul.mubr.msk.bf16.vlgmr.msra.gmra.mrb[0].mxu0 %vm60_vm1, %v36_v7  ;;  %335 = vmatprep.subr.bf16.mxu1 %v386_v1  ;;  %v305_v20 = vld [vmem:[%s510_s4] ss:$0 sm:$0xff]  ;;  %s362_s11 = scalar_lea.vmem %s291_s10, 256  ;;  %p367_p1 = scmp.lt.s32.totalorder %s291_s10, %s291_s10 }
   0xa   :  { %v311_v48 = vld [vmem:[%s511_s5] ss:$0 sm:$0xff]  ;;  %p363_p0 = scmp.ne.s32.totalorder %s291_s10, %s362_s11  ;;  %p368_p2 = scmp.lt.s32.totalorder %s362_s11, %s362_s11 }
   0xb   :  { %v312_v50 = vld [vmem:[%s512_s6] ss:$0 sm:$0xff] }
   0xc   :  { %336 = vmatpush3.bf16.msra.mxu1 %v352_v8  ;;  %p369_p3 = por %p368_p2, %p367_p1 }
   0xd   :  { %337 = vmatprep.subr.bf16.mxu1 %v386_v1 }
   0xe   :  { %p370_p4 = pnand %p369_p3, %p363_p0 }
  0x10   :  { %338 = vmatpush3.bf16.msra.mxu1 %v353_v9 }
  0xdc   :  { %v98_v11 = vpop.f32.mrb[0].mxu0 }
  0xdd   :  { %v99_v12 = vadd.f32 %v301_v10, %v98_v11  ;;  %v329_v13 = vpop.f32.mrb[1].mxu0 }
  0xde   :  { %v101_v14 = vpop.f32.mrb[2].mxu0 }
  0xdf   :  { %v102_v15 = vadd.f32 %v301_v10, %v101_v14  ;;  %v330_v16 = vpop.f32.mrb[3].mxu0  ;;  %v105_v17 = vmax.f32 %v99_v12, 0.0  ;;  %v313_v12 = vld [vmem:[%s513_s7] ss:$0 sm:$0xff] }
  0xe0   :  { %v314_v14 = vld [vmem:[%s514_s8] ss:$0 sm:$0xff] }
  0xe1   :  { %v106_v18 = vmax.f32 %v102_v15, 0.0 }
  0xe3   :  { %v107_v19 = vpack.c.bf16 %v106_v18, %v105_v17 }
  0xe5   :  { %340 = vmatmul.mubr.msk.bf16.vlgmr.msra.gmra.mrb[0].mxu1 %vm147_vm2, %v107_v19 }
 0x1b8   :  { %v185_v21 = vpop.f32.mrb[0].mxu1 }
 0x1b9   :  { %v186_v22 = vadd.f32 %v305_v20, %v185_v21  ;;  %v341_v23 = vpop.f32.mrb[1].mxu1 }
 0x1ba   :  { %v188_v24 = vpop.f32.mrb[2].mxu1 }
 0x1bb   :  { %v189_v25 = vadd.f32 %v305_v20, %v188_v24  ;;  %v342_v26 = vpop.f32.mrb[3].mxu1  ;;  %v192_v27 = vadd.f32 %v186_v22, %v34_v3 }
 0x1bd   :  { %v194_v28 = vsel %vm60_vm1, %v192_v27, 0.0  ;;  %v193_v29 = vadd.f32 %v189_v25, %v35_v4 }
 0x1be   :  { %195 = vadd.xlane.f32.xlu0 %v194_v28 }
 0x1bf   :  { %v197_v30 = vsel %vm60_vm1, %v193_v29, 0.0 }
 0x1c2   :  { %198 = vadd.xlane.f32.xlu0 %v197_v30 }
 0x24b   :  { %v196_v31 = vpop.xlane.xlu0 %195 }
 0x24c   :  { %v201_v32 = vmul.f32 0.03125, %v196_v31 }
 0x24e   :  { %v203_v33 = vsub.f32 %v192_v27, %v201_v32 }
 0x24f   :  { %v199_v34 = vpop.xlane.xlu0 %198 }
 0x250   :  { %v202_v35 = vmul.f32 0.03125, %v199_v34  ;;  %v205_v36 = vmul.f32 %v203_v33, %v203_v33 }
 0x252   :  { %v204_v37 = vsub.f32 %v193_v29, %v202_v35  ;;  %v207_v38 = vsel %vm60_vm1, %v205_v36, 0.0 }
 0x253   :  { %208 = vadd.xlane.f32.xlu1 %v207_v38 }
 0x254   :  { %v206_v39 = vmul.f32 %v204_v37, %v204_v37 }
 0x256   :  { %v210_v40 = vsel %vm60_vm1, %v206_v39, 0.0 }
 0x257   :  { %211 = vadd.xlane.f32.xlu1 %v210_v40 }
 0x2e0   :  { %v209_v41 = vpop.xlane.xlu1 %208 }
 0x2e1   :  { %v213_v42 = vmul.f32 0.03125, %v209_v41 }
 0x2e3   :  { %v215_v43 = vadd.f32 1e-05, %v213_v42 }
 0x2e4   :  { %v212_v44 = vpop.xlane.xlu1 %211 }
 0x2e5   :  { %354 = vrsqrt.f32 %v215_v43  ;;  %v214_v45 = vmul.f32 0.03125, %v212_v44 }
 0x2e7   :  { %v216_v46 = vadd.f32 1e-05, %v214_v45 }
 0x2e9   :  { %356 = vrsqrt.f32 %v216_v46 }
 0x2ef   :  { %v355_v47 = vpop.eup %354 }
 0x2f0   :  { %v219_v49 = vmul.f32 %v355_v47, %v203_v33 }
 0x2f2   :  { %v228_v51 = vmul.f32 %v311_v48, %v219_v49 }
 0x2f3   :  { %v357_v52 = vpop.eup %356 }
 0x2f4   :  { %v237_v53 = vadd.f32 %v312_v50, %v228_v51  ;;  %v220_v54 = vmul.f32 %v357_v52, %v204_v37 }
 0x2f6   :  { %v239_v55 = vsel %vm60_vm1, %v237_v53, 0.0  ;;  %v229_v56 = vmul.f32 %v311_v48, %v220_v54 }
 0x2f7   :  { %240 = vadd.xlane.f32.xlu0 %v239_v55 }
 0x2f8   :  { %v238_v57 = vadd.f32 %v312_v50, %v229_v56 }
 0x2fa   :  { %v242_v58 = vsel %vm60_vm1, %v238_v57, 0.0 }
 0x2fb   :  { %243 = vadd.xlane.f32.xlu1 %v242_v58 }
 0x384   :  { %v241_v59 = vpop.xlane.xlu0 %240 }
 0x385   :  { %v245_v60 = vmul.f32 0.03125, %v241_v59 }
 0x387   :  { %v247_v61 = vsub.f32 %v237_v53, %v245_v60 }
 0x388   :  { %v244_v62 = vpop.xlane.xlu1 %243 }
 0x389   :  { %v246_v63 = vmul.f32 0.03125, %v244_v62  ;;  %v249_v0 = vmul.f32 %v247_v61, %v247_v61 }
 0x38b   :  { %v248_v1 = vsub.f32 %v238_v57, %v246_v63  ;;  %v251_v2 = vsel %vm60_vm1, %v249_v0, 0.0 }
 0x38c   :  { %252 = vadd.xlane.f32.xlu0 %v251_v2 }
 0x38d   :  { %v250_v3 = vmul.f32 %v248_v1, %v248_v1 }
 0x38f   :  { %v254_v4 = vsel %vm60_vm1, %v250_v3, 0.0 }
 0x390   :  { %255 = vadd.xlane.f32.xlu1 %v254_v4 }
 0x419   :  { %v253_v5 = vpop.xlane.xlu0 %252 }
 0x41a   :  { %v257_v6 = vmul.f32 0.03125, %v253_v5 }
 0x41c   :  { %v259_v7 = vadd.f32 1e-05, %v257_v6 }
 0x41d   :  { %v256_v8 = vpop.xlane.xlu1 %255 }
 0x41e   :  { %358 = vrsqrt.f32 %v259_v7  ;;  %v258_v9 = vmul.f32 0.03125, %v256_v8 }
 0x420   :  { %v260_v10 = vadd.f32 1e-05, %v258_v9 }
 0x422   :  { %360 = vrsqrt.f32 %v260_v10 }
 0x428   :  { %v359_v11 = vpop.eup %358 }
 0x429   :  { %v263_v13 = vmul.f32 %v359_v11, %v247_v61 }
 0x42b   :  { %v272_v15 = vmul.f32 %v313_v12, %v263_v13 }
 0x42c   :  { %v361_v16 = vpop.eup %360 }
 0x42d   :  { %v264_v17 = vmul.f32 %v361_v16, %v248_v1  ;;  %v281_v18 = vadd.f32 %v314_v14, %v272_v15 }
 0x42f   :  { %v273_v19 = vmul.f32 %v313_v12, %v264_v17  ;;  %283 = vst.msk [vmem:[#allocation2] sm:$0xff] %vm60_vm1, %v281_v18 }
 0x431   :  { %v282_v20 = vadd.f32 %v314_v14, %v273_v19 }
 0x433   :  { %284 = vst.msk [vmem:[#allocation2 + $0x8] sm:$0xff] %vm60_vm1, %v282_v20 }
 0x434   :  { %373 = shalt.err (!%p370_p4)
}
 0x435   :  { %s374_s12 = scalar_lea.hbm %s515_s9, 256 }
 0x436   :  { %p375_p5 = scmp.ne.s32.totalorder %s515_s9, %s374_s12  ;;  %p378_p6 = scmp.lt.u32.totalorder %s374_s12, %s515_s9 }
 0x438   :  { %p380_p7 = pnand %p378_p6, %p375_p5 }
 0x43a   :  { %383 = shalt.err (!%p380_p7)
}
 0x43b   :  { %s389_s17 = smov 128   ;;  %s390_s18 = smov 8  }
 0x43c   :  { %296 = dma.vmem_to_hbm [thread:$0]  %s291_s10, 256, %s515_s9, [#allocation3], %s389_s17, %s389_s17, %s390_s18  }
 0x43d   :  { %384 = dma.done.wait [#allocation3], 256  }
 0x43e   :  { %385 = vsyncadd [#allocation3], 4294967040 }
 0x43f   :  { %300 = vsyncpa [#allocation3], 1 }

// kernel: transformer_forward.17
= control target key start
LH: loop header
LB: loop body
LE: loop exit
PB: predicated region body
PF: predicated region fallthrough
CT: control target
= control target key end

     0   :  { %s1656_s21 = smov 0   ;;  %s1848_s0 = inlined_call_operand.vmem [shape: f32[2,8,32], index: 0, kind: input, shape index: {}]   ;;  %s1849_s1 = inlined_call_operand.vmem [shape: f32[2,8,32], index: 1, kind: input, shape index: {}]   ;;  %s1850_s2 = inlined_call_operand.vmem [shape: bf16[32,32], index: 2, kind: input, shape index: {}]   ;;  %s1851_s3 = inlined_call_operand.vmem [shape: bf16[32,32], index: 3, kind: input, shape index: {}]   ;;  %s1852_s4 = inlined_call_operand.vmem [shape: bf16[32,32], index: 4, kind: input, shape index: {}]   ;;  %s1853_s5 = inlined_call_operand.vmem [shape: bf16[4,8,32], index: 5, kind: input, shape index: {}]   ;;  %s1854_s6 = inlined_call_operand.vmem [shape: f32[1,32], index: 6, kind: input, shape index: {}]   ;;  %s1855_s7 = inlined_call_operand.vmem [shape: f32[1,32], index: 7, kind: input, shape index: {}]   ;;  %s1856_s8 = inlined_call_operand.vmem [shape: f32[1,32], index: 8, kind: input, shape index: {}]   ;;  %s1857_s9 = inlined_call_operand.vmem [shape: f32[1,32], index: 9, kind: input, shape index: {}]   ;;  %s1858_s10 = inlined_call_operand.vmem [shape: f32[1,32], index: 10, kind: input, shape index: {}]   ;;  %s1859_s11 = inlined_call_operand.vmem [shape: f32[1,32], index: 11, kind: input, shape index: {}]   ;;  %s1860_s12 = inlined_call_operand.vmem [shape: f32[2,8,32], index: 12, kind: output, shape index: {}]  }
   0x1 LB: > { %s1372_s22 = sadd.s32 4294967295, %s1584_s21   ;;  %p1376_p0 = scmp.ge.s32.totalorder %s1584_s21, 1  ;;  %s1584_s21 = sphi %s1656_s21, %s22_s21  }
   0x2   : > { %p370_p1 = scmp.lt.s32.totalorder %s1584_s21, 3 }
   0x4   : > { %p371_p2 = pnand %p1376_p0, %p370_p1 }
   0x5   : > { %v1554_v0 = vld [vmem:[%s1850_s2] sm:$0xff] (!%p371_p2)   ;;  %v1586_v1 = vmov (!%p371_p2), 0.0   ;;  %v1556_v3 = vld [vmem:[%s1850_s2 + $0x8] sm:$0xff] (!%p371_p2)   ;;  %vm1587_vm0 = vmmov (!%p371_p2), 0   ;;  %p414_p3 = scmp.lt.s32.totalorder (!%p371_p2), %s1372_s22, 1  ;;  %vm455_vm1 = vcmask (!%p371_p2), 261120  }
   0x6   : > { %374 = sbr.rel (%p371_p2) target bundleno = 2457 (0x999), region = 68  ;;  %1445 = vmatprep.subr.bf16.mxu0 (!%p371_p2), %v1586_v1  ;;  %1453 = vmatprep.subr.bf16.mxu1 (!%p371_p2), %v1586_v1  ;;  %v1555_v2 = vld [vmem:[%s1851_s3] sm:$0xff] (!%p371_p2)   ;;  %v1557_v4 = vld [vmem:[%s1851_s3 + $0x8] sm:$0xff] (!%p371_p2)   ;;  %vm631_vm2 = vcmask (!%p371_p2), 64512   ;;  %s1588_s29 = smov (!%p371_p2), 120   ;;  %vm692_vm3 = vcmask (!%p371_p2), 1043456  }
   0x7   : > { %1446 = vmatpush3.bf16.msra.mxu0 (!%p371_p2), %v1554_v0  ;;  %1449 = vmatprep.mubr.msk.bf16.mxu0 (!%p371_p2), %vm1587_vm0, %v1586_v1  ;;  %v1558_v8 = vld [vmem:[%s1852_s4] sm:$0xff] (!%p371_p2)   ;;  %v1559_v10 = vld [vmem:[%s1852_s4 + $0x8] sm:$0xff] (!%p371_p2)   ;;  %s1589_s15 = smov (!%p371_p2), 112  }
   0x8   : > { %1454 = vmatpush3.bf16.msra.mxu1 (!%p371_p2), %v1555_v2  ;;  %1447 = vmatprep.subr.bf16.mxu0 (!%p371_p2), %v1586_v1  ;;  %v1384_v12 = vld [vmem:[%s1855_s7] ss:$0 sm:$0xff] (!%p371_p2)  ;;  %v1396_v0 = vld [vmem:[%s1853_s5 + $0x4] sm:$0xf] (!%p371_p2) }
   0x9   : > { %1455 = vmatprep.subr.bf16.mxu1 (!%p371_p2), %v1586_v1  ;;  %1457 = vmatprep.mubr.msk.bf16.mxu1 (!%p371_p2), %vm1587_vm0, %v1586_v1  ;;  %v1380_v13 = vld [vmem:[%s1854_s6] ss:$0 sm:$0xff] (!%p371_p2)  ;;  %v859_v2 = vsel (!%p371_p2), %vm692_vm3, %v1396_v0, 0 }
   0xa   : > { %v1388_v27 = vld [vmem:[%s1856_s8] ss:$0 sm:$0xff] (!%p371_p2) }
   0xb   : > { %1448 = vmatpush3.bf16.msra.mxu0 (!%p371_p2), %v1556_v3  ;;  %v738_v59 = vld [vmem:[%s1853_s5] sm:$0xf] (!%p371_p2) }
   0xc   : > { %1456 = vmatpush3.bf16.msra.mxu1 (!%p371_p2), %v1557_v4  ;;  %1461 = vmatprep.subr.bf16.mxu0 (!%p371_p2), %v1586_v1  ;;  %v905_v63 = vsel (!%p371_p2), %vm692_vm3, %v738_v59, 0 }
   0xd   : > { %s1862_s22 = smov (!%p414_p3, %s1372_s22), 1  ;;  %1469 = vmatprep.subr.bf16.mxu1 %v1586_v1 }
   0xe   : > { %s1684_s13 = sshll.u32 %s1862_s22, 3 }
   0xf   : > { %s417_s16 = scalar_lea.vmem %s1848_s0, %s1684_s13  ;;  %s421_s19 = scalar_lea.vmem %s1849_s1, %s1684_s13 }
  0x10   : > { %v1695_v5 = vld [vmem:[%s417_s16] sm:$0xff]  ;;  %s1590_s16 = smov 104   ;;  %s425_s17 = scalar_lea.vmem %s1860_s12, %s1684_s13 }
  0x11   : > { %v428_v6 = vld [vmem:[%s421_s19] sm:$0xff]  ;;  %v431_v11 = vpack.c.bf16 %v1695_v5, %v1695_v5 }
  0x12   : > { %v429_v7 = vadd.f32 %v428_v6, %v1695_v5 }
  0x14   : > { %v430_v9 = vpack.c.bf16 %v429_v7, %v429_v7 }
  0x16   : > { %1450 = vmatmul.mubr.msk.bf16.vlgmr.msra.gmra.mrb[0].mxu0 %vm455_vm1, %v430_v9  ;;  %1458 = vmatmul.mubr.msk.bf16.vlgmr.msra.gmra.mrb[0].mxu1 %vm455_vm1, %v430_v9 }
  0x17   : > { %1462 = vmatpush3.bf16.msra.mxu0 %v1558_v8  ;;  %1465 = vmatprep.mubr.msk.bf16.mxu0 %vm1587_vm0, %v1586_v1 }
  0x18   : > { %1463 = vmatprep.subr.bf16.mxu0 %v1586_v1  ;;  %1471 = vmatprep.mubr.msk.bf16.mxu1 %vm1587_vm0, %v1586_v1 }
  0x1b   : > { %1464 = vmatpush3.bf16.msra.mxu0 %v1559_v10 }
  0x1c   : > { %1475 = vmatprep.subr.bf16.mxu0 %v1586_v1 }
  0x1e   : > { %1466 = vmatmul.mubr.msk.bf16.vlgmr.msra.gmra.mrb[4].mxu0 %vm455_vm1, %v431_v11 }
  0x1f   : > { %1477 = vmatprep.mubr.msk.bf16.mxu0 %vm1587_vm0, %v1586_v1 }
  0xe9   : > { %v556_v14 = vpop.f32.mrb[0].mxu1  ;;  %v493_v15 = vpop.f32.mrb[0].mxu0 }
  0xea   : > { %v557_v16 = vadd.f32 %v1384_v12, %v556_v14  ;;  %v1459_v17 = vpop.f32.mrb[1].mxu1  ;;  %v494_v18 = vadd.f32 %v1380_v13, %v493_v15  ;;  %v1451_v19 = vpop.f32.mrb[1].mxu0 }
  0xeb   : > { %v559_v20 = vpop.f32.mrb[2].mxu1  ;;  %v496_v21 = vpop.f32.mrb[2].mxu0 }
  0xec   : > { %v1724_v22 = vpack.c.bf16 %v557_v16, %v557_v16  ;;  %v1460_v23 = vpop.f32.mrb[3].mxu1  ;;  %v1452_v24 = vpop.f32.mrb[3].mxu0  ;;  %v1726_v25 = vpack.c.bf16 %v494_v18, %v494_v18 }
  0xee   : > { %743 = vrot.lane.b32.xlu0 %v1724_v22, %s1588_s29  ;;  %v636_v26 = vsel %vm631_vm2, %v1724_v22, 0 }
  0xef   : > { %1470 = vmatpush3.bf16.xpose.msra.mxu1 %v636_v26 }
  0xf0   : > { %1481 = vmatprep.subr.bf16.mxu1 %v1586_v1 }
  0xf1   : > { %v622_v28 = vpop.f32.mrb[4].mxu0 }
  0xf2   : > { %v623_v29 = vadd.f32 %v1388_v27, %v622_v28  ;;  %740 = vrot.lane.b32.xlu0 %v1726_v25, %s1588_s29  ;;  %v1467_v30 = vpop.f32.mrb[5].mxu0 }
  0xf3   : > { %v625_v31 = vpop.f32.mrb[6].mxu0 }
  0xf4   : > { %v1736_v32 = vpack.c.bf16 %v623_v29, %v623_v29  ;;  %v1468_v33 = vpop.f32.mrb[7].mxu0 }
  0xf6   : > { %1472 = vmatmul.mubr.msk.bf16.vlgmr.msra.gmra.mrb[4].mxu1 %vm631_vm2, %v1726_v25  ;;  %803 = vrot.lane.b32.xlu0 %v1736_v32, %s1588_s29  ;;  %v694_v42 = vsel %vm692_vm3, %v1736_v32, 0 }
  0xf7   : > { %1483 = vmatprep.mubr.msk.bf16.mxu1 %vm1587_vm0, %v1586_v1  ;;  %1476 = vmatpush3.bf16.msra.mxu0 %v694_v42 }
  0xf8   : > { %1487 = vmatprep.subr.bf16.mxu0 %v1586_v1 }
  0xfa   : > { %949 = vrot.lane.b32.xlu0 %v1724_v22, %s1589_s15 }
 0x160   : > { %v744_v34 = vpop.permute.xlu0 %743 }
 0x161   : > { %v749_v35 = vsel %vm631_vm2, %v744_v34, 0 }
 0x162   : > { %1482 = vmatpush3.bf16.xpose.msra.mxu1 %v749_v35 }
 0x163   : > { %1493 = vmatprep.subr.bf16.mxu1 %v1586_v1 }
 0x164   : > { %v741_v36 = vpop.permute.xlu0 %740 }
 0x168   : > { %v804_v52 = vpop.permute.xlu0 %803 }
 0x169   : > { %1484 = vmatmul.mubr.msk.bf16.vlgmr.msra.gmra.mrb[8].mxu1 %vm631_vm2, %v741_v36  ;;  %v809_v53 = vsel %vm692_vm3, %v804_v52, 0 }
 0x16a   : > { %1495 = vmatprep.mubr.msk.bf16.mxu1 %vm1587_vm0, %v1586_v1  ;;  %1494 = vmatpush3.bf16.msra.mxu1 %v859_v2 }
 0x16b   : > { %1505 = vmatprep.subr.bf16.mxu1 %v1586_v1 }
 0x16c   : > { %v950_v3 = vpop.permute.xlu0 %949 }
 0x16d   : > { %v955_v24 = vsel %vm631_vm2, %v950_v3, 0 }
 0x1c9   : > { %v672_v37 = vpop.f32.mrb[4].mxu1 }
 0x1ca   : > { %v1473_v38 = vpop.f32.mrb[5].mxu1  ;;  %v678_v39 = vsel %vm631_vm2, %v672_v37, -inf }
 0x1cb   : > { %679 = vmax.xlane.f32.xlu1 %v678_v39  ;;  %v675_v40 = vpop.f32.mrb[6].mxu1 }
 0x1cc   : > { %v1474_v41 = vpop.f32.mrb[7].mxu1 }
 0x23c   : > { %v785_v43 = vpop.f32.mrb[8].mxu1 }
 0x23d   : > { %v1485_v44 = vpop.f32.mrb[9].mxu1  ;;  %v791_v45 = vsel %vm631_vm2, %v785_v43, -inf }
 0x23e   : > { %792 = vmax.xlane.f32.xlu1 %v791_v45  ;;  %v788_v46 = vpop.f32.mrb[10].mxu1 }
 0x23f   : > { %v1486_v47 = vpop.f32.mrb[11].mxu1 }
 0x258   : > { %v680_v48 = vpop.xlane.xlu1 %679 }
 0x259   : > { %v681_v49 = vsub.f32 %v672_v37, %v680_v48 }
 0x25b   : > { %v682_v50 = vmul.f32 1.442695, %v681_v49  ;;  %v1401_v49 = vld [vmem:[%s1853_s5 + $0x8] sm:$0xf] }
 0x25d   : > { %1560 = vpow2.f32 %v682_v50  ;;  %v1064_v50 = vsel %vm692_vm3, %v1401_v49, 0 }
 0x267   : > { %v1561_v51 = vpop.eup %1560 }
 0x268   : > { %v684_v54 = vsel %vm631_vm2, %v1561_v51, 0.0  ;;  %v688_v55 = vpack.c.bf16 %v1561_v51, %v1561_v51 }
 0x269   : > { %685 = vadd.xlane.f32.xlu0 %v684_v54 }
 0x26a   : > { %1478 = vmatmul.mubr.msk.bf16.vlgmr.msra.gmra.mrb[8].mxu0 %vm631_vm2, %v688_v55 }
 0x26b   : > { %1488 = vmatpush3.bf16.msra.mxu0 %v809_v53  ;;  %1489 = vmatprep.mubr.msk.bf16.mxu0 %vm1587_vm0, %v1586_v1 }
 0x26c   : > { %1499 = vmatprep.subr.bf16.mxu0 %v1586_v1 }
 0x27f   : > { %1008 = vrot.lane.b32.xlu0 %v1736_v32, %s1589_s15 }
 0x283   : > { %1107 = vrot.lane.b32.xlu0 %v1726_v25, %s1590_s16 }
 0x2cb   : > { %v793_v56 = vpop.xlane.xlu1 %792 }
 0x2cc   : > { %v794_v57 = vsub.f32 %v785_v43, %v793_v56 }
 0x2ce   : > { %v795_v58 = vmul.f32 1.442695, %v794_v57 }
 0x2d0   : > { %1562 = vpow2.f32 %v795_v58 }
 0x2da   : > { %v1563_v60 = vpop.eup %1562 }
 0x2db   : > { %v797_v61 = vsel %vm631_vm2, %v1563_v60, 0.0  ;;  %v801_v62 = vpack.c.bf16 %v1563_v60, %v1563_v60 }
 0x2dc   : > { %798 = vadd.xlane.f32.xlu1 %v797_v61 }
 0x2dd   : > { %1490 = vmatmul.mubr.msk.bf16.vlgmr.msra.gmra.mrb[12].mxu0 %vm631_vm2, %v801_v62 }
 0x2de   : > { %1500 = vmatpush3.bf16.msra.mxu0 %v905_v63  ;;  %1501 = vmatprep.mubr.msk.bf16.mxu0 %vm1587_vm0, %v1586_v1 }
 0x2df   : > { %1511 = vmatprep.subr.bf16.mxu0 %v1586_v1 }
 0x2ed   : > { %947 = vrot.lane.b32.xlu1 %v1726_v25, %s1589_s15 }
 0x2f6   : > { %v686_v4 = vpop.xlane.xlu0 %685 }
 0x2f7   : > { %1564 = vrcp.f32 %v686_v4 }
 0x2fa   : > { %v1009_v10 = vpop.permute.xlu0 %1008 }
 0x2fb   : > { %v1014_v14 = vsel %vm692_vm3, %v1009_v10, 0 }
 0x301   : > { %v1565_v6 = vpop.eup %1564 }
 0x33d   : > { %v730_v7 = vpop.f32.mrb[8].mxu0 }
 0x33e   : > { %v736_v8 = vmul.f32 %v1565_v6, %v730_v7  ;;  %v1479_v9 = vpop.f32.mrb[9].mxu0 }
 0x33f   : > { %v733_v11 = vpop.f32.mrb[10].mxu0 }
 0x340   : > { %v737_v12 = vpack.c.bf16 %v736_v8, %v736_v8  ;;  %v1480_v13 = vpop.f32.mrb[11].mxu0 }
 0x342   : > { %1502 = vmatmul.mubr.msk.bf16.vlgmr.msra.gmra.mrb[16].mxu0 %vm631_vm2, %v737_v12 }
 0x343   : > { %1512 = vmatpush3.bf16.msra.mxu0 %v1014_v14  ;;  %1513 = vmatprep.mubr.msk.bf16.mxu0 %vm1587_vm0, %v1586_v1 }
 0x344   : > { %1523 = vmatprep.subr.bf16.mxu0 %v1586_v1 }
 0x369   : > { %v799_v15 = vpop.xlane.xlu1 %798 }
 0x36a   : > { %1566 = vrcp.f32 %v799_v15 }
 0x36d   : > { %v948_v25 = vpop.permute.xlu1 %947 }
 0x374   : > { %v1567_v16 = vpop.eup %1566 }
 0x3b0   : > { %v845_v17 = vpop.f32.mrb[12].mxu0 }
 0x3b1   : > { %v851_v18 = vmul.f32 %v1567_v16, %v845_v17  ;;  %v1491_v19 = vpop.f32.mrb[13].mxu0 }
 0x3b2   : > { %v848_v20 = vpop.f32.mrb[14].mxu0 }
 0x3b3   : > { %v852_v21 = vpack.c.bf16 %v851_v18, %v851_v18  ;;  %v1492_v23 = vpop.f32.mrb[15].mxu0 }
 0x3b5   : > { %1496 = vmatmul.mubr.msk.bf16.vlgmr.msra.gmra.mrb[12].mxu1 %vm631_vm2, %v852_v21 }
 0x3b6   : > { %1506 = vmatpush3.bf16.xpose.msra.mxu1 %v955_v24  ;;  %1507 = vmatprep.mubr.msk.bf16.mxu1 %vm1587_vm0, %v1586_v1 }
 0x3b7   : > { %1517 = vmatprep.subr.bf16.mxu1 %v1586_v1 }
 0x3bd   : > { %1508 = vmatmul.mubr.msk.bf16.vlgmr.msra.gmra.mrb[16].mxu1 %vm631_vm2, %v948_v25  ;;  %v1407_v25 = vld [vmem:[%s1857_s9] ss:$0 sm:$0xff] }
 0x3be   : > { %1519 = vmatprep.mubr.msk.bf16.mxu1 %vm1587_vm0, %v1586_v1  ;;  %1518 = vmatpush3.bf16.msra.mxu1 %v1064_v50 }
 0x3bf   : > { %1529 = vmatprep.subr.bf16.mxu1 %v1586_v1 }
 0x415   : > { %v941_v26 = vpop.f32.mrb[16].mxu0 }
 0x416   : > { %v1503_v27 = vpop.f32.mrb[17].mxu0 }
 0x417   : > { %v944_v28 = vpop.f32.mrb[18].mxu0 }
 0x418   : > { %v1504_v29 = vpop.f32.mrb[19].mxu0 }
 0x488   : > { %v895_v30 = vpop.f32.mrb[12].mxu1 }
 0x489   : > { %v1794_v31 = vadd.f32 %v941_v26, %v895_v30  ;;  %v1497_v33 = vpop.f32.mrb[13].mxu1 }
 0x48a   : > { %v898_v34 = vpop.f32.mrb[14].mxu1 }
 0x48b   : > { %v1498_v35 = vpop.f32.mrb[15].mxu1 }
 0x490   : > { %v991_v36 = vpop.f32.mrb[16].mxu1 }
 0x491   : > { %v1509_v37 = vpop.f32.mrb[17].mxu1  ;;  %v997_v38 = vsel %vm631_vm2, %v991_v36, -inf }
 0x492   : > { %998 = vmax.xlane.f32.xlu1 %v997_v38  ;;  %v994_v39 = vpop.f32.mrb[18].mxu1 }
 0x493   : > { %v1510_v40 = vpop.f32.mrb[19].mxu1 }
 0x4a3   : > { %1109 = vrot.lane.b32.xlu1 %v1724_v22, %s1590_s16  ;;  %v1108_v22 = vpop.permute.xlu0 %1107 }
 0x51f   : > { %v999_v41 = vpop.xlane.xlu1 %998 }
 0x520   : > { %v1000_v42 = vsub.f32 %v991_v36, %v999_v41 }
 0x522   : > { %v1001_v43 = vmul.f32 1.442695, %v1000_v42 }
 0x523   : > { %v1110_v45 = vpop.permute.xlu1 %1109 }
 0x524   : > { %1568 = vpow2.f32 %v1001_v43  ;;  %v1115_v48 = vsel %vm631_vm2, %v1110_v45, 0 }
 0x52e   : > { %v1569_v44 = vpop.eup %1568 }
 0x52f   : > { %v1003_v46 = vsel %vm631_vm2, %v1569_v44, 0.0  ;;  %v1007_v47 = vpack.c.bf16 %v1569_v44, %v1569_v44  ;;  %v1409_v44 = vld [vmem:[%s1859_s11] ss:$0 sm:$0xff] }
 0x530   : > { %1004 = vadd.xlane.f32.xlu0 %v1003_v46 }
 0x531   : > { %1514 = vmatmul.mubr.msk.bf16.vlgmr.msra.gmra.mrb[20].mxu0 %vm631_vm2, %v1007_v47 }
 0x532   : > { %1524 = vmatpush3.bf16.xpose.msra.mxu0 %v1115_v48  ;;  %1525 = vmatprep.mubr.msk.bf16.mxu0 %vm1587_vm0, %v1586_v1 }
 0x533   : > { %1535 = vmatprep.subr.bf16.mxu0 %v1586_v1 }
 0x539   : > { %1526 = vmatmul.mubr.msk.bf16.vlgmr.msra.gmra.mrb[24].mxu0 %vm631_vm2, %v1108_v22 }
 0x53a   : > { %1537 = vmatprep.mubr.msk.bf16.mxu0 %vm1587_vm0, %v1586_v1 }
 0x546   : > { %1168 = vrot.lane.b32.xlu0 %v1736_v32, %s1590_s16 }
 0x5bd   : > { %v1005_v51 = vpop.xlane.xlu0 %1004 }
 0x5be   : > { %1570 = vrcp.f32 %v1005_v51 }
 0x5c1   : > { %v1169_v56 = vpop.permute.xlu0 %1168 }
 0x5c2   : > { %v1174_v32 = vsel %vm692_vm3, %v1169_v56, 0 }
 0x5c8   : > { %v1571_v52 = vpop.eup %1570 }
 0x604   : > { %v1050_v53 = vpop.f32.mrb[20].mxu0 }
 0x605   : > { %v1056_v54 = vmul.f32 %v1571_v52, %v1050_v53  ;;  %v1515_v55 = vpop.f32.mrb[21].mxu0 }
 0x606   : > { %v1053_v57 = vpop.f32.mrb[22].mxu0 }
 0x607   : > { %v1057_v58 = vpack.c.bf16 %v1056_v54, %v1056_v54  ;;  %v1516_v59 = vpop.f32.mrb[23].mxu0 }
 0x609   : > { %1520 = vmatmul.mubr.msk.bf16.vlgmr.msra.gmra.mrb[20].mxu1 %vm631_vm2, %v1057_v58 }
 0x60a   : > { %1530 = vmatpush3.bf16.msra.mxu1 %v1174_v32  ;;  %1531 = vmatprep.mubr.msk.bf16.mxu1 %vm1587_vm0, %v1586_v1  ;;  %v1405_v1 = vld [vmem:[%s1853_s5 + $0xc] sm:$0xf] }
 0x60b   : > { %v1224_v9 = vsel %vm692_vm3, %v1405_v1, 0 }
 0x60c   : > { %v1151_v60 = vpop.f32.mrb[24].mxu0  ;;  %1536 = vmatpush3.bf16.msra.mxu0 %v1224_v9 }
 0x60d   : > { %v1527_v61 = vpop.f32.mrb[25].mxu0  ;;  %v1157_v62 = vsel %vm631_vm2, %v1151_v60, -inf }
 0x60e   : > { %1158 = vmax.xlane.f32.xlu1 %v1157_v62  ;;  %v1154_v63 = vpop.f32.mrb[26].mxu0 }
 0x60f   : > { %v1528_v0 = vpop.f32.mrb[27].mxu0 }
 0x69b   : > { %v1159_v2 = vpop.xlane.xlu1 %1158 }
 0x69c   : > { %v1160_v3 = vsub.f32 %v1151_v60, %v1159_v2 }
 0x69e   : > { %v1161_v4 = vmul.f32 1.442695, %v1160_v3 }
 0x6a0   : > { %1572 = vpow2.f32 %v1161_v4 }
 0x6aa   : > { %v1573_v6 = vpop.eup %1572 }
 0x6ab   : > { %v1163_v7 = vsel %vm631_vm2, %v1573_v6, 0.0  ;;  %v1167_v8 = vpack.c.bf16 %v1573_v6, %v1573_v6 }
 0x6ac   : > { %1164 = vadd.xlane.f32.xlu1 %v1163_v7 }
 0x6ad   : > { %1532 = vmatmul.mubr.msk.bf16.vlgmr.msra.gmra.mrb[24].mxu1 %vm631_vm2, %v1167_v8 }
 0x6dc   : > { %v1100_v10 = vpop.f32.mrb[20].mxu1 }
 0x6dd   : > { %v1106_v11 = vadd.f32 %v1100_v10, %v1794_v31  ;;  %v1521_v12 = vpop.f32.mrb[21].mxu1 }
 0x6de   : > { %v1103_v13 = vpop.f32.mrb[22].mxu1 }
 0x6df   : > { %v1522_v14 = vpop.f32.mrb[23].mxu1 }
 0x739   : > { %v1165_v15 = vpop.xlane.xlu1 %1164 }
 0x73a   : > { %1574 = vrcp.f32 %v1165_v15 }
 0x744   : > { %v1575_v16 = vpop.eup %1574 }
 0x780   : > { %v1210_v17 = vpop.f32.mrb[24].mxu1 }
 0x781   : > { %v1216_v18 = vmul.f32 %v1575_v16, %v1210_v17  ;;  %v1533_v19 = vpop.f32.mrb[25].mxu1 }
 0x782   : > { %v1213_v20 = vpop.f32.mrb[26].mxu1 }
 0x783   : > { %v1217_v21 = vpack.c.bf16 %v1216_v18, %v1216_v18  ;;  %v1534_v23 = vpop.f32.mrb[27].mxu1 }
 0x785   : > { %1538 = vmatmul.mubr.msk.bf16.vlgmr.msra.gmra.mrb[28].mxu0 %vm631_vm2, %v1217_v21 }
 0x858   : > { %v1260_v24 = vpop.f32.mrb[28].mxu0 }
 0x859   : > { %v1266_v26 = vadd.f32 %v1260_v24, %v1106_v11  ;;  %v1539_v27 = vpop.f32.mrb[29].mxu0 }
 0x85a   : > { %v1263_v28 = vpop.f32.mrb[30].mxu0 }
 0x85b   : > { %v1274_v29 = vadd.f32 %v1407_v25, %v1266_v26  ;;  %v1540_v30 = vpop.f32.mrb[31].mxu0 }
 0x85d   : > { %v1275_v31 = vadd.f32 %v1274_v29, %v1695_v5  ;;  %v1408_v5 = vld [vmem:[%s1858_s10] ss:$0 sm:$0xff] }
 0x85f   : > { %v1276_v33 = vsel %vm455_vm1, %v1275_v31, 0.0 }
 0x860   : > { %1277 = vadd.xlane.f32.xlu1 %v1276_v33 }
 0x8ed   : > { %v1278_v34 = vpop.xlane.xlu1 %1277 }
 0x8ee   : > { %v1280_v35 = vmul.f32 0.03125, %v1278_v34 }
 0x8f0   : > { %v1281_v36 = vsub.f32 %v1275_v31, %v1280_v35 }
 0x8f2   : > { %v1282_v37 = vmul.f32 %v1281_v36, %v1281_v36 }
 0x8f4   : > { %v1283_v38 = vsel %vm455_vm1, %v1282_v37, 0.0 }
 0x8f5   : > { %1284 = vadd.xlane.f32.xlu0 %v1283_v38 }
 0x982   : > { %v1285_v39 = vpop.xlane.xlu0 %1284 }
 0x983   : > { %v1286_v40 = vmul.f32 0.03125, %v1285_v39 }
 0x985   : > { %v1287_v41 = vadd.f32 1e-05, %v1286_v40 }
 0x987   : > { %1576 = vrsqrt.f32 %v1287_v41 }
 0x991   : > { %v1577_v42 = vpop.eup %1576 }
 0x992   : > { %v1289_v43 = vmul.f32 %v1577_v42, %v1281_v36 }
 0x994   : > { %v1297_v45 = vmul.f32 %v1408_v5, %v1289_v43 }
 0x996   : > { %v1305_v46 = vadd.f32 %v1409_v44, %v1297_v45 }
 0x998   : > { %1306 = vst.msk [vmem:[%s425_s17] sm:$0xff] %vm455_vm1, %v1305_v46 }
 0x999 PF: > { %s22_s21 = sadd.s32 1, %s1584_s21  }
 0x99a   : > { %p19_p4 = scmp.ge.s32.totalorder %s22_s21, 4  }
 0x99c   :  { %21 = sbr.rel (!%p19_p4) target bundleno = 1 (0x1), region = 104 }

</bundles_post_ra>
